<compile_context>
chip_gen: v7x
topology: tpu7x:2x2x1
jax: 0.10.0
libtpu: 0.0.40
codegen_flags: <defaults>
</compile_context>

<pallas_src>
import functools

import jax
import jax.numpy as jnp
from jax.experimental import pallas as pl
from jax.experimental.pallas import tpu as pltpu


def _ceil_to(a, m):
    return (a + m - 1) // m * m


_TILE_M = 1024                      # M tile for large-batch conv matmuls
_VMEM_LIMIT = 32 * 1024 * 1024      # safe on v5e/v6e (128 MiB) and v7x (64 MiB)


# ------------------------------ Pallas kernels ------------------------------ #
def _matmul_bias_relu_kernel(x_ref, w_ref, b_ref, o_ref):
    """o = relu(x @ w + b); bf16 operands, f32 MXU accumulation, bf16 out."""
    acc = jnp.dot(x_ref[...], w_ref[...], preferred_element_type=jnp.float32)
    o_ref[...] = jnp.maximum(acc + b_ref[...], 0.0).astype(o_ref.dtype)


def _conv3_fc_head_kernel(p3_ref, w3_ref, b3_ref, w1_ref, b1_ref, w2_ref, b2_ref,
                          o_ref, *, bp):
    """Fused conv3 (as matmul) + ReLU + flatten + FC1 + ReLU + FC2.

    p3_ref rows are ordered (spatial position p, batch b) with b padded to bp
    (multiple of 8), so the NHWC flatten of the conv3 output reduces to
    vreg-aligned row slices: h[b] = sum_p a[p*bp + b] @ w1[p*64:(p+1)*64].
    Padded batch rows only pollute their own output rows (sliced off outside).
    """
    a = jnp.dot(p3_ref[...], w3_ref[...], preferred_element_type=jnp.float32)
    a = jnp.maximum(a + b3_ref[...], 0.0)                       # (16*bp, 64) f32
    h = jnp.zeros((bp, 512), jnp.float32)
    for p in range(16):                                         # unrolled at trace time
        ap = a[p * bp:(p + 1) * bp, :].astype(jnp.bfloat16)     # 8-aligned slice
        h = h + jnp.dot(ap, w1_ref[p * 64:(p + 1) * 64, :],
                        preferred_element_type=jnp.float32)
    h = jnp.maximum(h + b1_ref[...], 0.0).astype(jnp.bfloat16)
    o_ref[...] = (jnp.dot(h, w2_ref[...], preferred_element_type=jnp.float32)
                  + b2_ref[...])


# ------------------------------ call wrappers -------------------------------- #
def _m_tiling(M):
    """(tile_m, grid_m): full tile for tiny M, balanced 2-way split for mid M
    (keeps both v7x TensorCores busy), fixed 1024-row tiles for large M."""
    if M <= 256:
        return M, 1                                   # full-dim block, no alignment need
    if M <= 2 * _TILE_M:
        tile = _ceil_to((M + 1) // 2, 8)
        return tile, pl.cdiv(M, tile)
    return _TILE_M, pl.cdiv(M, _TILE_M)


def pallas_matmul_bias_relu(x, w, b):
    """relu(x @ w + b): x (M,K) bf16, w (K,N) bf16, b (1,N) f32 -> (M,N) bf16."""
    M, K = x.shape
    _, N = w.shape
    tile_m, grid_m = _m_tiling(M)
    return pl.pallas_call(
        _matmul_bias_relu_kernel,
        out_shape=jax.ShapeDtypeStruct((M, N), jnp.bfloat16),
        grid=(grid_m,),
        in_specs=[
            pl.BlockSpec((tile_m, K), lambda i: (i, 0)),
            pl.BlockSpec((K, N), lambda i: (0, 0)),
            pl.BlockSpec((1, N), lambda i: (0, 0)),
        ],
        out_specs=pl.BlockSpec((tile_m, N), lambda i: (i, 0)),
        compiler_params=pltpu.CompilerParams(
            dimension_semantics=("parallel",),
            vmem_limit_bytes=_VMEM_LIMIT),
        cost_estimate=pl.CostEstimate(
            flops=2 * M * K * N, transcendentals=0,
            bytes_accessed=M * K * 2 + K * N * 2 + N * 4 + M * N * 2),
    )(x, w, b)


def pallas_conv3_fc_head(p3, w3, b3, w1, b1, w2, b2, *, bp):
    """Fused conv3 + FC head; everything VMEM-resident, one launch."""
    m3, k3 = p3.shape                   # (16*bp, 576)
    n2 = w2.shape[1]
    flops = 2 * (m3 * k3 * 64 + bp * 1024 * 512 + bp * 512 * n2)
    bytes_accessed = (m3 * k3 * 2 + k3 * 64 * 2 + 64 * 4 + 1024 * 512 * 2
                      + 512 * 4 + 512 * n2 * 2 + n2 * 4 + bp * n2 * 4)
    return pl.pallas_call(
        functools.partial(_conv3_fc_head_kernel, bp=bp),
        out_shape=jax.ShapeDtypeStruct((bp, n2), jnp.float32),
        in_specs=[pl.BlockSpec(memory_space=pltpu.MemorySpace.VMEM)] * 7,
        out_specs=pl.BlockSpec(memory_space=pltpu.MemorySpace.VMEM),
        compiler_params=pltpu.CompilerParams(vmem_limit_bytes=_VMEM_LIMIT),
        cost_estimate=pl.CostEstimate(
            flops=flops, transcendentals=0, bytes_accessed=bytes_accessed),
    )(p3, w3, b3, w1, b1, w2, b2)


# ----------------------------- im2col (XLA glue) ----------------------------- #
def _im2col_k2s(x, kh, kw, stride):
    """NHWC im2col for the kw == 2*stride case (conv1: 8/4, conv2: 4/2).

    Each kh offset contributes one lane span of width kw*C built from two
    stride-aligned W blocks, so there are kh concat pieces (lane-width kw*C)
    instead of kh*kw pieces of lane-width C.  Column order (kh, kw, c)."""
    B, H, W, C = x.shape
    assert kw == 2 * stride and W % stride == 0
    oh = (H - kh) // stride + 1
    ow = (W - kw) // stride + 1
    nblk = W // stride
    pieces = []
    for i in range(kh):
        rows = x[:, i:i + stride * (oh - 1) + 1:stride]          # (B, oh, W, C)
        rows = rows.reshape(B, oh, nblk, stride * C)
        pieces.append(jnp.concatenate(
            [rows[:, :, :ow, :], rows[:, :, 1:ow + 1, :]], axis=-1))
    patches = jnp.concatenate(pieces, axis=-1)                   # (B, oh, ow, kh*kw*C)
    return patches.reshape(B * oh * ow, kh * kw * C), oh, ow


def _conv3_patches_pmajor(y, bp):
    """conv3 (3x3, stride 2) im2col of y (B, 9, 9, 64), rows ordered
    (spatial-position-major, batch-minor), batch zero-padded to bp."""
    B, H, W, C = y.shape
    oh = (H - 3) // 2 + 1
    ow = (W - 3) // 2 + 1
    cols = [y[:, i:i + 2 * (oh - 1) + 1:2, j:j + 2 * (ow - 1) + 1:2, :]
            for i in range(3) for j in range(3)]
    p = jnp.concatenate(cols, axis=-1)                           # (B, oh, ow, 576)
    if bp != B:
        p = jnp.zeros((bp,) + p.shape[1:], p.dtype).at[:B].set(p)
    p = p.transpose(1, 2, 0, 3)                                  # (oh, ow, bp, 576)
    return p.reshape(oh * ow * bp, 3 * 3 * C)


# --------------------------------- params ------------------------------------ #
def init_dqn_params(key, in_channels, n_actions):
    ks = jax.random.split(key, 10)

    def u(k, shape, fan_in):
        bound = 1.0 / jnp.sqrt(fan_in)
        return jax.random.uniform(k, shape, jnp.float32, -bound, bound)

    return {
        "c1w": u(ks[0], (32, in_channels, 8, 8), in_channels * 8 * 8),
        "c1b": u(ks[1], (32,), in_channels * 8 * 8),
        "c2w": u(ks[2], (64, 32, 4, 4), 32 * 4 * 4),
        "c2b": u(ks[3], (64,), 32 * 4 * 4),
        "c3w": u(ks[4], (64, 64, 3, 3), 64 * 3 * 3),
        "c3b": u(ks[5], (64,), 64 * 3 * 3),
        "f1w": u(ks[6], (64 * 4 * 4, 512), 64 * 4 * 4),
        "f1b": u(ks[7], (512,), 64 * 4 * 4),
        "f2w": u(ks[8], (512, n_actions), 512),
        "f2b": u(ks[9], (n_actions,), 512),
    }


def _pad2d(a, rows, cols):
    return jnp.zeros((rows, cols), a.dtype).at[:a.shape[0], :a.shape[1]].set(a)


def pack_params(params):
    """One-time packing: (K, N) layout, bf16 weights, f32 (1, N) biases.
    Conv N stays exact (32/64/64); only the final FC2 N is padded to 128.
    FC1 rows are permuted from PyTorch (c, h, w) flatten order to NHWC (h, w, c)."""
    def pack_conv(w, b):
        oc, ic, kh, kw = w.shape
        wm = w.transpose(2, 3, 1, 0).reshape(kh * kw * ic, oc)   # (kh,kw,c) x oc
        return wm.astype(jnp.bfloat16), b.astype(jnp.float32).reshape(1, oc)

    f1w_nhwc = (params["f1w"].reshape(64, 4, 4, 512)
                .transpose(1, 2, 0, 3).reshape(64 * 4 * 4, 512))
    n_actions = params["f2w"].shape[1]
    np2 = _ceil_to(n_actions, 128)

    packed = {}
    packed["c1w"], packed["c1b"] = pack_conv(params["c1w"], params["c1b"])
    packed["c2w"], packed["c2b"] = pack_conv(params["c2w"], params["c2b"])
    packed["c3w"], packed["c3b"] = pack_conv(params["c3w"], params["c3b"])
    packed["f1w"] = f1w_nhwc.astype(jnp.bfloat16)
    packed["f1b"] = params["f1b"].astype(jnp.float32).reshape(1, 512)
    packed["f2w"] = _pad2d(params["f2w"].astype(jnp.bfloat16), 512, np2)
    packed["f2b"] = _pad2d(params["f2b"].astype(jnp.float32).reshape(1, n_actions), 1, np2)
    return packed


# --------------------------------- forward ----------------------------------- #
@functools.partial(jax.jit, static_argnames=("n_actions",))
def dqn_forward(packed, x, *, n_actions):
    """x: (B, C, 84, 84) NCHW f32 (PyTorch convention) -> (B, n_actions) f32."""
    B = x.shape[0]
    x = x.transpose(0, 2, 3, 1).astype(jnp.bfloat16)             # NHWC + bf16, once

    p1, oh1, ow1 = _im2col_k2s(x, 8, 8, 4)                       # (B*400, 256)
    y1 = pallas_matmul_bias_relu(p1, packed["c1w"], packed["c1b"])
    y1 = y1.reshape(B, oh1, ow1, 32)

    p2, oh2, ow2 = _im2col_k2s(y1, 4, 4, 2)                      # (B*81, 512)
    y2 = pallas_matmul_bias_relu(p2, packed["c2w"], packed["c2b"])
    y2 = y2.reshape(B, oh2, ow2, 64)

    bp = _ceil_to(max(B, 1), 8)
    p3 = _conv3_patches_pmajor(y2, bp)                           # (16*bp, 576)
    q = pallas_conv3_fc_head(p3, packed["c3w"], packed["c3b"],
                             packed["f1w"], packed["f1b"],
                             packed["f2w"], packed["f2b"], bp=bp)
    return q[:B, :n_actions]


def dqn_forward_ref(params, x):
    """Pure-JAX f32 reference (lax.conv, NCHW) for correctness checking."""
    def conv(x, w, b, s, relu=True):
        y = jax.lax.conv_general_dilated(
            x, w, window_strides=(s, s), padding="VALID",
            dimension_numbers=("NCHW", "OIHW", "NCHW"))
        y = y + b[None, :, None, None]
        return jnp.maximum(y, 0.0) if relu else y
    x = conv(x, params["c1w"], params["c1b"], 4)
    x = conv(x, params["c2w"], params["c2b"], 2)
    x = conv(x, params["c3w"], params["c3b"], 2)
    x = x.reshape(x.shape[0], -1)
    x = jnp.maximum(x @ params["f1w"] + params["f1b"], 0.0)
    return x @ params["f2w"] + params["f2b"]


if __name__ == "__main__":
    key = jax.random.PRNGKey(0)
    k_param, k_x = jax.random.split(key)

    # 84x84 spatial is forced by the fc layer's 64*4*4 input; channels = 4.
    batch, in_channels, n_actions = 2, 4, 6
    params = init_dqn_params(k_param, in_channels, n_actions)
    packed = pack_params(params)       # one-time weight packing (not per forward)

    x = jax.random.normal(k_x, (batch, in_channels, 84, 84), jnp.float32)

    out = jax.block_until_ready(dqn_forward(packed, x, n_actions=n_actions))
    assert out.shape == (batch, n_actions), out.shape

    ref = jax.block_until_ready(dqn_forward_ref(params, x))
    max_err = float(jnp.max(jnp.abs(out - ref)))
    assert jnp.allclose(out, ref, rtol=2e-2, atol=2e-2), max_err

    print("KERNEL_OK")
</pallas_src>

<mosaic_0001>
module attributes {stable_mosaic.version = 11 : i64} {
  func.func @_matmul_bias_relu_kernel(%arg0: i32, %arg1: memref<400x256xbf16, #tpu.memory_space<vmem>>, %arg2: memref<256x32xbf16, #tpu.memory_space<vmem>>, %arg3: memref<1x32xf32, #tpu.memory_space<vmem>>, %arg4: memref<400x32xbf16, #tpu.memory_space<vmem>>) attributes {dimension_semantics = [#tpu.dimension_semantics<parallel>], iteration_bounds = array<i64: 2>, scalar_prefetch = 0 : i64, scratch_operands = 0 : i64, tpu.core_type = #tpu.core_type<tc>, window_params = [{transform_indices = @transform_0, window_bounds = array<i64: 400, 256>}, {pipeline_mode = #tpu.pipeline_mode<synchronous>, transform_indices = @transform_1, window_bounds = array<i64: 256, 32>}, {pipeline_mode = #tpu.pipeline_mode<synchronous>, transform_indices = @transform_2, window_bounds = array<i64: 1, 32>}, {transform_indices = @transform_3, window_bounds = array<i64: 400, 32>}]} {
    %c0 = arith.constant 0 : index
    %c0_0 = arith.constant 0 : index
    %0 = vector.load %arg1[%c0, %c0_0] : memref<400x256xbf16, #tpu.memory_space<vmem>>, vector<400x256xbf16>
    %c0_1 = arith.constant 0 : index
    %c0_2 = arith.constant 0 : index
    %1 = vector.load %arg2[%c0_1, %c0_2] : memref<256x32xbf16, #tpu.memory_space<vmem>>, vector<256x32xbf16>
    %cst = arith.constant dense<0.000000e+00> : vector<400x32xf32>
    %2 = tpu.matmul %0, %1, %cst {dimension_numbers = #tpu.dot_dimension_numbers<[1], [0], [0], [1], [0, 0, 1, 1], [], []>} : vector<400x256xbf16>, vector<256x32xbf16>, vector<400x32xf32> -> vector<400x32xf32>
    %c0_3 = arith.constant 0 : index
    %c0_4 = arith.constant 0 : index
    %3 = vector.load %arg3[%c0_3, %c0_4] : memref<1x32xf32, #tpu.memory_space<vmem>>, vector<1x32xf32>
    %4 = vector.broadcast %3 : vector<1x32xf32> to vector<400x32xf32>
    %5 = arith.addf %2, %4 : vector<400x32xf32>
    %cst_5 = arith.constant 0.000000e+00 : f32
    %6 = vector.broadcast %cst_5 : f32 to vector<400x32xf32>
    %7 = arith.maximumf %5, %6 : vector<400x32xf32>
    %8 = arith.truncf %7 : vector<400x32xf32> to vector<400x32xbf16>
    %c0_6 = arith.constant 0 : index
    %c0_7 = arith.constant 0 : index
    %9 = vector.load %arg4[%c0_6, %c0_7] : memref<400x32xbf16, #tpu.memory_space<vmem>>, vector<400x32xbf16>
    tpu.vector_store %arg4[%c0_6, %c0_7], %8 {strides = array<i32>} : memref<400x32xbf16, #tpu.memory_space<vmem>>, vector<400x32xbf16>,
    return
  }
  func.func @transform_0(%arg0: i32) -> (i32, i32) {
    %c0_i32 = arith.constant 0 : i32
    %c0_i32_0 = arith.constant 0 : i32
    return %arg0, %c0_i32 : i32, i32
  }
  func.func @transform_1(%arg0: i32) -> (i32, i32) {
    %c0_i32 = arith.constant 0 : i32
    %c0_i32_0 = arith.constant 0 : i32
    %c0_i32_1 = arith.constant 0 : i32
    return %c0_i32, %c0_i32_0 : i32, i32
  }
  func.func @transform_2(%arg0: i32) -> (i32, i32) {
    %c0_i32 = arith.constant 0 : i32
    %c0_i32_0 = arith.constant 0 : i32
    %c0_i32_1 = arith.constant 0 : i32
    return %c0_i32, %c0_i32_0 : i32, i32
  }
  func.func @transform_3(%arg0: i32) -> (i32, i32) {
    %c0_i32 = arith.constant 0 : i32
    %c0_i32_0 = arith.constant 0 : i32
    return %arg0, %c0_i32 : i32, i32
  }
}

module attributes {stable_mosaic.version = 11 : i64} {
  func.func @_matmul_bias_relu_kernel(%arg0: i32, %arg1: memref<162x512xbf16, #tpu.memory_space<vmem>>, %arg2: memref<512x64xbf16, #tpu.memory_space<vmem>>, %arg3: memref<1x64xf32, #tpu.memory_space<vmem>>, %arg4: memref<162x64xbf16, #tpu.memory_space<vmem>>) attributes {dimension_semantics = [#tpu.dimension_semantics<parallel>], iteration_bounds = array<i64: 1>, scalar_prefetch = 0 : i64, scratch_operands = 0 : i64, tpu.core_type = #tpu.core_type<tc>, window_params = [{transform_indices = @transform_0, window_bounds = array<i64: 162, 512>}, {pipeline_mode = #tpu.pipeline_mode<synchronous>, transform_indices = @transform_1, window_bounds = array<i64: 512, 64>}, {pipeline_mode = #tpu.pipeline_mode<synchronous>, transform_indices = @transform_2, window_bounds = array<i64: 1, 64>}, {transform_indices = @transform_3, window_bounds = array<i64: 162, 64>}]} {
    %c0 = arith.constant 0 : index
    %c0_0 = arith.constant 0 : index
    %0 = vector.load %arg1[%c0, %c0_0] : memref<162x512xbf16, #tpu.memory_space<vmem>>, vector<162x512xbf16>
    %c0_1 = arith.constant 0 : index
    %c0_2 = arith.constant 0 : index
    %1 = vector.load %arg2[%c0_1, %c0_2] : memref<512x64xbf16, #tpu.memory_space<vmem>>, vector<512x64xbf16>
    %cst = arith.constant dense<0.000000e+00> : vector<162x64xf32>
    %2 = tpu.matmul %0, %1, %cst {dimension_numbers = #tpu.dot_dimension_numbers<[1], [0], [0], [1], [0, 0, 1, 1], [], []>} : vector<162x512xbf16>, vector<512x64xbf16>, vector<162x64xf32> -> vector<162x64xf32>
    %c0_3 = arith.constant 0 : index
    %c0_4 = arith.constant 0 : index
    %3 = vector.load %arg3[%c0_3, %c0_4] : memref<1x64xf32, #tpu.memory_space<vmem>>, vector<1x64xf32>
    %4 = vector.broadcast %3 : vector<1x64xf32> to vector<162x64xf32>
    %5 = arith.addf %2, %4 : vector<162x64xf32>
    %cst_5 = arith.constant 0.000000e+00 : f32
    %6 = vector.broadcast %cst_5 : f32 to vector<162x64xf32>
    %7 = arith.maximumf %5, %6 : vector<162x64xf32>
    %8 = arith.truncf %7 : vector<162x64xf32> to vector<162x64xbf16>
    %c0_6 = arith.constant 0 : index
    %c0_7 = arith.constant 0 : index
    %9 = vector.load %arg4[%c0_6, %c0_7] : memref<162x64xbf16, #tpu.memory_space<vmem>>, vector<162x64xbf16>
    tpu.vector_store %arg4[%c0_6, %c0_7], %8 {strides = array<i32>} : memref<162x64xbf16, #tpu.memory_space<vmem>>, vector<162x64xbf16>,
    return
  }
  func.func @transform_0(%arg0: i32) -> (i32, i32) {
    %c0_i32 = arith.constant 0 : i32
    %c0_i32_0 = arith.constant 0 : i32
    return %arg0, %c0_i32 : i32, i32
  }
  func.func @transform_1(%arg0: i32) -> (i32, i32) {
    %c0_i32 = arith.constant 0 : i32
    %c0_i32_0 = arith.constant 0 : i32
    %c0_i32_1 = arith.constant 0 : i32
    return %c0_i32, %c0_i32_0 : i32, i32
  }
  func.func @transform_2(%arg0: i32) -> (i32, i32) {
    %c0_i32 = arith.constant 0 : i32
    %c0_i32_0 = arith.constant 0 : i32
    %c0_i32_1 = arith.constant 0 : i32
    return %c0_i32, %c0_i32_0 : i32, i32
  }
  func.func @transform_3(%arg0: i32) -> (i32, i32) {
    %c0_i32 = arith.constant 0 : i32
    %c0_i32_0 = arith.constant 0 : i32
    return %arg0, %c0_i32 : i32, i32
  }
}

module attributes {stable_mosaic.version = 11 : i64} {
  func.func @_conv3_fc_head_kernel(%arg0: memref<128x576xbf16, #tpu.memory_space<vmem>>, %arg1: memref<576x64xbf16, #tpu.memory_space<vmem>>, %arg2: memref<1x64xf32, #tpu.memory_space<vmem>>, %arg3: memref<1024x512xbf16, #tpu.memory_space<vmem>>, %arg4: memref<1x512xf32, #tpu.memory_space<vmem>>, %arg5: memref<512x128xbf16, #tpu.memory_space<vmem>>, %arg6: memref<1x128xf32, #tpu.memory_space<vmem>>, %arg7: memref<8x128xf32, #tpu.memory_space<vmem>>) attributes {dimension_semantics = [], scalar_prefetch = 0 : i64, scratch_operands = 0 : i64, tpu.core_type = #tpu.core_type<tc>} {
    %c0 = arith.constant 0 : index
    %c0_0 = arith.constant 0 : index
    %0 = vector.load %arg0[%c0, %c0_0] : memref<128x576xbf16, #tpu.memory_space<vmem>>, vector<128x576xbf16>
    %c0_1 = arith.constant 0 : index
    %c0_2 = arith.constant 0 : index
    %1 = vector.load %arg1[%c0_1, %c0_2] : memref<576x64xbf16, #tpu.memory_space<vmem>>, vector<576x64xbf16>
    %cst = arith.constant dense<0.000000e+00> : vector<128x64xf32>
    %2 = tpu.matmul %0, %1, %cst {dimension_numbers = #tpu.dot_dimension_numbers<[1], [0], [0], [1], [0, 0, 1, 1], [], []>} : vector<128x576xbf16>, vector<576x64xbf16>, vector<128x64xf32> -> vector<128x64xf32>
    %c0_3 = arith.constant 0 : index
    %c0_4 = arith.constant 0 : index
    %3 = vector.load %arg2[%c0_3, %c0_4] : memref<1x64xf32, #tpu.memory_space<vmem>>, vector<1x64xf32>
    %4 = vector.broadcast %3 : vector<1x64xf32> to vector<128x64xf32>
    %5 = arith.addf %2, %4 : vector<128x64xf32>
    %cst_5 = arith.constant 0.000000e+00 : f32
    %6 = vector.broadcast %cst_5 : f32 to vector<128x64xf32>
    %7 = arith.maximumf %5, %6 : vector<128x64xf32>
    %cst_6 = arith.constant 0.000000e+00 : f32
    %8 = vector.broadcast %cst_6 : f32 to vector<8x512xf32>
    %9 = vector.extract_strided_slice %7 {offsets = [0, 0], sizes = [8, 64], strides = [1, 1]} : vector<128x64xf32> to vector<8x64xf32>
    %10 = arith.truncf %9 : vector<8x64xf32> to vector<8x64xbf16>
    %c0_7 = arith.constant 0 : index
    %c0_8 = arith.constant 0 : index
    %11 = vector.load %arg3[%c0_7, %c0_8] : memref<1024x512xbf16, #tpu.memory_space<vmem>>, vector<64x512xbf16>
    %cst_9 = arith.constant dense<0.000000e+00> : vector<8x512xf32>
    %12 = tpu.matmul %10, %11, %cst_9 {dimension_numbers = #tpu.dot_dimension_numbers<[1], [0], [0], [1], [0, 0, 1, 1], [], []>} : vector<8x64xbf16>, vector<64x512xbf16>, vector<8x512xf32> -> vector<8x512xf32>
    %13 = arith.addf %8, %12 : vector<8x512xf32>
    %14 = vector.extract_strided_slice %7 {offsets = [8, 0], sizes = [8, 64], strides = [1, 1]} : vector<128x64xf32> to vector<8x64xf32>
    %15 = arith.truncf %14 : vector<8x64xf32> to vector<8x64xbf16>
    %c64 = arith.constant 64 : index
    %c0_10 = arith.constant 0 : index
    %16 = vector.load %arg3[%c64, %c0_10] : memref<1024x512xbf16, #tpu.memory_space<vmem>>, vector<64x512xbf16>
    %cst_11 = arith.constant dense<0.000000e+00> : vector<8x512xf32>
    %17 = tpu.matmul %15, %16, %cst_11 {dimension_numbers = #tpu.dot_dimension_numbers<[1], [0], [0], [1], [0, 0, 1, 1], [], []>} : vector<8x64xbf16>, vector<64x512xbf16>, vector<8x512xf32> -> vector<8x512xf32>
    %18 = arith.addf %13, %17 : vector<8x512xf32>
    %19 = vector.extract_strided_slice %7 {offsets = [16, 0], sizes = [8, 64], strides = [1, 1]} : vector<128x64xf32> to vector<8x64xf32>
    %20 = arith.truncf %19 : vector<8x64xf32> to vector<8x64xbf16>
    %c128 = arith.constant 128 : index
    %c0_12 = arith.constant 0 : index
    %21 = vector.load %arg3[%c128, %c0_12] : memref<1024x512xbf16, #tpu.memory_space<vmem>>, vector<64x512xbf16>
    %cst_13 = arith.constant dense<0.000000e+00> : vector<8x512xf32>
    %22 = tpu.matmul %20, %21, %cst_13 {dimension_numbers = #tpu.dot_dimension_numbers<[1], [0], [0], [1], [0, 0, 1, 1], [], []>} : vector<8x64xbf16>, vector<64x512xbf16>, vector<8x512xf32> -> vector<8x512xf32>
    %23 = arith.addf %18, %22 : vector<8x512xf32>
    %24 = vector.extract_strided_slice %7 {offsets = [24, 0], sizes = [8, 64], strides = [1, 1]} : vector<128x64xf32> to vector<8x64xf32>
    %25 = arith.truncf %24 : vector<8x64xf32> to vector<8x64xbf16>
    %c192 = arith.constant 192 : index
    %c0_14 = arith.constant 0 : index
    %26 = vector.load %arg3[%c192, %c0_14] : memref<1024x512xbf16, #tpu.memory_space<vmem>>, vector<64x512xbf16>
    %cst_15 = arith.constant dense<0.000000e+00> : vector<8x512xf32>
    %27 = tpu.matmul %25, %26, %cst_15 {dimension_numbers = #tpu.dot_dimension_numbers<[1], [0], [0], [1], [0, 0, 1, 1], [], []>} : vector<8x64xbf16>, vector<64x512xbf16>, vector<8x512xf32> -> vector<8x512xf32>
    %28 = arith.addf %23, %27 : vector<8x512xf32>
    %29 = vector.extract_strided_slice %7 {offsets = [32, 0], sizes = [8, 64], strides = [1, 1]} : vector<128x64xf32> to vector<8x64xf32>
    %30 = arith.truncf %29 : vector<8x64xf32> to vector<8x64xbf16>
    %c256 = arith.constant 256 : index
    %c0_16 = arith.constant 0 : index
    %31 = vector.load %arg3[%c256, %c0_16] : memref<1024x512xbf16, #tpu.memory_space<vmem>>, vector<64x512xbf16>
    %cst_17 = arith.constant dense<0.000000e+00> : vector<8x512xf32>
    %32 = tpu.matmul %30, %31, %cst_17 {dimension_numbers = #tpu.dot_dimension_numbers<[1], [0], [0], [1], [0, 0, 1, 1], [], []>} : vector<8x64xbf16>, vector<64x512xbf16>, vector<8x512xf32> -> vector<8x512xf32>
    %33 = arith.addf %28, %32 : vector<8x512xf32>
    %34 = vector.extract_strided_slice %7 {offsets = [40, 0], sizes = [8, 64], strides = [1, 1]} : vector<128x64xf32> to vector<8x64xf32>
    %35 = arith.truncf %34 : vector<8x64xf32> to vector<8x64xbf16>
    %c320 = arith.constant 320 : index
    %c0_18 = arith.constant 0 : index
    %36 = vector.load %arg3[%c320, %c0_18] : memref<1024x512xbf16, #tpu.memory_space<vmem>>, vector<64x512xbf16>
    %cst_19 = arith.constant dense<0.000000e+00> : vector<8x512xf32>
    %37 = tpu.matmul %35, %36, %cst_19 {dimension_numbers = #tpu.dot_dimension_numbers<[1], [0], [0], [1], [0, 0, 1, 1], [], []>} : vector<8x64xbf16>, vector<64x512xbf16>, vector<8x512xf32> -> vector<8x512xf32>
    %38 = arith.addf %33, %37 : vector<8x512xf32>
    %39 = vector.extract_strided_slice %7 {offsets = [48, 0], sizes = [8, 64], strides = [1, 1]} : vector<128x64xf32> to vector<8x64xf32>
    %40 = arith.truncf %39 : vector<8x64xf32> to vector<8x64xbf16>
    %c384 = arith.constant 384 : index
    %c0_20 = arith.constant 0 : index
    %41 = vector.load %arg3[%c384, %c0_20] : memref<1024x512xbf16, #tpu.memory_space<vmem>>, vector<64x512xbf16>
    %cst_21 = arith.constant dense<0.000000e+00> : vector<8x512xf32>
    %42 = tpu.matmul %40, %41, %cst_21 {dimension_numbers = #tpu.dot_dimension_numbers<[1], [0], [0], [1], [0, 0, 1, 1], [], []>} : vector<8x64xbf16>, vector<64x512xbf16>, vector<8x512xf32> -> vector<8x512xf32>
    %43 = arith.addf %38, %42 : vector<8x512xf32>
    %44 = vector.extract_strided_slice %7 {offsets = [56, 0], sizes = [8, 64], strides = [1, 1]} : vector<128x64xf32> to vector<8x64xf32>
    %45 = arith.truncf %44 : vector<8x64xf32> to vector<8x64xbf16>
    %c448 = arith.constant 448 : index
    %c0_22 = arith.constant 0 : index
    %46 = vector.load %arg3[%c448, %c0_22] : memref<1024x512xbf16, #tpu.memory_space<vmem>>, vector<64x512xbf16>
    %cst_23 = arith.constant dense<0.000000e+00> : vector<8x512xf32>
    %47 = tpu.matmul %45, %46, %cst_23 {dimension_numbers = #tpu.dot_dimension_numbers<[1], [0], [0], [1], [0, 0, 1, 1], [], []>} : vector<8x64xbf16>, vector<64x512xbf16>, vector<8x512xf32> -> vector<8x512xf32>
    %48 = arith.addf %43, %47 : vector<8x512xf32>
    %49 = vector.extract_strided_slice %7 {offsets = [64, 0], sizes = [8, 64], strides = [1, 1]} : vector<128x64xf32> to vector<8x64xf32>
    %50 = arith.truncf %49 : vector<8x64xf32> to vector<8x64xbf16>
    %c512 = arith.constant 512 : index
    %c0_24 = arith.constant 0 : index
    %51 = vector.load %arg3[%c512, %c0_24] : memref<1024x512xbf16, #tpu.memory_space<vmem>>, vector<64x512xbf16>
    %cst_25 = arith.constant dense<0.000000e+00> : vector<8x512xf32>
    %52 = tpu.matmul %50, %51, %cst_25 {dimension_numbers = #tpu.dot_dimension_numbers<[1], [0], [0], [1], [0, 0, 1, 1], [], []>} : vector<8x64xbf16>, vector<64x512xbf16>, vector<8x512xf32> -> vector<8x512xf32>
    %53 = arith.addf %48, %52 : vector<8x512xf32>
    %54 = vector.extract_strided_slice %7 {offsets = [72, 0], sizes = [8, 64], strides = [1, 1]} : vector<128x64xf32> to vector<8x64xf32>
    %55 = arith.truncf %54 : vector<8x64xf32> to vector<8x64xbf16>
    %c576 = arith.constant 576 : index
    %c0_26 = arith.constant 0 : index
    %56 = vector.load %arg3[%c576, %c0_26] : memref<1024x512xbf16, #tpu.memory_space<vmem>>, vector<64x512xbf16>
    %cst_27 = arith.constant dense<0.000000e+00> : vector<8x512xf32>
    %57 = tpu.matmul %55, %56, %cst_27 {dimension_numbers = #tpu.dot_dimension_numbers<[1], [0], [0], [1], [0, 0, 1, 1], [], []>} : vector<8x64xbf16>, vector<64x512xbf16>, vector<8x512xf32> -> vector<8x512xf32>
    %58 = arith.addf %53, %57 : vector<8x512xf32>
    %59 = vector.extract_strided_slice %7 {offsets = [80, 0], sizes = [8, 64], strides = [1, 1]} : vector<128x64xf32> to vector<8x64xf32>
    %60 = arith.truncf %59 : vector<8x64xf32> to vector<8x64xbf16>
    %c640 = arith.constant 640 : index
    %c0_28 = arith.constant 0 : index
    %61 = vector.load %arg3[%c640, %c0_28] : memref<1024x512xbf16, #tpu.memory_space<vmem>>, vector<64x512xbf16>
    %cst_29 = arith.constant dense<0.000000e+00> : vector<8x512xf32>
    %62 = tpu.matmul %60, %61, %cst_29 {dimension_numbers = #tpu.dot_dimension_numbers<[1], [0], [0], [1], [0, 0, 1, 1], [], []>} : vector<8x64xbf16>, vector<64x512xbf16>, vector<8x512xf32> -> vector<8x512xf32>
    %63 = arith.addf %58, %62 : vector<8x512xf32>
    %64 = vector.extract_strided_slice %7 {offsets = [88, 0], sizes = [8, 64], strides = [1, 1]} : vector<128x64xf32> to vector<8x64xf32>
    %65 = arith.truncf %64 : vector<8x64xf32> to vector<8x64xbf16>
    %c704 = arith.constant 704 : index
    %c0_30 = arith.constant 0 : index
    %66 = vector.load %arg3[%c704, %c0_30] : memref<1024x512xbf16, #tpu.memory_space<vmem>>, vector<64x512xbf16>
    %cst_31 = arith.constant dense<0.000000e+00> : vector<8x512xf32>
    %67 = tpu.matmul %65, %66, %cst_31 {dimension_numbers = #tpu.dot_dimension_numbers<[1], [0], [0], [1], [0, 0, 1, 1], [], []>} : vector<8x64xbf16>, vector<64x512xbf16>, vector<8x512xf32> -> vector<8x512xf32>
    %68 = arith.addf %63, %67 : vector<8x512xf32>
    %69 = vector.extract_strided_slice %7 {offsets = [96, 0], sizes = [8, 64], strides = [1, 1]} : vector<128x64xf32> to vector<8x64xf32>
    %70 = arith.truncf %69 : vector<8x64xf32> to vector<8x64xbf16>
    %c768 = arith.constant 768 : index
    %c0_32 = arith.constant 0 : index
    %71 = vector.load %arg3[%c768, %c0_32] : memref<1024x512xbf16, #tpu.memory_space<vmem>>, vector<64x512xbf16>
    %cst_33 = arith.constant dense<0.000000e+00> : vector<8x512xf32>
    %72 = tpu.matmul %70, %71, %cst_33 {dimension_numbers = #tpu.dot_dimension_numbers<[1], [0], [0], [1], [0, 0, 1, 1], [], []>} : vector<8x64xbf16>, vector<64x512xbf16>, vector<8x512xf32> -> vector<8x512xf32>
    %73 = arith.addf %68, %72 : vector<8x512xf32>
    %74 = vector.extract_strided_slice %7 {offsets = [104, 0], sizes = [8, 64], strides = [1, 1]} : vector<128x64xf32> to vector<8x64xf32>
    %75 = arith.truncf %74 : vector<8x64xf32> to vector<8x64xbf16>
    %c832 = arith.constant 832 : index
    %c0_34 = arith.constant 0 : index
    %76 = vector.load %arg3[%c832, %c0_34] : memref<1024x512xbf16, #tpu.memory_space<vmem>>, vector<64x512xbf16>
    %cst_35 = arith.constant dense<0.000000e+00> : vector<8x512xf32>
    %77 = tpu.matmul %75, %76, %cst_35 {dimension_numbers = #tpu.dot_dimension_numbers<[1], [0], [0], [1], [0, 0, 1, 1], [], []>} : vector<8x64xbf16>, vector<64x512xbf16>, vector<8x512xf32> -> vector<8x512xf32>
    %78 = arith.addf %73, %77 : vector<8x512xf32>
    %79 = vector.extract_strided_slice %7 {offsets = [112, 0], sizes = [8, 64], strides = [1, 1]} : vector<128x64xf32> to vector<8x64xf32>
    %80 = arith.truncf %79 : vector<8x64xf32> to vector<8x64xbf16>
    %c896 = arith.constant 896 : index
    %c0_36 = arith.constant 0 : index
    %81 = vector.load %arg3[%c896, %c0_36] : memref<1024x512xbf16, #tpu.memory_space<vmem>>, vector<64x512xbf16>
    %cst_37 = arith.constant dense<0.000000e+00> : vector<8x512xf32>
    %82 = tpu.matmul %80, %81, %cst_37 {dimension_numbers = #tpu.dot_dimension_numbers<[1], [0], [0], [1], [0, 0, 1, 1], [], []>} : vector<8x64xbf16>, vector<64x512xbf16>, vector<8x512xf32> -> vector<8x512xf32>
    %83 = arith.addf %78, %82 : vector<8x512xf32>
    %84 = vector.extract_strided_slice %7 {offsets = [120, 0], sizes = [8, 64], strides = [1, 1]} : vector<128x64xf32> to vector<8x64xf32>
    %85 = arith.truncf %84 : vector<8x64xf32> to vector<8x64xbf16>
    %c960 = arith.constant 960 : index
    %c0_38 = arith.constant 0 : index
    %86 = vector.load %arg3[%c960, %c0_38] : memref<1024x512xbf16, #tpu.memory_space<vmem>>, vector<64x512xbf16>
    %cst_39 = arith.constant dense<0.000000e+00> : vector<8x512xf32>
    %87 = tpu.matmul %85, %86, %cst_39 {dimension_numbers = #tpu.dot_dimension_numbers<[1], [0], [0], [1], [0, 0, 1, 1], [], []>} : vector<8x64xbf16>, vector<64x512xbf16>, vector<8x512xf32> -> vector<8x512xf32>
    %88 = arith.addf %83, %87 : vector<8x512xf32>
    %c0_40 = arith.constant 0 : index
    %c0_41 = arith.constant 0 : index
    %89 = vector.load %arg4[%c0_40, %c0_41] : memref<1x512xf32, #tpu.memory_space<vmem>>, vector<1x512xf32>
    %90 = vector.broadcast %89 : vector<1x512xf32> to vector<8x512xf32>
    %91 = arith.addf %88, %90 : vector<8x512xf32>
    %cst_42 = arith.constant 0.000000e+00 : f32
    %92 = vector.broadcast %cst_42 : f32 to vector<8x512xf32>
    %93 = arith.maximumf %91, %92 : vector<8x512xf32>
    %94 = arith.truncf %93 : vector<8x512xf32> to vector<8x512xbf16>
    %c0_43 = arith.constant 0 : index
    %c0_44 = arith.constant 0 : index
    %95 = vector.load %arg5[%c0_43, %c0_44] : memref<512x128xbf16, #tpu.memory_space<vmem>>, vector<512x128xbf16>
    %cst_45 = arith.constant dense<0.000000e+00> : vector<8x128xf32>
    %96 = tpu.matmul %94, %95, %cst_45 {dimension_numbers = #tpu.dot_dimension_numbers<[1], [0], [0], [1], [0, 0, 1, 1], [], []>} : vector<8x512xbf16>, vector<512x128xbf16>, vector<8x128xf32> -> vector<8x128xf32>
    %c0_46 = arith.constant 0 : index
    %c0_47 = arith.constant 0 : index
    %97 = vector.load %arg6[%c0_46, %c0_47] : memref<1x128xf32, #tpu.memory_space<vmem>>, vector<1x128xf32>
    %98 = vector.broadcast %97 : vector<1x128xf32> to vector<8x128xf32>
    %99 = arith.addf %96, %98 : vector<8x128xf32>
    %c0_48 = arith.constant 0 : index
    %c0_49 = arith.constant 0 : index
    %100 = vector.load %arg7[%c0_48, %c0_49] : memref<8x128xf32, #tpu.memory_space<vmem>>, vector<8x128xf32>
    tpu.vector_store %arg7[%c0_48, %c0_49], %99 {strides = array<i32>} : memref<8x128xf32, #tpu.memory_space<vmem>>, vector<8x128xf32>,
    return
  }
}

</mosaic_0001>

<bundles_post_ra>
// kernel: dqn_forward.3
= control target key start
LH: loop header
LB: loop body
LE: loop exit
PB: predicated region body
PF: predicated region fallthrough
CT: control target
= control target key end

     0   :  { %s1542_s12 = smov 0   ;;  %s1852_s0 = inlined_call_operand.vmem [shape: bf16[800,256], index: 0, kind: input, shape index: {}]   ;;  %s1853_s1 = inlined_call_operand.vmem [shape: bf16[256,32], index: 1, kind: input, shape index: {}]   ;;  %s1854_s2 = inlined_call_operand.vmem [shape: f32[1,32], index: 2, kind: input, shape index: {}]   ;;  %s1855_s3 = inlined_call_operand.vmem [shape: bf16[800,32], index: 3, kind: output, shape index: {}]  }
   0x1 LB: > { %s1203_s13 = sadd.s32 4294967295, %s1519_s12   ;;  %p1207_p0 = scmp.ge.s32.totalorder %s1519_s12, 1  ;;  %s1519_s12 = sphi %s1542_s12, %s13_s12  }
   0x2   : > { %p139_p1 = scmp.lt.s32.totalorder %s1519_s12, 3 }
   0x4   : > { %p140_p2 = pnand %p1207_p0, %p139_p1 }
   0x5   : > { %v1422_v0 = vld [vmem:[%s1853_s1] sm:$0xff] (!%p140_p2)   ;;  %v1521_v1 = vmov (!%p140_p2), 0   ;;  %s164_s16 = smul.u32 (!%p140_p2), 50, %s1203_s13  ;;  %v1423_v2 = vld [vmem:[%s1853_s1 + $0x8] sm:$0xff] (!%p140_p2)   ;;  %v1424_v3 = vld [vmem:[%s1853_s1 + $0x10] sm:$0xff] (!%p140_p2)   ;;  %vm1096_vm0 = vcmask (!%p140_p2), 257024  }
   0x6   : > { %143 = sbr.rel (%p140_p2) target bundleno = 387 (0x183), region = 32  ;;  %613 = vmatprep.subr.bf16.mxu0 (!%p140_p2), %v1521_v1  ;;  %1381 = vmatprep.subr.bf16.mxu1 (!%p140_p2), %v1521_v1  ;;  %v1425_v4 = vld [vmem:[%s1853_s1 + $0x18] sm:$0xff] (!%p140_p2)   ;;  %v1426_v5 = vld [vmem:[%s1853_s1 + $0x20] sm:$0xff] (!%p140_p2)   ;;  %v1427_v7 = vld [vmem:[%s1853_s1 + $0x28] sm:$0xff] (!%p140_p2)  }
   0x7   : > { %614 = vmatpush1.bf16.msra.mxu0 (!%p140_p2), %v1422_v0  ;;  %1397 = vmatpush1.bf16.msra.mxu1 (!%p140_p2), %v1422_v0  ;;  %p165_p3 = scmp.lt.s32.totalorder (!%p140_p2), %s164_s16, 99  ;;  %v1428_v9 = vld [vmem:[%s1853_s1 + $0x30] sm:$0xff] (!%p140_p2)   ;;  %v1429_v10 = vld [vmem:[%s1853_s1 + $0x38] sm:$0xff] (!%p140_p2)   ;;  %v1430_v11 = vld [vmem:[%s1853_s1 + $0x40] sm:$0xff] (!%p140_p2)  }
   0x8   : > { %615 = vmatprep.subr.bf16.mxu0 (!%p140_p2), %v1521_v1  ;;  %1382 = vmatprep.subr.bf16.mxu1 (!%p140_p2), %v1521_v1  ;;  %v1431_v12 = vld [vmem:[%s1853_s1 + $0x48] sm:$0xff] (!%p140_p2)   ;;  %v1432_v13 = vld [vmem:[%s1853_s1 + $0x50] sm:$0xff] (!%p140_p2)   ;;  %v1433_v14 = vld [vmem:[%s1853_s1 + $0x58] sm:$0xff] (!%p140_p2)  }
   0x9   : > { %v1434_v15 = vld [vmem:[%s1853_s1 + $0x60] sm:$0xff] (!%p140_p2)   ;;  %v1435_v16 = vld [vmem:[%s1853_s1 + $0x68] sm:$0xff] (!%p140_p2)   ;;  %v1436_v17 = vld [vmem:[%s1853_s1 + $0x70] sm:$0xff] (!%p140_p2)  }
   0xa   : > { %v1437_v18 = vld [vmem:[%s1853_s1 + $0x78] sm:$0xff] (!%p140_p2)  }
   0xb   : > { %616 = vmatpush1.bf16.msra.mxu0 (!%p140_p2), %v1423_v2  ;;  %1398 = vmatpush1.bf16.msra.mxu1 (!%p140_p2), %v1423_v2 }
   0xc   : > { %617 = vmatprep.subr.bf16.mxu0 (!%p140_p2), %v1521_v1  ;;  %1383 = vmatprep.subr.bf16.mxu1 (!%p140_p2), %v1521_v1 }
   0xd   : > { %s1857_s16 = smov (!%p165_p3, %s164_s16), 99 }
   0xe   : > { %s1330_s23 = sshll.u32 %s1857_s16, 3  ;;  %s1210_s29 = sshll.u32 %s1857_s16, 2 }
   0xf   : > { %618 = vmatpush1.bf16.msra.mxu0 %v1424_v3  ;;  %1399 = vmatpush1.bf16.msra.mxu1 %v1424_v3  ;;  %s1579_s28 = scalar_lea.vmem %s1852_s0, %s1330_s23  ;;  %v1691_v3 = vld [vmem:[%s1854_s2] ss:$0 sm:$0xff]  ;;  %s1701_s16 = scalar_lea.vmem %s1855_s3, %s1210_s29 }
  0x10   : > { %619 = vmatprep.subr.bf16.mxu0 %v1521_v1  ;;  %1384 = vmatprep.subr.bf16.mxu1 %v1521_v1  ;;  %v1440_v6 = vld [vmem:[%s1579_s28 + $0x4] ss:$8 sps:$4 sm:$0xff]   ;;  %v1443_v8 = vld [vmem:[%s1579_s28 + $0xd4] ss:$8 sps:$4 sm:$0xff]   ;;  %v1438_v19 = vld [vmem:[%s1579_s28] ss:$8 sps:$4 sm:$0xff]  }
  0x11   : > { %645 = vmatprep.mubr.bf16.mxu0 %v1440_v6  ;;  %749 = vmatprep.mubr.bf16.mxu1 %v1443_v8  ;;  %v1441_v20 = vld [vmem:[%s1579_s28 + $0xd0] ss:$8 sps:$4 sm:$0xff]   ;;  %v1444_v21 = vld [vmem:[%s1579_s28 + $0x14] ss:$8 sps:$4 sm:$0xff]   ;;  %v1447_v22 = vld [vmem:[%s1579_s28 + $0xe4] ss:$8 sps:$4 sm:$0xff]  }
  0x12   : > { %v1446_v23 = vld [vmem:[%s1579_s28 + $0x10] ss:$8 sps:$4 sm:$0xff]   ;;  %v1449_v24 = vld [vmem:[%s1579_s28 + $0xe0] ss:$8 sps:$4 sm:$0xff]   ;;  %v1450_v25 = vld [vmem:[%s1579_s28 + $0x24] ss:$8 sps:$4 sm:$0xff]  }
  0x13   : > { %620 = vmatpush1.bf16.msra.mxu0 %v1425_v4  ;;  %1400 = vmatpush1.bf16.msra.mxu1 %v1425_v4  ;;  %v1453_v26 = vld [vmem:[%s1579_s28 + $0xf4] ss:$8 sps:$4 sm:$0xff]   ;;  %v1452_v27 = vld [vmem:[%s1579_s28 + $0x20] ss:$8 sps:$4 sm:$0xff]   ;;  %v1455_v28 = vld [vmem:[%s1579_s28 + $0xf0] ss:$8 sps:$4 sm:$0xff]  }
  0x14   : > { %621 = vmatprep.subr.bf16.mxu0 %v1521_v1  ;;  %1385 = vmatprep.subr.bf16.mxu1 %v1521_v1  ;;  %v1456_v29 = vld [vmem:[%s1579_s28 + $0x34] ss:$8 sps:$4 sm:$0xff]   ;;  %v1459_v30 = vld [vmem:[%s1579_s28 + $0x104] ss:$8 sps:$4 sm:$0xff]   ;;  %v1458_v31 = vld [vmem:[%s1579_s28 + $0x30] ss:$8 sps:$4 sm:$0xff]  }
  0x15   : > { %v1461_v32 = vld [vmem:[%s1579_s28 + $0x100] ss:$8 sps:$4 sm:$0xff]   ;;  %v1462_v33 = vld [vmem:[%s1579_s28 + $0x44] ss:$8 sps:$4 sm:$0xff]   ;;  %v1465_v34 = vld [vmem:[%s1579_s28 + $0x114] ss:$8 sps:$4 sm:$0xff]  }
  0x16   : > { %v1464_v35 = vld [vmem:[%s1579_s28 + $0x40] ss:$8 sps:$4 sm:$0xff]   ;;  %v1467_v36 = vld [vmem:[%s1579_s28 + $0x110] ss:$8 sps:$4 sm:$0xff]   ;;  %v1468_v37 = vld [vmem:[%s1579_s28 + $0x54] ss:$8 sps:$4 sm:$0xff]  }
  0x17   : > { %622 = vmatpush1.bf16.msra.mxu0 %v1426_v5  ;;  %1401 = vmatpush1.bf16.msra.mxu1 %v1426_v5  ;;  %v1471_v38 = vld [vmem:[%s1579_s28 + $0x124] ss:$8 sps:$4 sm:$0xff]   ;;  %v1470_v39 = vld [vmem:[%s1579_s28 + $0x50] ss:$8 sps:$4 sm:$0xff]   ;;  %v1473_v40 = vld [vmem:[%s1579_s28 + $0x120] ss:$8 sps:$4 sm:$0xff]  }
  0x18   : > { %623 = vmatprep.subr.bf16.mxu0 %v1521_v1  ;;  %1386 = vmatprep.subr.bf16.mxu1 %v1521_v1  ;;  %v1474_v41 = vld [vmem:[%s1579_s28 + $0x64] ss:$8 sps:$4 sm:$0xff]   ;;  %v1477_v42 = vld [vmem:[%s1579_s28 + $0x134] ss:$8 sps:$4 sm:$0xff]   ;;  %v1476_v43 = vld [vmem:[%s1579_s28 + $0x60] ss:$8 sps:$4 sm:$0xff]  }
  0x19   : > { %v1479_v44 = vld [vmem:[%s1579_s28 + $0x130] ss:$8 sps:$4 sm:$0xff]   ;;  %v1480_v45 = vld [vmem:[%s1579_s28 + $0x74] ss:$8 sps:$4 sm:$0xff]   ;;  %v1483_v46 = vld [vmem:[%s1579_s28 + $0x144] ss:$8 sps:$4 sm:$0xff]  }
  0x1a   : > { %v1482_v47 = vld [vmem:[%s1579_s28 + $0x70] ss:$8 sps:$4 sm:$0xff]   ;;  %v1485_v48 = vld [vmem:[%s1579_s28 + $0x140] ss:$8 sps:$4 sm:$0xff]   ;;  %v1486_v49 = vld [vmem:[%s1579_s28 + $0x84] ss:$8 sps:$4 sm:$0xff]  }
  0x1b   : > { %624 = vmatpush1.bf16.msra.mxu0 %v1427_v7  ;;  %1402 = vmatpush1.bf16.msra.mxu1 %v1427_v7  ;;  %v1489_v50 = vld [vmem:[%s1579_s28 + $0x154] ss:$8 sps:$4 sm:$0xff]   ;;  %v1488_v51 = vld [vmem:[%s1579_s28 + $0x80] ss:$8 sps:$4 sm:$0xff]   ;;  %v1491_v52 = vld [vmem:[%s1579_s28 + $0x150] ss:$8 sps:$4 sm:$0xff]  }
  0x1c   : > { %625 = vmatprep.subr.bf16.mxu0 %v1521_v1  ;;  %1387 = vmatprep.subr.bf16.mxu1 %v1521_v1  ;;  %v1492_v53 = vld [vmem:[%s1579_s28 + $0x94] ss:$8 sps:$4 sm:$0xff]   ;;  %v1495_v54 = vld [vmem:[%s1579_s28 + $0x164] ss:$8 sps:$4 sm:$0xff]   ;;  %v1494_v55 = vld [vmem:[%s1579_s28 + $0x90] ss:$8 sps:$4 sm:$0xff]  }
  0x1d   : > { %v1497_v56 = vld [vmem:[%s1579_s28 + $0x160] ss:$8 sps:$4 sm:$0xff]   ;;  %v1498_v57 = vld [vmem:[%s1579_s28 + $0xa4] ss:$8 sps:$4 sm:$0xff]   ;;  %v1501_v58 = vld [vmem:[%s1579_s28 + $0x174] ss:$8 sps:$4 sm:$0xff]  }
  0x1e   : > { %v1500_v59 = vld [vmem:[%s1579_s28 + $0xa0] ss:$8 sps:$4 sm:$0xff]   ;;  %v1503_v60 = vld [vmem:[%s1579_s28 + $0x170] ss:$8 sps:$4 sm:$0xff]   ;;  %v1504_v61 = vld [vmem:[%s1579_s28 + $0xb4] ss:$8 sps:$4 sm:$0xff]  }
  0x1f   : > { %626 = vmatpush1.bf16.msra.mxu0 %v1428_v9  ;;  %1403 = vmatpush1.bf16.msra.mxu1 %v1428_v9  ;;  %v1507_v62 = vld [vmem:[%s1579_s28 + $0x184] ss:$8 sps:$4 sm:$0xff]   ;;  %v1506_v63 = vld [vmem:[%s1579_s28 + $0xb0] ss:$8 sps:$4 sm:$0xff]   ;;  %v1509_v0 = vld [vmem:[%s1579_s28 + $0x180] ss:$8 sps:$4 sm:$0xff]  }
  0x20   : > { %627 = vmatprep.subr.bf16.mxu0 %v1521_v1  ;;  %1388 = vmatprep.subr.bf16.mxu1 %v1521_v1  ;;  %v1512_v2 = vld [vmem:[%s1579_s28 + $0xc0] ss:$8 sps:$4 sm:$0xff]  }
  0x23   : > { %628 = vmatpush1.bf16.msra.mxu0 %v1429_v10  ;;  %1404 = vmatpush1.bf16.msra.mxu1 %v1429_v10 }
  0x24   : > { %629 = vmatprep.subr.bf16.mxu0 %v1521_v1  ;;  %1389 = vmatprep.subr.bf16.mxu1 %v1521_v1 }
  0x27   : > { %630 = vmatpush1.bf16.msra.mxu0 %v1430_v11  ;;  %1405 = vmatpush1.bf16.msra.mxu1 %v1430_v11 }
  0x28   : > { %631 = vmatprep.subr.bf16.mxu0 %v1521_v1  ;;  %1390 = vmatprep.subr.bf16.mxu1 %v1521_v1 }
  0x2b   : > { %632 = vmatpush1.bf16.msra.mxu0 %v1431_v12  ;;  %1406 = vmatpush1.bf16.msra.mxu1 %v1431_v12 }
  0x2c   : > { %633 = vmatprep.subr.bf16.mxu0 %v1521_v1  ;;  %1391 = vmatprep.subr.bf16.mxu1 %v1521_v1 }
  0x2f   : > { %634 = vmatpush1.bf16.msra.mxu0 %v1432_v13  ;;  %1407 = vmatpush1.bf16.msra.mxu1 %v1432_v13 }
  0x30   : > { %635 = vmatprep.subr.bf16.mxu0 %v1521_v1  ;;  %1392 = vmatprep.subr.bf16.mxu1 %v1521_v1 }
  0x33   : > { %636 = vmatpush1.bf16.msra.mxu0 %v1433_v14  ;;  %1408 = vmatpush1.bf16.msra.mxu1 %v1433_v14 }
  0x34   : > { %637 = vmatprep.subr.bf16.mxu0 %v1521_v1  ;;  %1393 = vmatprep.subr.bf16.mxu1 %v1521_v1 }
  0x37   : > { %638 = vmatpush1.bf16.msra.mxu0 %v1434_v15  ;;  %1409 = vmatpush1.bf16.msra.mxu1 %v1434_v15 }
  0x38   : > { %639 = vmatprep.subr.bf16.mxu0 %v1521_v1  ;;  %1394 = vmatprep.subr.bf16.mxu1 %v1521_v1 }
  0x3b   : > { %640 = vmatpush1.bf16.msra.mxu0 %v1435_v16  ;;  %1410 = vmatpush1.bf16.msra.mxu1 %v1435_v16 }
  0x3c   : > { %641 = vmatprep.subr.bf16.mxu0 %v1521_v1  ;;  %1395 = vmatprep.subr.bf16.mxu1 %v1521_v1 }
  0x3f   : > { %642 = vmatpush1.bf16.msra.mxu0 %v1436_v17  ;;  %1411 = vmatpush1.bf16.msra.mxu1 %v1436_v17 }
  0x40   : > { %643 = vmatprep.subr.bf16.mxu0 %v1521_v1  ;;  %1396 = vmatprep.subr.bf16.mxu1 %v1521_v1  ;;  %v1510_v1 = vld [vmem:[%s1579_s28 + $0xc4] ss:$8 sps:$4 sm:$0xff]  }
  0x43   : > { %644 = vmatpush1.bf16.msra.mxu0 %v1437_v18  ;;  %1412 = vmatpush1.bf16.msra.mxu1 %v1437_v18 }
  0x46   : > { %646 = vmatmul.mubr.bf16.vlgmr.msra.gmra.mrb[0].mxu0 %v1438_v19  ;;  %750 = vmatmul.mubr.bf16.vlgmr.msra.gmra.mrb[0].mxu1 %v1441_v20 }
  0x47   : > { %653 = vmatprep.mubr.bf16.mxu0 %v1444_v21  ;;  %757 = vmatprep.mubr.bf16.mxu1 %v1447_v22 }
  0x4e   : > { %654 = vmatmul.mubr.bf16.gmra.mrb[4].mxu0 %v1446_v23  ;;  %758 = vmatmul.mubr.bf16.gmra.mrb[4].mxu1 %v1449_v24 }
  0x4f   : > { %661 = vmatprep.mubr.bf16.mxu0 %v1450_v25  ;;  %765 = vmatprep.mubr.bf16.mxu1 %v1453_v26 }
  0x56   : > { %662 = vmatmul.mubr.bf16.gmra.mrb[8].mxu0 %v1452_v27  ;;  %766 = vmatmul.mubr.bf16.gmra.mrb[8].mxu1 %v1455_v28 }
  0x57   : > { %669 = vmatprep.mubr.bf16.mxu0 %v1456_v29  ;;  %773 = vmatprep.mubr.bf16.mxu1 %v1459_v30 }
  0x5e   : > { %670 = vmatmul.mubr.bf16.gmra.mrb[12].mxu0 %v1458_v31  ;;  %774 = vmatmul.mubr.bf16.gmra.mrb[12].mxu1 %v1461_v32 }
  0x5f   : > { %677 = vmatprep.mubr.bf16.mxu0 %v1462_v33  ;;  %781 = vmatprep.mubr.bf16.mxu1 %v1465_v34 }
  0x66   : > { %678 = vmatmul.mubr.bf16.gmra.mrb[16].mxu0 %v1464_v35  ;;  %782 = vmatmul.mubr.bf16.gmra.mrb[16].mxu1 %v1467_v36 }
  0x67   : > { %685 = vmatprep.mubr.bf16.mxu0 %v1468_v37  ;;  %789 = vmatprep.mubr.bf16.mxu1 %v1471_v38 }
  0x6e   : > { %686 = vmatmul.mubr.bf16.gmra.mrb[20].mxu0 %v1470_v39  ;;  %790 = vmatmul.mubr.bf16.gmra.mrb[20].mxu1 %v1473_v40 }
  0x6f   : > { %693 = vmatprep.mubr.bf16.mxu0 %v1474_v41  ;;  %797 = vmatprep.mubr.bf16.mxu1 %v1477_v42 }
  0x76   : > { %694 = vmatmul.mubr.bf16.gmra.mrb[24].mxu0 %v1476_v43  ;;  %798 = vmatmul.mubr.bf16.gmra.mrb[24].mxu1 %v1479_v44 }
  0x77   : > { %701 = vmatprep.mubr.bf16.mxu0 %v1480_v45  ;;  %805 = vmatprep.mubr.bf16.mxu1 %v1483_v46 }
  0x7e   : > { %702 = vmatmul.mubr.bf16.gmra.mrb[28].mxu0 %v1482_v47  ;;  %806 = vmatmul.mubr.bf16.gmra.mrb[28].mxu1 %v1485_v48 }
  0x7f   : > { %709 = vmatprep.mubr.bf16.mxu0 %v1486_v49  ;;  %813 = vmatprep.mubr.bf16.mxu1 %v1489_v50 }
  0x86   : > { %710 = vmatmul.mubr.bf16.gmra.mrb[32].mxu0 %v1488_v51  ;;  %814 = vmatmul.mubr.bf16.gmra.mrb[32].mxu1 %v1491_v52 }
  0x87   : > { %717 = vmatprep.mubr.bf16.mxu0 %v1492_v53  ;;  %821 = vmatprep.mubr.bf16.mxu1 %v1495_v54 }
  0x8e   : > { %718 = vmatmul.mubr.bf16.gmra.mrb[36].mxu0 %v1494_v55  ;;  %822 = vmatmul.mubr.bf16.gmra.mrb[36].mxu1 %v1497_v56 }
  0x8f   : > { %725 = vmatprep.mubr.bf16.mxu0 %v1498_v57  ;;  %829 = vmatprep.mubr.bf16.mxu1 %v1501_v58 }
  0x96   : > { %726 = vmatmul.mubr.bf16.gmra.mrb[40].mxu0 %v1500_v59  ;;  %830 = vmatmul.mubr.bf16.gmra.mrb[40].mxu1 %v1503_v60 }
  0x97   : > { %733 = vmatprep.mubr.bf16.mxu0 %v1504_v61  ;;  %837 = vmatprep.mubr.bf16.mxu1 %v1507_v62 }
  0x9e   : > { %734 = vmatmul.mubr.bf16.gmra.mrb[44].mxu0 %v1506_v63  ;;  %838 = vmatmul.mubr.bf16.gmra.mrb[44].mxu1 %v1509_v0 }
  0x9f   : > { %741 = vmatprep.mubr.bf16.mxu0 %v1510_v1 }
  0xa6   : > { %742 = vmatmul.mubr.bf16.gmra.mrb[48].mxu0 %v1512_v2 }
 0x119   : > { %v647_v4 = vpop.f32.mrb[0].mxu0  ;;  %v751_v5 = vpop.f32.mrb[0].mxu1 }
 0x11a   : > { %v648_v6 = vadd.f32 %v1691_v3, %v647_v4  ;;  %v649_v7 = vpop.f32.mrb[1].mxu0  ;;  %v752_v8 = vadd.f32 %v1691_v3, %v751_v5  ;;  %v753_v9 = vpop.f32.mrb[1].mxu1 }
 0x11b   : > { %v650_v10 = vpop.f32.mrb[2].mxu0  ;;  %v754_v11 = vpop.f32.mrb[2].mxu1 }
 0x11c   : > { %v846_v12 = vmax.f32 %v648_v6, 0.0  ;;  %v651_v13 = vadd.f32 %v1691_v3, %v650_v10  ;;  %v652_v14 = vpop.f32.mrb[3].mxu0  ;;  %v872_v15 = vmax.f32 %v752_v8, 0.0  ;;  %v755_v16 = vadd.f32 %v1691_v3, %v754_v11  ;;  %v756_v17 = vpop.f32.mrb[3].mxu1 }
 0x11e   : > { %v1331_v18 = vpack.c.bf16 %v846_v12, %v846_v12  ;;  %v847_v19 = vmax.f32 %v651_v13, 0.0  ;;  %v1357_v20 = vpack.c.bf16 %v872_v15, %v872_v15  ;;  %v873_v21 = vmax.f32 %v755_v16, 0.0 }
 0x120   : > { %1097 = vst.msk [vmem:[%s1701_s16] sm:$0xf] %vm1096_vm0, %v1331_v18  ;;  %v1332_v22 = vpack.c.bf16 %v847_v19, %v847_v19  ;;  %1123 = vst.msk [vmem:[%s1701_s16 + $0x68] sm:$0xf] %vm1096_vm0, %v1357_v20  ;;  %v1358_v23 = vpack.c.bf16 %v873_v21, %v873_v21 }
 0x121   : > { %v655_v24 = vpop.f32.mrb[4].mxu0  ;;  %v759_v25 = vpop.f32.mrb[4].mxu1 }
 0x122   : > { %1098 = vst.msk [vmem:[%s1701_s16 + $0x4] sm:$0xf] %vm1096_vm0, %v1332_v22  ;;  %1124 = vst.msk [vmem:[%s1701_s16 + $0x6c] sm:$0xf] %vm1096_vm0, %v1358_v23  ;;  %v656_v26 = vadd.f32 %v1691_v3, %v655_v24  ;;  %v657_v27 = vpop.f32.mrb[5].mxu0  ;;  %v760_v28 = vadd.f32 %v1691_v3, %v759_v25  ;;  %v761_v29 = vpop.f32.mrb[5].mxu1 }
 0x123   : > { %v658_v30 = vpop.f32.mrb[6].mxu0  ;;  %v762_v31 = vpop.f32.mrb[6].mxu1 }
 0x124   : > { %v848_v32 = vmax.f32 %v656_v26, 0.0  ;;  %v659_v33 = vadd.f32 %v1691_v3, %v658_v30  ;;  %v660_v34 = vpop.f32.mrb[7].mxu0  ;;  %v874_v35 = vmax.f32 %v760_v28, 0.0  ;;  %v763_v36 = vadd.f32 %v1691_v3, %v762_v31  ;;  %v764_v37 = vpop.f32.mrb[7].mxu1 }
 0x126   : > { %v1333_v38 = vpack.c.bf16 %v848_v32, %v848_v32  ;;  %v849_v39 = vmax.f32 %v659_v33, 0.0  ;;  %v1359_v40 = vpack.c.bf16 %v874_v35, %v874_v35  ;;  %v875_v41 = vmax.f32 %v763_v36, 0.0 }
 0x128   : > { %1099 = vst.msk [vmem:[%s1701_s16 + $0x8] sm:$0xf] %vm1096_vm0, %v1333_v38  ;;  %v1334_v42 = vpack.c.bf16 %v849_v39, %v849_v39  ;;  %1125 = vst.msk [vmem:[%s1701_s16 + $0x70] sm:$0xf] %vm1096_vm0, %v1359_v40  ;;  %v1360_v43 = vpack.c.bf16 %v875_v41, %v875_v41 }
 0x129   : > { %v663_v44 = vpop.f32.mrb[8].mxu0  ;;  %v767_v45 = vpop.f32.mrb[8].mxu1 }
 0x12a   : > { %1100 = vst.msk [vmem:[%s1701_s16 + $0xc] sm:$0xf] %vm1096_vm0, %v1334_v42  ;;  %1126 = vst.msk [vmem:[%s1701_s16 + $0x74] sm:$0xf] %vm1096_vm0, %v1360_v43  ;;  %v664_v46 = vadd.f32 %v1691_v3, %v663_v44  ;;  %v665_v47 = vpop.f32.mrb[9].mxu0  ;;  %v768_v48 = vadd.f32 %v1691_v3, %v767_v45  ;;  %v769_v49 = vpop.f32.mrb[9].mxu1 }
 0x12b   : > { %v666_v50 = vpop.f32.mrb[10].mxu0  ;;  %v770_v51 = vpop.f32.mrb[10].mxu1 }
 0x12c   : > { %v850_v52 = vmax.f32 %v664_v46, 0.0  ;;  %v667_v53 = vadd.f32 %v1691_v3, %v666_v50  ;;  %v668_v54 = vpop.f32.mrb[11].mxu0  ;;  %v876_v55 = vmax.f32 %v768_v48, 0.0  ;;  %v771_v56 = vadd.f32 %v1691_v3, %v770_v51  ;;  %v772_v57 = vpop.f32.mrb[11].mxu1 }
 0x12e   : > { %v1335_v58 = vpack.c.bf16 %v850_v52, %v850_v52  ;;  %v851_v59 = vmax.f32 %v667_v53, 0.0  ;;  %v1361_v60 = vpack.c.bf16 %v876_v55, %v876_v55  ;;  %v877_v61 = vmax.f32 %v771_v56, 0.0 }
 0x130   : > { %1101 = vst.msk [vmem:[%s1701_s16 + $0x10] sm:$0xf] %vm1096_vm0, %v1335_v58  ;;  %v1336_v62 = vpack.c.bf16 %v851_v59, %v851_v59  ;;  %1127 = vst.msk [vmem:[%s1701_s16 + $0x78] sm:$0xf] %vm1096_vm0, %v1361_v60  ;;  %v1362_v63 = vpack.c.bf16 %v877_v61, %v877_v61 }
 0x131   : > { %v671_v0 = vpop.f32.mrb[12].mxu0  ;;  %v775_v1 = vpop.f32.mrb[12].mxu1 }
 0x132   : > { %1102 = vst.msk [vmem:[%s1701_s16 + $0x14] sm:$0xf] %vm1096_vm0, %v1336_v62  ;;  %1128 = vst.msk [vmem:[%s1701_s16 + $0x7c] sm:$0xf] %vm1096_vm0, %v1362_v63  ;;  %v672_v2 = vadd.f32 %v1691_v3, %v671_v0  ;;  %v673_v4 = vpop.f32.mrb[13].mxu0  ;;  %v776_v5 = vadd.f32 %v1691_v3, %v775_v1  ;;  %v777_v6 = vpop.f32.mrb[13].mxu1 }
 0x133   : > { %v674_v7 = vpop.f32.mrb[14].mxu0  ;;  %v778_v8 = vpop.f32.mrb[14].mxu1 }
 0x134   : > { %v852_v9 = vmax.f32 %v672_v2, 0.0  ;;  %v675_v10 = vadd.f32 %v1691_v3, %v674_v7  ;;  %v676_v11 = vpop.f32.mrb[15].mxu0  ;;  %v878_v12 = vmax.f32 %v776_v5, 0.0  ;;  %v779_v13 = vadd.f32 %v1691_v3, %v778_v8  ;;  %v780_v14 = vpop.f32.mrb[15].mxu1 }
 0x136   : > { %v1337_v15 = vpack.c.bf16 %v852_v9, %v852_v9  ;;  %v853_v16 = vmax.f32 %v675_v10, 0.0  ;;  %v1363_v17 = vpack.c.bf16 %v878_v12, %v878_v12  ;;  %v879_v18 = vmax.f32 %v779_v13, 0.0 }
 0x138   : > { %1103 = vst.msk [vmem:[%s1701_s16 + $0x18] sm:$0xf] %vm1096_vm0, %v1337_v15  ;;  %v1338_v19 = vpack.c.bf16 %v853_v16, %v853_v16  ;;  %1129 = vst.msk [vmem:[%s1701_s16 + $0x80] sm:$0xf] %vm1096_vm0, %v1363_v17  ;;  %v1364_v20 = vpack.c.bf16 %v879_v18, %v879_v18 }
 0x139   : > { %v679_v21 = vpop.f32.mrb[16].mxu0  ;;  %v783_v22 = vpop.f32.mrb[16].mxu1 }
 0x13a   : > { %1104 = vst.msk [vmem:[%s1701_s16 + $0x1c] sm:$0xf] %vm1096_vm0, %v1338_v19  ;;  %1130 = vst.msk [vmem:[%s1701_s16 + $0x84] sm:$0xf] %vm1096_vm0, %v1364_v20  ;;  %v680_v23 = vadd.f32 %v1691_v3, %v679_v21  ;;  %v681_v24 = vpop.f32.mrb[17].mxu0  ;;  %v784_v25 = vadd.f32 %v1691_v3, %v783_v22  ;;  %v785_v26 = vpop.f32.mrb[17].mxu1 }
 0x13b   : > { %v682_v27 = vpop.f32.mrb[18].mxu0  ;;  %v786_v28 = vpop.f32.mrb[18].mxu1 }
 0x13c   : > { %v854_v29 = vmax.f32 %v680_v23, 0.0  ;;  %v683_v30 = vadd.f32 %v1691_v3, %v682_v27  ;;  %v684_v31 = vpop.f32.mrb[19].mxu0  ;;  %v880_v32 = vmax.f32 %v784_v25, 0.0  ;;  %v787_v33 = vadd.f32 %v1691_v3, %v786_v28  ;;  %v788_v34 = vpop.f32.mrb[19].mxu1 }
 0x13e   : > { %v1339_v35 = vpack.c.bf16 %v854_v29, %v854_v29  ;;  %v855_v36 = vmax.f32 %v683_v30, 0.0  ;;  %v1365_v37 = vpack.c.bf16 %v880_v32, %v880_v32  ;;  %v881_v38 = vmax.f32 %v787_v33, 0.0 }
 0x140   : > { %1105 = vst.msk [vmem:[%s1701_s16 + $0x20] sm:$0xf] %vm1096_vm0, %v1339_v35  ;;  %v1340_v39 = vpack.c.bf16 %v855_v36, %v855_v36  ;;  %1131 = vst.msk [vmem:[%s1701_s16 + $0x88] sm:$0xf] %vm1096_vm0, %v1365_v37  ;;  %v1366_v40 = vpack.c.bf16 %v881_v38, %v881_v38 }
 0x141   : > { %v687_v41 = vpop.f32.mrb[20].mxu0  ;;  %v791_v42 = vpop.f32.mrb[20].mxu1 }
 0x142   : > { %1106 = vst.msk [vmem:[%s1701_s16 + $0x24] sm:$0xf] %vm1096_vm0, %v1340_v39  ;;  %1132 = vst.msk [vmem:[%s1701_s16 + $0x8c] sm:$0xf] %vm1096_vm0, %v1366_v40  ;;  %v688_v43 = vadd.f32 %v1691_v3, %v687_v41  ;;  %v689_v44 = vpop.f32.mrb[21].mxu0  ;;  %v792_v45 = vadd.f32 %v1691_v3, %v791_v42  ;;  %v793_v46 = vpop.f32.mrb[21].mxu1 }
 0x143   : > { %v690_v47 = vpop.f32.mrb[22].mxu0  ;;  %v794_v48 = vpop.f32.mrb[22].mxu1 }
 0x144   : > { %v856_v49 = vmax.f32 %v688_v43, 0.0  ;;  %v691_v50 = vadd.f32 %v1691_v3, %v690_v47  ;;  %v692_v51 = vpop.f32.mrb[23].mxu0  ;;  %v882_v52 = vmax.f32 %v792_v45, 0.0  ;;  %v795_v53 = vadd.f32 %v1691_v3, %v794_v48  ;;  %v796_v54 = vpop.f32.mrb[23].mxu1 }
 0x146   : > { %v1341_v55 = vpack.c.bf16 %v856_v49, %v856_v49  ;;  %v857_v56 = vmax.f32 %v691_v50, 0.0  ;;  %v1367_v57 = vpack.c.bf16 %v882_v52, %v882_v52  ;;  %v883_v58 = vmax.f32 %v795_v53, 0.0 }
 0x148   : > { %1107 = vst.msk [vmem:[%s1701_s16 + $0x28] sm:$0xf] %vm1096_vm0, %v1341_v55  ;;  %v1342_v59 = vpack.c.bf16 %v857_v56, %v857_v56  ;;  %1133 = vst.msk [vmem:[%s1701_s16 + $0x90] sm:$0xf] %vm1096_vm0, %v1367_v57  ;;  %v1368_v60 = vpack.c.bf16 %v883_v58, %v883_v58 }
 0x149   : > { %v695_v61 = vpop.f32.mrb[24].mxu0  ;;  %v799_v62 = vpop.f32.mrb[24].mxu1 }
 0x14a   : > { %1108 = vst.msk [vmem:[%s1701_s16 + $0x2c] sm:$0xf] %vm1096_vm0, %v1342_v59  ;;  %1134 = vst.msk [vmem:[%s1701_s16 + $0x94] sm:$0xf] %vm1096_vm0, %v1368_v60  ;;  %v696_v63 = vadd.f32 %v1691_v3, %v695_v61  ;;  %v697_v0 = vpop.f32.mrb[25].mxu0  ;;  %v800_v1 = vadd.f32 %v1691_v3, %v799_v62  ;;  %v801_v2 = vpop.f32.mrb[25].mxu1 }
 0x14b   : > { %v698_v4 = vpop.f32.mrb[26].mxu0  ;;  %v802_v5 = vpop.f32.mrb[26].mxu1 }
 0x14c   : > { %v858_v6 = vmax.f32 %v696_v63, 0.0  ;;  %v699_v7 = vadd.f32 %v1691_v3, %v698_v4  ;;  %v700_v8 = vpop.f32.mrb[27].mxu0  ;;  %v884_v9 = vmax.f32 %v800_v1, 0.0  ;;  %v803_v10 = vadd.f32 %v1691_v3, %v802_v5  ;;  %v804_v11 = vpop.f32.mrb[27].mxu1 }
 0x14e   : > { %v1343_v12 = vpack.c.bf16 %v858_v6, %v858_v6  ;;  %v859_v13 = vmax.f32 %v699_v7, 0.0  ;;  %v1369_v14 = vpack.c.bf16 %v884_v9, %v884_v9  ;;  %v885_v15 = vmax.f32 %v803_v10, 0.0 }
 0x150   : > { %1109 = vst.msk [vmem:[%s1701_s16 + $0x30] sm:$0xf] %vm1096_vm0, %v1343_v12  ;;  %v1344_v16 = vpack.c.bf16 %v859_v13, %v859_v13  ;;  %1135 = vst.msk [vmem:[%s1701_s16 + $0x98] sm:$0xf] %vm1096_vm0, %v1369_v14  ;;  %v1370_v17 = vpack.c.bf16 %v885_v15, %v885_v15 }
 0x151   : > { %v703_v18 = vpop.f32.mrb[28].mxu0  ;;  %v807_v19 = vpop.f32.mrb[28].mxu1 }
 0x152   : > { %1110 = vst.msk [vmem:[%s1701_s16 + $0x34] sm:$0xf] %vm1096_vm0, %v1344_v16  ;;  %1136 = vst.msk [vmem:[%s1701_s16 + $0x9c] sm:$0xf] %vm1096_vm0, %v1370_v17  ;;  %v704_v20 = vadd.f32 %v1691_v3, %v703_v18  ;;  %v705_v21 = vpop.f32.mrb[29].mxu0  ;;  %v808_v22 = vadd.f32 %v1691_v3, %v807_v19  ;;  %v809_v23 = vpop.f32.mrb[29].mxu1 }
 0x153   : > { %v706_v24 = vpop.f32.mrb[30].mxu0  ;;  %v810_v25 = vpop.f32.mrb[30].mxu1 }
 0x154   : > { %v860_v26 = vmax.f32 %v704_v20, 0.0  ;;  %v707_v27 = vadd.f32 %v1691_v3, %v706_v24  ;;  %v708_v28 = vpop.f32.mrb[31].mxu0  ;;  %v886_v29 = vmax.f32 %v808_v22, 0.0  ;;  %v811_v30 = vadd.f32 %v1691_v3, %v810_v25  ;;  %v812_v31 = vpop.f32.mrb[31].mxu1 }
 0x156   : > { %v1345_v32 = vpack.c.bf16 %v860_v26, %v860_v26  ;;  %v861_v33 = vmax.f32 %v707_v27, 0.0  ;;  %v1371_v34 = vpack.c.bf16 %v886_v29, %v886_v29  ;;  %v887_v35 = vmax.f32 %v811_v30, 0.0 }
 0x158   : > { %1111 = vst.msk [vmem:[%s1701_s16 + $0x38] sm:$0xf] %vm1096_vm0, %v1345_v32  ;;  %v1346_v36 = vpack.c.bf16 %v861_v33, %v861_v33  ;;  %1137 = vst.msk [vmem:[%s1701_s16 + $0xa0] sm:$0xf] %vm1096_vm0, %v1371_v34  ;;  %v1372_v37 = vpack.c.bf16 %v887_v35, %v887_v35 }
 0x159   : > { %v711_v38 = vpop.f32.mrb[32].mxu0  ;;  %v815_v39 = vpop.f32.mrb[32].mxu1 }
 0x15a   : > { %1112 = vst.msk [vmem:[%s1701_s16 + $0x3c] sm:$0xf] %vm1096_vm0, %v1346_v36  ;;  %1138 = vst.msk [vmem:[%s1701_s16 + $0xa4] sm:$0xf] %vm1096_vm0, %v1372_v37  ;;  %v712_v40 = vadd.f32 %v1691_v3, %v711_v38  ;;  %v713_v41 = vpop.f32.mrb[33].mxu0  ;;  %v816_v42 = vadd.f32 %v1691_v3, %v815_v39  ;;  %v817_v43 = vpop.f32.mrb[33].mxu1 }
 0x15b   : > { %v714_v44 = vpop.f32.mrb[34].mxu0  ;;  %v818_v45 = vpop.f32.mrb[34].mxu1 }
 0x15c   : > { %v862_v46 = vmax.f32 %v712_v40, 0.0  ;;  %v715_v47 = vadd.f32 %v1691_v3, %v714_v44  ;;  %v716_v48 = vpop.f32.mrb[35].mxu0  ;;  %v888_v49 = vmax.f32 %v816_v42, 0.0  ;;  %v819_v50 = vadd.f32 %v1691_v3, %v818_v45  ;;  %v820_v51 = vpop.f32.mrb[35].mxu1 }
 0x15e   : > { %v1347_v52 = vpack.c.bf16 %v862_v46, %v862_v46  ;;  %v863_v53 = vmax.f32 %v715_v47, 0.0  ;;  %v1373_v54 = vpack.c.bf16 %v888_v49, %v888_v49  ;;  %v889_v55 = vmax.f32 %v819_v50, 0.0 }
 0x160   : > { %1113 = vst.msk [vmem:[%s1701_s16 + $0x40] sm:$0xf] %vm1096_vm0, %v1347_v52  ;;  %v1348_v56 = vpack.c.bf16 %v863_v53, %v863_v53  ;;  %1139 = vst.msk [vmem:[%s1701_s16 + $0xa8] sm:$0xf] %vm1096_vm0, %v1373_v54  ;;  %v1374_v57 = vpack.c.bf16 %v889_v55, %v889_v55 }
 0x161   : > { %v719_v58 = vpop.f32.mrb[36].mxu0  ;;  %v823_v59 = vpop.f32.mrb[36].mxu1 }
 0x162   : > { %1114 = vst.msk [vmem:[%s1701_s16 + $0x44] sm:$0xf] %vm1096_vm0, %v1348_v56  ;;  %1140 = vst.msk [vmem:[%s1701_s16 + $0xac] sm:$0xf] %vm1096_vm0, %v1374_v57  ;;  %v720_v60 = vadd.f32 %v1691_v3, %v719_v58  ;;  %v721_v61 = vpop.f32.mrb[37].mxu0  ;;  %v824_v62 = vadd.f32 %v1691_v3, %v823_v59  ;;  %v825_v63 = vpop.f32.mrb[37].mxu1 }
 0x163   : > { %v722_v0 = vpop.f32.mrb[38].mxu0  ;;  %v826_v1 = vpop.f32.mrb[38].mxu1 }
 0x164   : > { %v864_v2 = vmax.f32 %v720_v60, 0.0  ;;  %v723_v4 = vadd.f32 %v1691_v3, %v722_v0  ;;  %v724_v5 = vpop.f32.mrb[39].mxu0  ;;  %v890_v6 = vmax.f32 %v824_v62, 0.0  ;;  %v827_v7 = vadd.f32 %v1691_v3, %v826_v1  ;;  %v828_v8 = vpop.f32.mrb[39].mxu1 }
 0x166   : > { %v1349_v9 = vpack.c.bf16 %v864_v2, %v864_v2  ;;  %v865_v10 = vmax.f32 %v723_v4, 0.0  ;;  %v1375_v11 = vpack.c.bf16 %v890_v6, %v890_v6  ;;  %v891_v12 = vmax.f32 %v827_v7, 0.0 }
 0x168   : > { %1115 = vst.msk [vmem:[%s1701_s16 + $0x48] sm:$0xf] %vm1096_vm0, %v1349_v9  ;;  %v1350_v13 = vpack.c.bf16 %v865_v10, %v865_v10  ;;  %1141 = vst.msk [vmem:[%s1701_s16 + $0xb0] sm:$0xf] %vm1096_vm0, %v1375_v11  ;;  %v1376_v14 = vpack.c.bf16 %v891_v12, %v891_v12 }
 0x169   : > { %v727_v15 = vpop.f32.mrb[40].mxu0  ;;  %v831_v16 = vpop.f32.mrb[40].mxu1 }
 0x16a   : > { %1116 = vst.msk [vmem:[%s1701_s16 + $0x4c] sm:$0xf] %vm1096_vm0, %v1350_v13  ;;  %1142 = vst.msk [vmem:[%s1701_s16 + $0xb4] sm:$0xf] %vm1096_vm0, %v1376_v14  ;;  %v728_v17 = vadd.f32 %v1691_v3, %v727_v15  ;;  %v729_v18 = vpop.f32.mrb[41].mxu0  ;;  %v832_v19 = vadd.f32 %v1691_v3, %v831_v16  ;;  %v833_v20 = vpop.f32.mrb[41].mxu1 }
 0x16b   : > { %v730_v21 = vpop.f32.mrb[42].mxu0  ;;  %v834_v22 = vpop.f32.mrb[42].mxu1 }
 0x16c   : > { %v866_v23 = vmax.f32 %v728_v17, 0.0  ;;  %v731_v24 = vadd.f32 %v1691_v3, %v730_v21  ;;  %v732_v25 = vpop.f32.mrb[43].mxu0  ;;  %v892_v26 = vmax.f32 %v832_v19, 0.0  ;;  %v835_v27 = vadd.f32 %v1691_v3, %v834_v22  ;;  %v836_v28 = vpop.f32.mrb[43].mxu1 }
 0x16e   : > { %v1351_v29 = vpack.c.bf16 %v866_v23, %v866_v23  ;;  %v867_v30 = vmax.f32 %v731_v24, 0.0  ;;  %v1377_v31 = vpack.c.bf16 %v892_v26, %v892_v26  ;;  %v893_v32 = vmax.f32 %v835_v27, 0.0 }
 0x170   : > { %1117 = vst.msk [vmem:[%s1701_s16 + $0x50] sm:$0xf] %vm1096_vm0, %v1351_v29  ;;  %v1352_v33 = vpack.c.bf16 %v867_v30, %v867_v30  ;;  %1143 = vst.msk [vmem:[%s1701_s16 + $0xb8] sm:$0xf] %vm1096_vm0, %v1377_v31  ;;  %v1378_v34 = vpack.c.bf16 %v893_v32, %v893_v32 }
 0x171   : > { %v735_v35 = vpop.f32.mrb[44].mxu0  ;;  %v839_v36 = vpop.f32.mrb[44].mxu1 }
 0x172   : > { %1118 = vst.msk [vmem:[%s1701_s16 + $0x54] sm:$0xf] %vm1096_vm0, %v1352_v33  ;;  %1144 = vst.msk [vmem:[%s1701_s16 + $0xbc] sm:$0xf] %vm1096_vm0, %v1378_v34  ;;  %v736_v37 = vadd.f32 %v1691_v3, %v735_v35  ;;  %v737_v38 = vpop.f32.mrb[45].mxu0  ;;  %v840_v39 = vadd.f32 %v1691_v3, %v839_v36  ;;  %v841_v40 = vpop.f32.mrb[45].mxu1 }
 0x173   : > { %v738_v41 = vpop.f32.mrb[46].mxu0  ;;  %v842_v42 = vpop.f32.mrb[46].mxu1 }
 0x174   : > { %v868_v43 = vmax.f32 %v736_v37, 0.0  ;;  %v739_v44 = vadd.f32 %v1691_v3, %v738_v41  ;;  %v740_v45 = vpop.f32.mrb[47].mxu0  ;;  %v894_v46 = vmax.f32 %v840_v39, 0.0  ;;  %v843_v47 = vadd.f32 %v1691_v3, %v842_v42  ;;  %v844_v48 = vpop.f32.mrb[47].mxu1 }
 0x176   : > { %v1353_v49 = vpack.c.bf16 %v868_v43, %v868_v43  ;;  %v869_v50 = vmax.f32 %v739_v44, 0.0  ;;  %v1379_v51 = vpack.c.bf16 %v894_v46, %v894_v46  ;;  %v895_v52 = vmax.f32 %v843_v47, 0.0 }
 0x178   : > { %1119 = vst.msk [vmem:[%s1701_s16 + $0x58] sm:$0xf] %vm1096_vm0, %v1353_v49  ;;  %v1354_v53 = vpack.c.bf16 %v869_v50, %v869_v50  ;;  %1145 = vst.msk [vmem:[%s1701_s16 + $0xc0] sm:$0xf] %vm1096_vm0, %v1379_v51  ;;  %v1380_v54 = vpack.c.bf16 %v895_v52, %v895_v52 }
 0x179   : > { %v743_v55 = vpop.f32.mrb[48].mxu0 }
 0x17a   : > { %1120 = vst.msk [vmem:[%s1701_s16 + $0x5c] sm:$0xf] %vm1096_vm0, %v1354_v53  ;;  %1146 = vst.msk [vmem:[%s1701_s16 + $0xc4] sm:$0xf] %vm1096_vm0, %v1380_v54  ;;  %v744_v56 = vadd.f32 %v1691_v3, %v743_v55  ;;  %v745_v57 = vpop.f32.mrb[49].mxu0 }
 0x17b   : > { %v746_v58 = vpop.f32.mrb[50].mxu0 }
 0x17c   : > { %v870_v59 = vmax.f32 %v744_v56, 0.0  ;;  %v747_v60 = vadd.f32 %v1691_v3, %v746_v58  ;;  %v748_v61 = vpop.f32.mrb[51].mxu0 }
 0x17e   : > { %v1355_v62 = vpack.c.bf16 %v870_v59, %v870_v59  ;;  %v871_v63 = vmax.f32 %v747_v60, 0.0 }
 0x180   : > { %1121 = vst.msk [vmem:[%s1701_s16 + $0x60] sm:$0xf] %vm1096_vm0, %v1355_v62  ;;  %v1356_v0 = vpack.c.bf16 %v871_v63, %v871_v63 }
 0x182   : > { %1122 = vst.msk [vmem:[%s1701_s16 + $0x64] sm:$0xf] %vm1096_vm0, %v1356_v0 }
 0x183 PF: > { %s13_s12 = sadd.s32 1, %s1519_s12  }
 0x184   : > { %p10_p4 = scmp.ge.s32.totalorder %s13_s12, 4  }
 0x186   :  { %12 = sbr.rel (!%p10_p4) target bundleno = 1 (0x1), region = 62 }

// kernel: dqn_forward.4
= control target key start
LH: loop header
LB: loop body
LE: loop exit
PB: predicated region body
PF: predicated region fallthrough
CT: control target
= control target key end

     0   :  { %vm880_vm0 = vcmask 519168   ;;  %vm901_vm1 = vcmask 516096   ;;  %s1637_s1 = inlined_call_operand.vmem [shape: bf16[512,64], index: 1, kind: input, shape index: {}]   ;;  %s1638_s0 = inlined_call_operand.vmem [shape: bf16[162,512], index: 0, kind: input, shape index: {}]   ;;  %s1639_s2 = inlined_call_operand.vmem [shape: f32[1,64], index: 2, kind: input, shape index: {}]   ;;  %s1640_s3 = inlined_call_operand.vmem [shape: bf16[162,64], index: 3, kind: output, shape index: {}]  }
   0x1   :  { %v1190_v0 = vld [vmem:[%s1637_s1 + $0x40] sm:$0xff]   ;;  %v1194_v4 = vld [vmem:[%s1637_s1 + $0x48] sm:$0xff]   ;;  %v1198_v8 = vld [vmem:[%s1637_s1 + $0x50] sm:$0xff]  }
   0x2   :  { %v1191_v1 = vld [vmem:[%s1637_s1 + $0xc0] sm:$0xff]   ;;  %1026 = vmatprep.subr.bf16.mxu0 %v1190_v0  ;;  %v1195_v5 = vld [vmem:[%s1637_s1 + $0xc8] sm:$0xff]   ;;  %v1199_v9 = vld [vmem:[%s1637_s1 + $0xd0] sm:$0xff]  }
   0x3   :  { %v1192_v2 = vld [vmem:[%s1637_s1] sm:$0xff]   ;;  %1108 = vmatprep.subr.bf16.mxu1 %v1191_v1  ;;  %v1196_v6 = vld [vmem:[%s1637_s1 + $0x8] sm:$0xff]   ;;  %v1200_v10 = vld [vmem:[%s1637_s1 + $0x10] sm:$0xff]  }
   0x4   :  { %v1193_v3 = vld [vmem:[%s1637_s1 + $0x80] sm:$0xff]   ;;  %1027 = vmatpush3.bf16.msra.mxu0 %v1192_v2  ;;  %v1197_v7 = vld [vmem:[%s1637_s1 + $0x88] sm:$0xff]   ;;  %v1201_v11 = vld [vmem:[%s1637_s1 + $0x90] sm:$0xff]  }
   0x5   :  { %1109 = vmatpush3.bf16.msra.mxu1 %v1193_v3  ;;  %1028 = vmatprep.subr.bf16.mxu0 %v1194_v4  ;;  %v1202_v12 = vld [vmem:[%s1637_s1 + $0x58] sm:$0xff]   ;;  %v1206_v16 = vld [vmem:[%s1637_s1 + $0x60] sm:$0xff]   ;;  %v1210_v20 = vld [vmem:[%s1637_s1 + $0x68] sm:$0xff]  }
   0x6   :  { %1110 = vmatprep.subr.bf16.mxu1 %v1195_v5  ;;  %v1203_v13 = vld [vmem:[%s1637_s1 + $0xd8] sm:$0xff]   ;;  %v1207_v17 = vld [vmem:[%s1637_s1 + $0xe0] sm:$0xff]   ;;  %v1211_v21 = vld [vmem:[%s1637_s1 + $0xe8] sm:$0xff]  }
   0x7   :  { %v1204_v14 = vld [vmem:[%s1637_s1 + $0x18] sm:$0xff]   ;;  %v1208_v18 = vld [vmem:[%s1637_s1 + $0x20] sm:$0xff]   ;;  %v1212_v22 = vld [vmem:[%s1637_s1 + $0x28] sm:$0xff]  }
   0x8   :  { %1029 = vmatpush3.bf16.msra.mxu0 %v1196_v6  ;;  %v1205_v15 = vld [vmem:[%s1637_s1 + $0x98] sm:$0xff]   ;;  %v1209_v19 = vld [vmem:[%s1637_s1 + $0xa0] sm:$0xff]   ;;  %v1213_v23 = vld [vmem:[%s1637_s1 + $0xa8] sm:$0xff]  }
   0x9   :  { %1111 = vmatpush3.bf16.msra.mxu1 %v1197_v7  ;;  %1030 = vmatprep.subr.bf16.mxu0 %v1198_v8  ;;  %v1214_v24 = vld [vmem:[%s1637_s1 + $0x70] sm:$0xff]   ;;  %v1218_v28 = vld [vmem:[%s1637_s1 + $0x78] sm:$0xff]   ;;  %v55_v6 = vld [vmem:[%s1638_s0 + $0x140] sm:$0x11] }
   0xa   :  { %1112 = vmatprep.subr.bf16.mxu1 %v1199_v9  ;;  %v1215_v25 = vld [vmem:[%s1637_s1 + $0xf0] sm:$0xff]   ;;  %v1219_v29 = vld [vmem:[%s1637_s1 + $0xf8] sm:$0xff]   ;;  %v56_v7 = vld [vmem:[%s1638_s0 + $0x148] sm:$0x11] }
   0xb   :  { %v1216_v26 = vld [vmem:[%s1637_s1 + $0x30] sm:$0xff]   ;;  %v1220_v30 = vld [vmem:[%s1637_s1 + $0x38] sm:$0xff]  }
   0xc   :  { %1031 = vmatpush3.bf16.msra.mxu0 %v1200_v10  ;;  %v1217_v27 = vld [vmem:[%s1637_s1 + $0xb0] sm:$0xff]   ;;  %v1221_v31 = vld [vmem:[%s1637_s1 + $0xb8] sm:$0xff]   ;;  %v949_v10 = vcombine.high %v55_v6, %v55_v6 }
   0xd   :  { %1113 = vmatpush3.bf16.msra.mxu1 %v1201_v11  ;;  %1032 = vmatprep.subr.bf16.mxu0 %v1202_v12  ;;  %v1222_v32 = vld [vmem:[%s1638_s0] ss:$16 sps:$4 sm:$0xff]   ;;  %v1224_v33 = vld [vmem:[%s1638_s0 + $0x4] ss:$16 sps:$4 sm:$0xff]   ;;  %v1225_v34 = vld [vmem:[%s1638_s0 + $0x8] ss:$16 sps:$4 sm:$0xff]   ;;  %v951_v11 = vcombine.high %v56_v7, %v56_v7  ;;  %v948_v12 = vcombine.low %v55_v6, %v55_v6 }
   0xe   :  { %1114 = vmatprep.subr.bf16.mxu1 %v1203_v13  ;;  %v1227_v35 = vld [vmem:[%s1638_s0 + $0xc] ss:$16 sps:$4 sm:$0xff]   ;;  %566 = vmatprep.mubr.bf16.mxu0 %v1224_v33  ;;  %v1228_v36 = vld [vmem:[%s1638_s0 + $0x24] ss:$16 sps:$4 sm:$0xff]   ;;  %v1232_v38 = vld [vmem:[%s1638_s0 + $0x20] ss:$16 sps:$4 sm:$0xff]   ;;  %v950_v13 = vcombine.low %v56_v7, %v56_v7 }
   0xf   :  { %686 = vmatprep.mubr.bf16.mxu1 %v1227_v35  ;;  %v1230_v37 = vld [vmem:[%s1638_s0 + $0x2c] ss:$16 sps:$4 sm:$0xff]   ;;  %v1233_v39 = vld [vmem:[%s1638_s0 + $0x28] ss:$16 sps:$4 sm:$0xff]   ;;  %v1234_v40 = vld [vmem:[%s1638_s0 + $0x44] ss:$16 sps:$4 sm:$0xff]  }
  0x10   :  { %1033 = vmatpush3.bf16.msra.mxu0 %v1204_v14  ;;  %v1236_v41 = vld [vmem:[%s1638_s0 + $0x4c] ss:$16 sps:$4 sm:$0xff]   ;;  %v1238_v42 = vld [vmem:[%s1638_s0 + $0x40] ss:$16 sps:$4 sm:$0xff]   ;;  %v1239_v43 = vld [vmem:[%s1638_s0 + $0x48] ss:$16 sps:$4 sm:$0xff]  }
  0x11   :  { %1115 = vmatpush3.bf16.msra.mxu1 %v1205_v15  ;;  %1034 = vmatprep.subr.bf16.mxu0 %v1206_v16  ;;  %v1240_v44 = vld [vmem:[%s1638_s0 + $0x64] ss:$16 sps:$4 sm:$0xff]   ;;  %v1242_v45 = vld [vmem:[%s1638_s0 + $0x6c] ss:$16 sps:$4 sm:$0xff]   ;;  %v1244_v46 = vld [vmem:[%s1638_s0 + $0x60] ss:$16 sps:$4 sm:$0xff]  }
  0x12   :  { %1116 = vmatprep.subr.bf16.mxu1 %v1207_v17  ;;  %v1245_v47 = vld [vmem:[%s1638_s0 + $0x68] ss:$16 sps:$4 sm:$0xff]   ;;  %v1246_v48 = vld [vmem:[%s1638_s0 + $0x84] ss:$16 sps:$4 sm:$0xff]   ;;  %v1248_v49 = vld [vmem:[%s1638_s0 + $0x8c] ss:$16 sps:$4 sm:$0xff]  }
  0x13   :  { %v1250_v50 = vld [vmem:[%s1638_s0 + $0x80] ss:$16 sps:$4 sm:$0xff]   ;;  %v1251_v51 = vld [vmem:[%s1638_s0 + $0x88] ss:$16 sps:$4 sm:$0xff]   ;;  %v1252_v52 = vld [vmem:[%s1638_s0 + $0xa4] ss:$16 sps:$4 sm:$0xff]  }
  0x14   :  { %1035 = vmatpush3.bf16.msra.mxu0 %v1208_v18  ;;  %v1254_v53 = vld [vmem:[%s1638_s0 + $0xac] ss:$16 sps:$4 sm:$0xff]   ;;  %v1256_v54 = vld [vmem:[%s1638_s0 + $0xa0] ss:$16 sps:$4 sm:$0xff]   ;;  %v1257_v55 = vld [vmem:[%s1638_s0 + $0xa8] ss:$16 sps:$4 sm:$0xff]  }
  0x15   :  { %1117 = vmatpush3.bf16.msra.mxu1 %v1209_v19  ;;  %1036 = vmatprep.subr.bf16.mxu0 %v1210_v20  ;;  %v1258_v56 = vld [vmem:[%s1638_s0 + $0xc4] ss:$16 sps:$4 sm:$0xff]   ;;  %v1260_v57 = vld [vmem:[%s1638_s0 + $0xcc] ss:$16 sps:$4 sm:$0xff]   ;;  %v1262_v58 = vld [vmem:[%s1638_s0 + $0xc0] ss:$16 sps:$4 sm:$0xff]  }
  0x16   :  { %1118 = vmatprep.subr.bf16.mxu1 %v1211_v21  ;;  %v1263_v59 = vld [vmem:[%s1638_s0 + $0xc8] ss:$16 sps:$4 sm:$0xff]   ;;  %v1264_v60 = vld [vmem:[%s1638_s0 + $0xe4] ss:$16 sps:$4 sm:$0xff]   ;;  %v1266_v61 = vld [vmem:[%s1638_s0 + $0xec] ss:$16 sps:$4 sm:$0xff]  }
  0x17   :  { %v1268_v62 = vld [vmem:[%s1638_s0 + $0xe0] ss:$16 sps:$4 sm:$0xff]   ;;  %v1269_v63 = vld [vmem:[%s1638_s0 + $0xe8] ss:$16 sps:$4 sm:$0xff]   ;;  %v1270_v0 = vld [vmem:[%s1638_s0 + $0x104] ss:$16 sps:$4 sm:$0xff]  }
  0x18   :  { %1037 = vmatpush3.bf16.msra.mxu0 %v1212_v22  ;;  %v1272_v1 = vld [vmem:[%s1638_s0 + $0x10c] ss:$16 sps:$4 sm:$0xff]   ;;  %v1274_v2 = vld [vmem:[%s1638_s0 + $0x100] ss:$16 sps:$4 sm:$0xff]   ;;  %v1275_v3 = vld [vmem:[%s1638_s0 + $0x108] ss:$16 sps:$4 sm:$0xff]  }
  0x19   :  { %1119 = vmatpush3.bf16.msra.mxu1 %v1213_v23  ;;  %1038 = vmatprep.subr.bf16.mxu0 %v1214_v24  ;;  %v1276_v4 = vld [vmem:[%s1638_s0 + $0x124] ss:$16 sps:$4 sm:$0xff]   ;;  %v1278_v5 = vld [vmem:[%s1638_s0 + $0x12c] ss:$16 sps:$4 sm:$0xff]   ;;  %v1280_v8 = vld [vmem:[%s1638_s0 + $0x120] ss:$16 sps:$4 sm:$0xff]  }
  0x1a   :  { %1120 = vmatprep.subr.bf16.mxu1 %v1215_v25  ;;  %v1281_v9 = vld [vmem:[%s1638_s0 + $0x128] ss:$16 sps:$4 sm:$0xff]   ;;  %v1531_v16 = vld [vmem:[%s1639_s2] ss:$0 sm:$0xff] }
  0x1c   :  { %1039 = vmatpush3.bf16.msra.mxu0 %v1216_v26 }
  0x1d   :  { %1121 = vmatpush3.bf16.msra.mxu1 %v1217_v27  ;;  %1040 = vmatprep.subr.bf16.mxu0 %v1218_v28 }
  0x1e   :  { %1122 = vmatprep.subr.bf16.mxu1 %v1219_v29 }
  0x20   :  { %1041 = vmatpush3.bf16.msra.mxu0 %v1220_v30 }
  0x21   :  { %1123 = vmatpush3.bf16.msra.mxu1 %v1221_v31 }
  0x23   :  { %567 = vmatmul.mubr.bf16.vlgmr.msra.gmra.mrb[0].mxu0 %v1222_v32 }
  0x24   :  { %687 = vmatmul.mubr.bf16.vlgmr.msra.gmra.mrb[0].mxu1 %v1225_v34  ;;  %574 = vmatprep.mubr.bf16.mxu0 %v1228_v36 }
  0x25   :  { %694 = vmatprep.mubr.bf16.mxu1 %v1230_v37 }
  0x2b   :  { %575 = vmatmul.mubr.bf16.gmra.mrb[4].mxu0 %v1232_v38 }
  0x2c   :  { %695 = vmatmul.mubr.bf16.gmra.mrb[4].mxu1 %v1233_v39  ;;  %582 = vmatprep.mubr.bf16.mxu0 %v1234_v40 }
  0x2d   :  { %702 = vmatprep.mubr.bf16.mxu1 %v1236_v41 }
  0x33   :  { %583 = vmatmul.mubr.bf16.gmra.mrb[8].mxu0 %v1238_v42 }
  0x34   :  { %703 = vmatmul.mubr.bf16.gmra.mrb[8].mxu1 %v1239_v43  ;;  %590 = vmatprep.mubr.bf16.mxu0 %v1240_v44 }
  0x35   :  { %710 = vmatprep.mubr.bf16.mxu1 %v1242_v45 }
  0x3b   :  { %591 = vmatmul.mubr.bf16.gmra.mrb[12].mxu0 %v1244_v46 }
  0x3c   :  { %711 = vmatmul.mubr.bf16.gmra.mrb[12].mxu1 %v1245_v47  ;;  %598 = vmatprep.mubr.bf16.mxu0 %v1246_v48 }
  0x3d   :  { %718 = vmatprep.mubr.bf16.mxu1 %v1248_v49 }
  0x43   :  { %599 = vmatmul.mubr.bf16.gmra.mrb[16].mxu0 %v1250_v50 }
  0x44   :  { %719 = vmatmul.mubr.bf16.gmra.mrb[16].mxu1 %v1251_v51  ;;  %606 = vmatprep.mubr.bf16.mxu0 %v1252_v52 }
  0x45   :  { %726 = vmatprep.mubr.bf16.mxu1 %v1254_v53 }
  0x4b   :  { %607 = vmatmul.mubr.bf16.gmra.mrb[20].mxu0 %v1256_v54 }
  0x4c   :  { %727 = vmatmul.mubr.bf16.gmra.mrb[20].mxu1 %v1257_v55  ;;  %614 = vmatprep.mubr.bf16.mxu0 %v1258_v56 }
  0x4d   :  { %734 = vmatprep.mubr.bf16.mxu1 %v1260_v57 }
  0x53   :  { %615 = vmatmul.mubr.bf16.gmra.mrb[24].mxu0 %v1262_v58 }
  0x54   :  { %735 = vmatmul.mubr.bf16.gmra.mrb[24].mxu1 %v1263_v59  ;;  %622 = vmatprep.mubr.bf16.mxu0 %v1264_v60 }
  0x55   :  { %742 = vmatprep.mubr.bf16.mxu1 %v1266_v61 }
  0x5b   :  { %623 = vmatmul.mubr.bf16.gmra.mrb[28].mxu0 %v1268_v62 }
  0x5c   :  { %743 = vmatmul.mubr.bf16.gmra.mrb[28].mxu1 %v1269_v63  ;;  %630 = vmatprep.mubr.bf16.mxu0 %v1270_v0 }
  0x5d   :  { %750 = vmatprep.mubr.bf16.mxu1 %v1272_v1 }
  0x63   :  { %631 = vmatmul.mubr.bf16.gmra.mrb[32].mxu0 %v1274_v2 }
  0x64   :  { %751 = vmatmul.mubr.bf16.gmra.mrb[32].mxu1 %v1275_v3  ;;  %638 = vmatprep.mubr.bf16.mxu0 %v1276_v4 }
  0x65   :  { %758 = vmatprep.mubr.bf16.mxu1 %v1278_v5 }
  0x6b   :  { %639 = vmatmul.mubr.bf16.gmra.mrb[36].mxu0 %v1280_v8 }
  0x6c   :  { %759 = vmatmul.mubr.bf16.gmra.mrb[36].mxu1 %v1281_v9  ;;  %646 = vmatprep.mubr.bf16.mxu0 %v949_v10 }
  0x6d   :  { %766 = vmatprep.mubr.bf16.mxu1 %v951_v11 }
  0x73   :  { %647 = vmatmul.mubr.bf16.gmra.mrb[40].mxu0 %v948_v12 }
  0x74   :  { %767 = vmatmul.mubr.bf16.gmra.mrb[40].mxu1 %v950_v13 }
  0xf6   :  { %v1042_v14 = vpop.f32.mrb[0].mxu0 }
  0xf7   :  { %v1124_v15 = vpop.f32.mrb[0].mxu1  ;;  %v1043_v17 = vpop.f32.mrb[1].mxu0 }
  0xf8   :  { %v1044_v18 = vadd.f32 %v1043_v17, %v1042_v14  ;;  %v1125_v19 = vpop.f32.mrb[1].mxu1  ;;  %v1045_v20 = vpop.f32.mrb[2].mxu0 }
  0xf9   :  { %v1126_v21 = vadd.f32 %v1125_v19, %v1124_v15  ;;  %v1127_v22 = vpop.f32.mrb[2].mxu1  ;;  %v1046_v23 = vpop.f32.mrb[3].mxu0 }
  0xfa   :  { %v569_v24 = vadd.f32 %v1044_v18, %v1531_v16  ;;  %v1047_v25 = vadd.f32 %v1046_v23, %v1045_v20  ;;  %v1128_v26 = vpop.f32.mrb[3].mxu1 }
  0xfb   :  { %v1129_v27 = vadd.f32 %v1128_v26, %v1127_v22 }
  0xfc   :  { %v689_v28 = vadd.f32 %v1126_v21, %v569_v24  ;;  %v572_v29 = vadd.f32 %v1047_v25, %v1531_v16 }
  0xfe   :  { %v774_v30 = vmax.f32 %v689_v28, 0.0  ;;  %v692_v31 = vadd.f32 %v1129_v27, %v572_v29  ;;  %v1048_v32 = vpop.f32.mrb[4].mxu0 }
  0xff   :  { %v1130_v33 = vpop.f32.mrb[4].mxu1  ;;  %v1049_v34 = vpop.f32.mrb[5].mxu0 }
 0x100   :  { %v1005_v35 = vpack.c.bf16 %v774_v30, %v774_v30  ;;  %v775_v36 = vmax.f32 %v692_v31, 0.0  ;;  %v1050_v37 = vadd.f32 %v1049_v34, %v1048_v32  ;;  %v1131_v38 = vpop.f32.mrb[5].mxu1  ;;  %v1051_v39 = vpop.f32.mrb[6].mxu0 }
 0x101   :  { %v1132_v40 = vadd.f32 %v1131_v38, %v1130_v33  ;;  %v1133_v41 = vpop.f32.mrb[6].mxu1  ;;  %v1052_v42 = vpop.f32.mrb[7].mxu0 }
 0x102   :  { %881 = vst.msk [vmem:[%s1640_s3] sm:$0xf] %vm880_vm0, %v1005_v35  ;;  %v1006_v43 = vpack.c.bf16 %v775_v36, %v775_v36  ;;  %v577_v44 = vadd.f32 %v1050_v37, %v1531_v16  ;;  %v1053_v45 = vadd.f32 %v1052_v42, %v1051_v39  ;;  %v1134_v46 = vpop.f32.mrb[7].mxu1 }
 0x103   :  { %v1135_v47 = vadd.f32 %v1134_v46, %v1133_v41 }
 0x104   :  { %882 = vst.msk [vmem:[%s1640_s3 + $0x4] sm:$0xf] %vm880_vm0, %v1006_v43  ;;  %v697_v48 = vadd.f32 %v1132_v40, %v577_v44  ;;  %v580_v49 = vadd.f32 %v1053_v45, %v1531_v16 }
 0x106   :  { %v776_v50 = vmax.f32 %v697_v48, 0.0  ;;  %v700_v51 = vadd.f32 %v1135_v47, %v580_v49  ;;  %v1054_v52 = vpop.f32.mrb[8].mxu0 }
 0x107   :  { %v1136_v53 = vpop.f32.mrb[8].mxu1  ;;  %v1055_v54 = vpop.f32.mrb[9].mxu0 }
 0x108   :  { %v1007_v55 = vpack.c.bf16 %v776_v50, %v776_v50  ;;  %v777_v56 = vmax.f32 %v700_v51, 0.0  ;;  %v1056_v57 = vadd.f32 %v1055_v54, %v1054_v52  ;;  %v1137_v58 = vpop.f32.mrb[9].mxu1  ;;  %v1057_v59 = vpop.f32.mrb[10].mxu0 }
 0x109   :  { %v1138_v60 = vadd.f32 %v1137_v58, %v1136_v53  ;;  %v1139_v61 = vpop.f32.mrb[10].mxu1  ;;  %v1058_v62 = vpop.f32.mrb[11].mxu0 }
 0x10a   :  { %883 = vst.msk [vmem:[%s1640_s3 + $0x8] sm:$0xf] %vm880_vm0, %v1007_v55  ;;  %v1008_v63 = vpack.c.bf16 %v777_v56, %v777_v56  ;;  %v585_v0 = vadd.f32 %v1056_v57, %v1531_v16  ;;  %v1059_v1 = vadd.f32 %v1058_v62, %v1057_v59  ;;  %v1140_v2 = vpop.f32.mrb[11].mxu1 }
 0x10b   :  { %v1141_v3 = vadd.f32 %v1140_v2, %v1139_v61 }
 0x10c   :  { %884 = vst.msk [vmem:[%s1640_s3 + $0xc] sm:$0xf] %vm880_vm0, %v1008_v63  ;;  %v705_v4 = vadd.f32 %v1138_v60, %v585_v0  ;;  %v588_v5 = vadd.f32 %v1059_v1, %v1531_v16 }
 0x10e   :  { %v778_v6 = vmax.f32 %v705_v4, 0.0  ;;  %v708_v7 = vadd.f32 %v1141_v3, %v588_v5  ;;  %v1060_v8 = vpop.f32.mrb[12].mxu0 }
 0x10f   :  { %v1142_v9 = vpop.f32.mrb[12].mxu1  ;;  %v1061_v10 = vpop.f32.mrb[13].mxu0 }
 0x110   :  { %v1009_v11 = vpack.c.bf16 %v778_v6, %v778_v6  ;;  %v779_v12 = vmax.f32 %v708_v7, 0.0  ;;  %v1062_v13 = vadd.f32 %v1061_v10, %v1060_v8  ;;  %v1143_v14 = vpop.f32.mrb[13].mxu1  ;;  %v1063_v15 = vpop.f32.mrb[14].mxu0 }
 0x111   :  { %v1144_v17 = vadd.f32 %v1143_v14, %v1142_v9  ;;  %v1145_v18 = vpop.f32.mrb[14].mxu1  ;;  %v1064_v19 = vpop.f32.mrb[15].mxu0 }
 0x112   :  { %885 = vst.msk [vmem:[%s1640_s3 + $0x10] sm:$0xf] %vm880_vm0, %v1009_v11  ;;  %v1010_v20 = vpack.c.bf16 %v779_v12, %v779_v12  ;;  %v593_v21 = vadd.f32 %v1062_v13, %v1531_v16  ;;  %v1065_v22 = vadd.f32 %v1064_v19, %v1063_v15  ;;  %v1146_v23 = vpop.f32.mrb[15].mxu1 }
 0x113   :  { %v1147_v24 = vadd.f32 %v1146_v23, %v1145_v18 }
 0x114   :  { %886 = vst.msk [vmem:[%s1640_s3 + $0x14] sm:$0xf] %vm880_vm0, %v1010_v20  ;;  %v713_v25 = vadd.f32 %v1144_v17, %v593_v21  ;;  %v596_v26 = vadd.f32 %v1065_v22, %v1531_v16 }
 0x116   :  { %v780_v27 = vmax.f32 %v713_v25, 0.0  ;;  %v716_v28 = vadd.f32 %v1147_v24, %v596_v26  ;;  %v1066_v29 = vpop.f32.mrb[16].mxu0 }
 0x117   :  { %v1148_v30 = vpop.f32.mrb[16].mxu1  ;;  %v1067_v31 = vpop.f32.mrb[17].mxu0 }
 0x118   :  { %v1011_v32 = vpack.c.bf16 %v780_v27, %v780_v27  ;;  %v781_v33 = vmax.f32 %v716_v28, 0.0  ;;  %v1068_v34 = vadd.f32 %v1067_v31, %v1066_v29  ;;  %v1149_v35 = vpop.f32.mrb[17].mxu1  ;;  %v1069_v36 = vpop.f32.mrb[18].mxu0 }
 0x119   :  { %v1150_v37 = vadd.f32 %v1149_v35, %v1148_v30  ;;  %v1151_v38 = vpop.f32.mrb[18].mxu1  ;;  %v1070_v39 = vpop.f32.mrb[19].mxu0 }
 0x11a   :  { %887 = vst.msk [vmem:[%s1640_s3 + $0x18] sm:$0xf] %vm880_vm0, %v1011_v32  ;;  %v1012_v40 = vpack.c.bf16 %v781_v33, %v781_v33  ;;  %v601_v41 = vadd.f32 %v1068_v34, %v1531_v16  ;;  %v1071_v42 = vadd.f32 %v1070_v39, %v1069_v36  ;;  %v1152_v43 = vpop.f32.mrb[19].mxu1 }
 0x11b   :  { %v1153_v44 = vadd.f32 %v1152_v43, %v1151_v38 }
 0x11c   :  { %888 = vst.msk [vmem:[%s1640_s3 + $0x1c] sm:$0xf] %vm880_vm0, %v1012_v40  ;;  %v721_v45 = vadd.f32 %v1150_v37, %v601_v41  ;;  %v604_v46 = vadd.f32 %v1071_v42, %v1531_v16 }
 0x11e   :  { %v782_v47 = vmax.f32 %v721_v45, 0.0  ;;  %v724_v48 = vadd.f32 %v1153_v44, %v604_v46  ;;  %v1072_v49 = vpop.f32.mrb[20].mxu0 }
 0x11f   :  { %v1154_v50 = vpop.f32.mrb[20].mxu1  ;;  %v1073_v51 = vpop.f32.mrb[21].mxu0 }
 0x120   :  { %v1013_v52 = vpack.c.bf16 %v782_v47, %v782_v47  ;;  %v783_v53 = vmax.f32 %v724_v48, 0.0  ;;  %v1074_v54 = vadd.f32 %v1073_v51, %v1072_v49  ;;  %v1155_v55 = vpop.f32.mrb[21].mxu1  ;;  %v1075_v56 = vpop.f32.mrb[22].mxu0 }
 0x121   :  { %v1156_v57 = vadd.f32 %v1155_v55, %v1154_v50  ;;  %v1157_v58 = vpop.f32.mrb[22].mxu1  ;;  %v1076_v59 = vpop.f32.mrb[23].mxu0 }
 0x122   :  { %889 = vst.msk [vmem:[%s1640_s3 + $0x20] sm:$0xf] %vm880_vm0, %v1013_v52  ;;  %v1014_v60 = vpack.c.bf16 %v783_v53, %v783_v53  ;;  %v609_v61 = vadd.f32 %v1074_v54, %v1531_v16  ;;  %v1077_v62 = vadd.f32 %v1076_v59, %v1075_v56  ;;  %v1158_v63 = vpop.f32.mrb[23].mxu1 }
 0x123   :  { %v1159_v0 = vadd.f32 %v1158_v63, %v1157_v58 }
 0x124   :  { %890 = vst.msk [vmem:[%s1640_s3 + $0x24] sm:$0xf] %vm880_vm0, %v1014_v60  ;;  %v729_v1 = vadd.f32 %v1156_v57, %v609_v61  ;;  %v612_v2 = vadd.f32 %v1077_v62, %v1531_v16 }
 0x126   :  { %v784_v3 = vmax.f32 %v729_v1, 0.0  ;;  %v732_v4 = vadd.f32 %v1159_v0, %v612_v2  ;;  %v1078_v5 = vpop.f32.mrb[24].mxu0 }
 0x127   :  { %v1160_v6 = vpop.f32.mrb[24].mxu1  ;;  %v1079_v7 = vpop.f32.mrb[25].mxu0 }
 0x128   :  { %v1015_v8 = vpack.c.bf16 %v784_v3, %v784_v3  ;;  %v785_v9 = vmax.f32 %v732_v4, 0.0  ;;  %v1080_v10 = vadd.f32 %v1079_v7, %v1078_v5  ;;  %v1161_v11 = vpop.f32.mrb[25].mxu1  ;;  %v1081_v12 = vpop.f32.mrb[26].mxu0 }
 0x129   :  { %v1162_v13 = vadd.f32 %v1161_v11, %v1160_v6  ;;  %v1163_v14 = vpop.f32.mrb[26].mxu1  ;;  %v1082_v15 = vpop.f32.mrb[27].mxu0 }
 0x12a   :  { %891 = vst.msk [vmem:[%s1640_s3 + $0x28] sm:$0xf] %vm880_vm0, %v1015_v8  ;;  %v1016_v17 = vpack.c.bf16 %v785_v9, %v785_v9  ;;  %v617_v18 = vadd.f32 %v1080_v10, %v1531_v16  ;;  %v1083_v19 = vadd.f32 %v1082_v15, %v1081_v12  ;;  %v1164_v20 = vpop.f32.mrb[27].mxu1 }
 0x12b   :  { %v1165_v21 = vadd.f32 %v1164_v20, %v1163_v14 }
 0x12c   :  { %892 = vst.msk [vmem:[%s1640_s3 + $0x2c] sm:$0xf] %vm880_vm0, %v1016_v17  ;;  %v737_v22 = vadd.f32 %v1162_v13, %v617_v18  ;;  %v620_v23 = vadd.f32 %v1083_v19, %v1531_v16 }
 0x12e   :  { %v786_v24 = vmax.f32 %v737_v22, 0.0  ;;  %v740_v25 = vadd.f32 %v1165_v21, %v620_v23  ;;  %v1084_v26 = vpop.f32.mrb[28].mxu0 }
 0x12f   :  { %v1166_v27 = vpop.f32.mrb[28].mxu1  ;;  %v1085_v28 = vpop.f32.mrb[29].mxu0 }
 0x130   :  { %v1017_v29 = vpack.c.bf16 %v786_v24, %v786_v24  ;;  %v787_v30 = vmax.f32 %v740_v25, 0.0  ;;  %v1086_v31 = vadd.f32 %v1085_v28, %v1084_v26  ;;  %v1167_v32 = vpop.f32.mrb[29].mxu1  ;;  %v1087_v33 = vpop.f32.mrb[30].mxu0 }
 0x131   :  { %v1168_v34 = vadd.f32 %v1167_v32, %v1166_v27  ;;  %v1169_v35 = vpop.f32.mrb[30].mxu1  ;;  %v1088_v36 = vpop.f32.mrb[31].mxu0 }
 0x132   :  { %893 = vst.msk [vmem:[%s1640_s3 + $0x30] sm:$0xf] %vm880_vm0, %v1017_v29  ;;  %v1018_v37 = vpack.c.bf16 %v787_v30, %v787_v30  ;;  %v625_v38 = vadd.f32 %v1086_v31, %v1531_v16  ;;  %v1089_v39 = vadd.f32 %v1088_v36, %v1087_v33  ;;  %v1170_v40 = vpop.f32.mrb[31].mxu1 }
 0x133   :  { %v1171_v41 = vadd.f32 %v1170_v40, %v1169_v35 }
 0x134   :  { %894 = vst.msk [vmem:[%s1640_s3 + $0x34] sm:$0xf] %vm880_vm0, %v1018_v37  ;;  %v745_v42 = vadd.f32 %v1168_v34, %v625_v38  ;;  %v628_v43 = vadd.f32 %v1089_v39, %v1531_v16 }
 0x136   :  { %v788_v44 = vmax.f32 %v745_v42, 0.0  ;;  %v748_v45 = vadd.f32 %v1171_v41, %v628_v43  ;;  %v1090_v46 = vpop.f32.mrb[32].mxu0 }
 0x137   :  { %v1172_v47 = vpop.f32.mrb[32].mxu1  ;;  %v1091_v48 = vpop.f32.mrb[33].mxu0 }
 0x138   :  { %v1019_v49 = vpack.c.bf16 %v788_v44, %v788_v44  ;;  %v789_v50 = vmax.f32 %v748_v45, 0.0  ;;  %v1092_v51 = vadd.f32 %v1091_v48, %v1090_v46  ;;  %v1173_v52 = vpop.f32.mrb[33].mxu1  ;;  %v1093_v53 = vpop.f32.mrb[34].mxu0 }
 0x139   :  { %v1174_v54 = vadd.f32 %v1173_v52, %v1172_v47  ;;  %v1175_v55 = vpop.f32.mrb[34].mxu1  ;;  %v1094_v56 = vpop.f32.mrb[35].mxu0 }
 0x13a   :  { %895 = vst.msk [vmem:[%s1640_s3 + $0x38] sm:$0xf] %vm880_vm0, %v1019_v49  ;;  %v1020_v57 = vpack.c.bf16 %v789_v50, %v789_v50  ;;  %v633_v58 = vadd.f32 %v1092_v51, %v1531_v16  ;;  %v1095_v59 = vadd.f32 %v1094_v56, %v1093_v53  ;;  %v1176_v60 = vpop.f32.mrb[35].mxu1 }
 0x13b   :  { %v1177_v61 = vadd.f32 %v1176_v60, %v1175_v55 }
 0x13c   :  { %896 = vst.msk [vmem:[%s1640_s3 + $0x3c] sm:$0xf] %vm880_vm0, %v1020_v57  ;;  %v753_v62 = vadd.f32 %v1174_v54, %v633_v58  ;;  %v636_v63 = vadd.f32 %v1095_v59, %v1531_v16 }
 0x13e   :  { %v790_v0 = vmax.f32 %v753_v62, 0.0  ;;  %v756_v1 = vadd.f32 %v1177_v61, %v636_v63  ;;  %v1096_v2 = vpop.f32.mrb[36].mxu0 }
 0x13f   :  { %v1178_v3 = vpop.f32.mrb[36].mxu1  ;;  %v1097_v4 = vpop.f32.mrb[37].mxu0 }
 0x140   :  { %v1021_v5 = vpack.c.bf16 %v790_v0, %v790_v0  ;;  %v791_v6 = vmax.f32 %v756_v1, 0.0  ;;  %v1098_v7 = vadd.f32 %v1097_v4, %v1096_v2  ;;  %v1179_v8 = vpop.f32.mrb[37].mxu1  ;;  %v1099_v9 = vpop.f32.mrb[38].mxu0 }
 0x141   :  { %v1180_v10 = vadd.f32 %v1179_v8, %v1178_v3  ;;  %v1181_v11 = vpop.f32.mrb[38].mxu1  ;;  %v1100_v12 = vpop.f32.mrb[39].mxu0 }
 0x142   :  { %897 = vst.msk [vmem:[%s1640_s3 + $0x40] sm:$0xf] %vm880_vm0, %v1021_v5  ;;  %v1022_v13 = vpack.c.bf16 %v791_v6, %v791_v6  ;;  %v641_v14 = vadd.f32 %v1098_v7, %v1531_v16  ;;  %v1101_v15 = vadd.f32 %v1100_v12, %v1099_v9  ;;  %v1182_v17 = vpop.f32.mrb[39].mxu1 }
 0x143   :  { %v1183_v18 = vadd.f32 %v1182_v17, %v1181_v11 }
 0x144   :  { %898 = vst.msk [vmem:[%s1640_s3 + $0x44] sm:$0xf] %vm880_vm0, %v1022_v13  ;;  %v761_v19 = vadd.f32 %v1180_v10, %v641_v14  ;;  %v644_v20 = vadd.f32 %v1101_v15, %v1531_v16 }
 0x146   :  { %v792_v21 = vmax.f32 %v761_v19, 0.0  ;;  %v764_v22 = vadd.f32 %v1183_v18, %v644_v20  ;;  %v1102_v23 = vpop.f32.mrb[40].mxu0 }
 0x147   :  { %v1184_v24 = vpop.f32.mrb[40].mxu1  ;;  %v1103_v25 = vpop.f32.mrb[41].mxu0 }
 0x148   :  { %v1023_v26 = vpack.c.bf16 %v792_v21, %v792_v21  ;;  %v793_v27 = vmax.f32 %v764_v22, 0.0  ;;  %v1104_v28 = vadd.f32 %v1103_v25, %v1102_v23  ;;  %v1185_v29 = vpop.f32.mrb[41].mxu1  ;;  %v1105_v30 = vpop.f32.mrb[42].mxu0 }
 0x149   :  { %v1186_v31 = vadd.f32 %v1185_v29, %v1184_v24  ;;  %v1187_v32 = vpop.f32.mrb[42].mxu1  ;;  %v1106_v33 = vpop.f32.mrb[43].mxu0 }
 0x14a   :  { %899 = vst.msk [vmem:[%s1640_s3 + $0x48] sm:$0xf] %vm880_vm0, %v1023_v26  ;;  %v1024_v34 = vpack.c.bf16 %v793_v27, %v793_v27  ;;  %v649_v35 = vadd.f32 %v1104_v28, %v1531_v16  ;;  %v1188_v36 = vpop.f32.mrb[43].mxu1 }
 0x14c   :  { %900 = vst.msk [vmem:[%s1640_s3 + $0x4c] sm:$0xf] %vm880_vm0, %v1024_v34  ;;  %v769_v37 = vadd.f32 %v1186_v31, %v649_v35 }
 0x14e   :  { %v794_v38 = vmax.f32 %v769_v37, 0.0 }
 0x150   :  { %v1025_v39 = vpack.c.bf16 %v794_v38, %v794_v38 }
 0x152   :  { %902 = vst.msk [vmem:[%s1640_s3 + $0x50] sm:$0x1] %vm901_vm1, %v1025_v39 }

// kernel: dqn_forward.5
= control target key start
LH: loop header
LB: loop body
LE: loop exit
PB: predicated region body
PF: predicated region fallthrough
CT: control target
= control target key end

     0   :  { %vm570_vm0 = vcmask 523264   ;;  %s6760_s1 = inlined_call_operand.vmem [shape: bf16[576,64], index: 1, kind: input, shape index: {}]   ;;  %s6761_s0 = inlined_call_operand.vmem [shape: bf16[128,576], index: 0, kind: input, shape index: {}]   ;;  %s6762_s3 = inlined_call_operand.vmem [shape: bf16[1024,512], index: 3, kind: input, shape index: {}]   ;;  %s6763_s2 = inlined_call_operand.vmem [shape: f32[1,64], index: 2, kind: input, shape index: {}]   ;;  %s6764_s5 = inlined_call_operand.vmem [shape: bf16[512,128], index: 5, kind: input, shape index: {}]   ;;  %s6765_s4 = inlined_call_operand.vmem [shape: f32[1,512], index: 4, kind: input, shape index: {}]   ;;  %s6766_s6 = inlined_call_operand.vmem [shape: f32[1,128], index: 6, kind: input, shape index: {}]   ;;  %s6767_s7 = inlined_call_operand.vmem [shape: f32[8,128], index: 7, kind: output, shape index: {}]  }
   0x1   :  { %v4867_v0 = vld [vmem:[%s6760_s1 + $0x40] sm:$0xff]   ;;  %v4871_v4 = vld [vmem:[%s6760_s1 + $0x48] sm:$0xff]   ;;  %v4875_v8 = vld [vmem:[%s6760_s1 + $0x50] sm:$0xff]  }
   0x2   :  { %v4868_v1 = vld [vmem:[%s6760_s1] sm:$0xff]   ;;  %4658 = vmatprep.subr.bf16.mxu0 %v4867_v0  ;;  %v4872_v5 = vld [vmem:[%s6760_s1 + $0x8] sm:$0xff]   ;;  %v4876_v9 = vld [vmem:[%s6760_s1 + $0x10] sm:$0xff]  }
   0x3   :  { %v4869_v2 = vld [vmem:[%s6760_s1 + $0xc0] sm:$0xff]   ;;  %4659 = vmatpush3.bf16.msra.mxu0 %v4868_v1  ;;  %v4873_v6 = vld [vmem:[%s6760_s1 + $0xc8] sm:$0xff]   ;;  %v4877_v10 = vld [vmem:[%s6760_s1 + $0xd0] sm:$0xff]  }
   0x4   :  { %v4870_v3 = vld [vmem:[%s6760_s1 + $0x80] sm:$0xff]   ;;  %4722 = vmatprep.subr.bf16.mxu1 %v4869_v2  ;;  %4660 = vmatprep.subr.bf16.mxu0 %v4871_v4  ;;  %v4874_v7 = vld [vmem:[%s6760_s1 + $0x88] sm:$0xff]   ;;  %v4878_v11 = vld [vmem:[%s6760_s1 + $0x90] sm:$0xff]  }
   0x5   :  { %4723 = vmatpush3.bf16.msra.mxu1 %v4870_v3  ;;  %v4879_v12 = vld [vmem:[%s6760_s1 + $0x58] sm:$0xff]   ;;  %v4883_v16 = vld [vmem:[%s6760_s1 + $0x60] sm:$0xff]   ;;  %v4887_v20 = vld [vmem:[%s6760_s1 + $0x68] sm:$0xff]  }
   0x6   :  { %4724 = vmatprep.subr.bf16.mxu1 %v4873_v6  ;;  %v4880_v13 = vld [vmem:[%s6760_s1 + $0x18] sm:$0xff]   ;;  %v4884_v17 = vld [vmem:[%s6760_s1 + $0x20] sm:$0xff]   ;;  %v4888_v21 = vld [vmem:[%s6760_s1 + $0x28] sm:$0xff]  }
   0x7   :  { %4661 = vmatpush3.bf16.msra.mxu0 %v4872_v5  ;;  %v4881_v14 = vld [vmem:[%s6760_s1 + $0xd8] sm:$0xff]   ;;  %v4885_v18 = vld [vmem:[%s6760_s1 + $0xe0] sm:$0xff]   ;;  %v4889_v22 = vld [vmem:[%s6760_s1 + $0xe8] sm:$0xff]  }
   0x8   :  { %4662 = vmatprep.subr.bf16.mxu0 %v4875_v8  ;;  %v4882_v15 = vld [vmem:[%s6760_s1 + $0x98] sm:$0xff]   ;;  %v4886_v19 = vld [vmem:[%s6760_s1 + $0xa0] sm:$0xff]   ;;  %v4890_v23 = vld [vmem:[%s6760_s1 + $0xa8] sm:$0xff]  }
   0x9   :  { %4725 = vmatpush3.bf16.msra.mxu1 %v4874_v7  ;;  %v4891_v24 = vld [vmem:[%s6760_s1 + $0x70] sm:$0xff]   ;;  %v4895_v28 = vld [vmem:[%s6760_s1 + $0x78] sm:$0xff]   ;;  %v4902_v34 = vld [vmem:[%s6760_s1 + $0x100] sm:$0xff]  }
   0xa   :  { %4726 = vmatprep.subr.bf16.mxu1 %v4877_v10  ;;  %v4892_v25 = vld [vmem:[%s6760_s1 + $0x30] sm:$0xff]   ;;  %v4896_v29 = vld [vmem:[%s6760_s1 + $0x38] sm:$0xff]   ;;  %v4905_v36 = vld [vmem:[%s6761_s0 + $0xc] ss:$20 sps:$4 sm:$0xff]  }
   0xb   :  { %4663 = vmatpush3.bf16.msra.mxu0 %v4876_v9  ;;  %v4893_v26 = vld [vmem:[%s6760_s1 + $0xf0] sm:$0xff]   ;;  %v4897_v30 = vld [vmem:[%s6760_s1 + $0xf8] sm:$0xff]   ;;  %v4906_v37 = vld [vmem:[%s6761_s0 + $0x2c] ss:$20 sps:$4 sm:$0xff]   ;;  %724 = vmatprep.mubr.bf16.mxu1 %v4905_v36 }
   0xc   :  { %4664 = vmatprep.subr.bf16.mxu0 %v4879_v12  ;;  %v4894_v27 = vld [vmem:[%s6760_s1 + $0xb0] sm:$0xff]   ;;  %v4900_v32 = vld [vmem:[%s6761_s0 + $0x4] ss:$20 sps:$4 sm:$0xff]   ;;  %v4903_v35 = vld [vmem:[%s6761_s0 + $0x8] ss:$20 sps:$4 sm:$0xff]  }
   0xd   :  { %4727 = vmatpush3.bf16.msra.mxu1 %v4878_v11  ;;  %v4898_v31 = vld [vmem:[%s6761_s0] ss:$20 sps:$4 sm:$0xff]   ;;  %v4901_v33 = vld [vmem:[%s6760_s1 + $0xb8] sm:$0xff]   ;;  %627 = vmatprep.mubr.bf16.mxu0 %v4900_v32  ;;  %v4915_v41 = vld [vmem:[%s6760_s1 + $0x108] sm:$0xff]  }
   0xe   :  { %4728 = vmatprep.subr.bf16.mxu1 %v4881_v14  ;;  %v4909_v38 = vld [vmem:[%s6761_s0 + $0x34] ss:$20 sps:$4 sm:$0xff]   ;;  %v4911_v42 = vld [vmem:[%s6761_s0 + $0x30] ss:$20 sps:$4 sm:$0xff]   ;;  %v4918_v47 = vld [vmem:[%s6761_s0 + $0x58] ss:$20 sps:$4 sm:$0xff]  }
   0xf   :  { %4665 = vmatpush3.bf16.msra.mxu0 %v4880_v13  ;;  %v4908_v39 = vld [vmem:[%s6761_s0 + $0x28] ss:$20 sps:$4 sm:$0xff]   ;;  %v4928_v44 = vld [vmem:[%s6760_s1 + $0x110] sm:$0xff]   ;;  %v4922_v48 = vld [vmem:[%s6761_s0 + $0x84] ss:$20 sps:$4 sm:$0xff]  }
  0x10   :  { %4666 = vmatprep.subr.bf16.mxu0 %v4883_v16  ;;  %v4912_v40 = vld [vmem:[%s6761_s0 + $0x54] ss:$20 sps:$4 sm:$0xff]   ;;  %v4916_v43 = vld [vmem:[%s6761_s0 + $0x5c] ss:$20 sps:$4 sm:$0xff]   ;;  %v4921_v50 = vld [vmem:[%s6761_s0 + $0x78] ss:$20 sps:$4 sm:$0xff]  }
  0x11   :  { %4729 = vmatpush3.bf16.msra.mxu1 %v4882_v15  ;;  %v4914_v45 = vld [vmem:[%s6761_s0 + $0x50] ss:$20 sps:$4 sm:$0xff]   ;;  %v4941_v49 = vld [vmem:[%s6760_s1 + $0x118] sm:$0xff]   ;;  %v4924_v52 = vld [vmem:[%s6761_s0 + $0x80] ss:$20 sps:$4 sm:$0xff]  }
  0x12   :  { %4730 = vmatprep.subr.bf16.mxu1 %v4885_v18  ;;  %v4919_v46 = vld [vmem:[%s6761_s0 + $0x7c] ss:$20 sps:$4 sm:$0xff]   ;;  %v4925_v51 = vld [vmem:[%s6761_s0 + $0xa4] ss:$20 sps:$4 sm:$0xff]   ;;  %v4929_v53 = vld [vmem:[%s6761_s0 + $0xac] ss:$20 sps:$4 sm:$0xff]  }
  0x13   :  { %4667 = vmatpush3.bf16.msra.mxu0 %v4884_v17  ;;  %v4927_v54 = vld [vmem:[%s6761_s0 + $0xa0] ss:$20 sps:$4 sm:$0xff]   ;;  %v4931_v56 = vld [vmem:[%s6761_s0 + $0xa8] ss:$20 sps:$4 sm:$0xff]   ;;  %v4937_v60 = vld [vmem:[%s6761_s0 + $0xd0] ss:$20 sps:$4 sm:$0xff]  }
  0x14   :  { %4668 = vmatprep.subr.bf16.mxu0 %v4887_v20  ;;  %v4932_v55 = vld [vmem:[%s6761_s0 + $0xcc] ss:$20 sps:$4 sm:$0xff]   ;;  %v4935_v57 = vld [vmem:[%s6761_s0 + $0xd4] ss:$20 sps:$4 sm:$0xff]   ;;  %v4942_v61 = vld [vmem:[%s6761_s0 + $0xfc] ss:$20 sps:$4 sm:$0xff]  }
  0x15   :  { %4731 = vmatpush3.bf16.msra.mxu1 %v4886_v19  ;;  %v4934_v58 = vld [vmem:[%s6761_s0 + $0xc8] ss:$20 sps:$4 sm:$0xff]   ;;  %v4940_v62 = vld [vmem:[%s6761_s0 + $0xf0] ss:$20 sps:$4 sm:$0xff]   ;;  %v4944_v0 = vld [vmem:[%s6761_s0 + $0xf8] ss:$20 sps:$4 sm:$0xff]  }
  0x16   :  { %4732 = vmatprep.subr.bf16.mxu1 %v4889_v22  ;;  %v4938_v59 = vld [vmem:[%s6761_s0 + $0xf4] ss:$20 sps:$4 sm:$0xff]   ;;  %v4945_v63 = vld [vmem:[%s6761_s0 + $0x11c] ss:$20 sps:$4 sm:$0xff]   ;;  %v4948_v1 = vld [vmem:[%s6761_s0 + $0x124] ss:$20 sps:$4 sm:$0xff]  }
  0x17   :  { %4669 = vmatpush3.bf16.msra.mxu0 %v4888_v21  ;;  %v4947_v2 = vld [vmem:[%s6761_s0 + $0x118] ss:$20 sps:$4 sm:$0xff]   ;;  %v4951_v3 = vld [vmem:[%s6761_s0 + $0x10] ss:$20 sps:$4 sm:$0xff]   ;;  %v4950_v4 = vld [vmem:[%s6761_s0 + $0x120] ss:$20 sps:$4 sm:$0xff]  }
  0x18   :  { %4670 = vmatprep.subr.bf16.mxu0 %v4891_v24  ;;  %v4952_v5 = vld [vmem:[%s6761_s0 + $0x38] ss:$20 sps:$4 sm:$0xff]   ;;  %v4953_v6 = vld [vmem:[%s6761_s0 + $0x60] ss:$20 sps:$4 sm:$0xff]   ;;  %v4954_v7 = vld [vmem:[%s6761_s0 + $0x88] ss:$20 sps:$4 sm:$0xff]  }
  0x19   :  { %4733 = vmatpush3.bf16.msra.mxu1 %v4890_v23  ;;  %v4955_v8 = vld [vmem:[%s6761_s0 + $0xb0] ss:$20 sps:$4 sm:$0xff]   ;;  %v4956_v9 = vld [vmem:[%s6761_s0 + $0xd8] ss:$20 sps:$4 sm:$0xff]   ;;  %v4957_v10 = vld [vmem:[%s6761_s0 + $0x100] ss:$20 sps:$4 sm:$0xff]  }
  0x1a   :  { %4734 = vmatprep.subr.bf16.mxu1 %v4893_v26  ;;  %v4958_v11 = vld [vmem:[%s6761_s0 + $0x128] ss:$20 sps:$4 sm:$0xff]   ;;  %v4959_v12 = vld [vmem:[%s6762_s3 + $0x80] ss:$16 sps:$4 sm:$0xff]   ;;  %v4961_v13 = vld [vmem:[%s6762_s3 + $0x84] ss:$16 sps:$4 sm:$0xff]  }
  0x1b   :  { %4671 = vmatpush3.bf16.msra.mxu0 %v4892_v25  ;;  %v4962_v14 = vld [vmem:[%s6762_s3 + $0xa0] ss:$16 sps:$4 sm:$0xff]   ;;  %v4964_v15 = vld [vmem:[%s6762_s3 + $0xa4] ss:$16 sps:$4 sm:$0xff]  }
  0x1c   :  { %4672 = vmatprep.subr.bf16.mxu0 %v4895_v28  ;;  %v4965_v16 = vld [vmem:[%s6762_s3 + $0xc0] ss:$16 sps:$4 sm:$0xff]   ;;  %v4967_v17 = vld [vmem:[%s6762_s3 + $0xc4] ss:$16 sps:$4 sm:$0xff]  }
  0x1d   :  { %4735 = vmatpush3.bf16.msra.mxu1 %v4894_v27  ;;  %v4970_v18 = vld [vmem:[%s6762_s3 + $0x4] ss:$16 sps:$4 sm:$0xff]   ;;  %v4968_v19 = vld [vmem:[%s6762_s3] ss:$16 sps:$4 sm:$0xff]  }
  0x1e   :  { %4736 = vmatprep.subr.bf16.mxu1 %v4897_v30  ;;  %v4976_v20 = vld [vmem:[%s6762_s3 + $0x24] ss:$16 sps:$4 sm:$0xff]   ;;  %v4974_v21 = vld [vmem:[%s6762_s3 + $0x20] ss:$16 sps:$4 sm:$0xff]   ;;  %v4988_v30 = vld [vmem:[%s6762_s3 + $0x8c] ss:$16 sps:$4 sm:$0xff]  }
  0x1f   :  { %4673 = vmatpush3.bf16.msra.mxu0 %v4896_v29  ;;  %v4971_v22 = vld [vmem:[%s6762_s3 + $0xe0] ss:$16 sps:$4 sm:$0xff]   ;;  %v4973_v23 = vld [vmem:[%s6762_s3 + $0xe4] ss:$16 sps:$4 sm:$0xff]   ;;  %v5375_v29 = vmov 0  }
  0x20   :  { %4842 = vmatprep.subr.bf16.mxu0 %v4902_v34  ;;  %v4979_v24 = vld [vmem:[%s6762_s3 + $0x44] ss:$16 sps:$4 sm:$0xff]   ;;  %v4977_v25 = vld [vmem:[%s6762_s3 + $0x40] ss:$16 sps:$4 sm:$0xff]  }
  0x21   :  { %4737 = vmatpush3.bf16.msra.mxu1 %v4901_v33  ;;  %v4982_v26 = vld [vmem:[%s6762_s3 + $0x64] ss:$16 sps:$4 sm:$0xff]   ;;  %v4980_v27 = vld [vmem:[%s6762_s3 + $0x60] ss:$16 sps:$4 sm:$0xff]  }
  0x22   :  { %628 = vmatmul.mubr.bf16.vlgmr.msra.gmra.mrb[0].mxu0 %v4898_v31  ;;  %1019 = vmatprep.subr.bf16.mxu1 %v4961_v13  ;;  %v4985_v28 = vld [vmem:[%s6762_s3 + $0x104] ss:$16 sps:$4 sm:$0xff]   ;;  %v5711_v32 = vld [vmem:[%s6763_s2] ss:$0 sm:$0xff] }
  0x23   :  { %4843 = vmatpush3.bf16.msra.mxu0 %v4902_v34  ;;  %635 = vmatprep.mubr.bf16.mxu0 %v4906_v37 }
  0x24   :  { %725 = vmatmul.mubr.bf16.vlgmr.msra.gmra.mrb[0].mxu1 %v4903_v35  ;;  %4844 = vmatprep.subr.bf16.mxu0 %v4915_v41 }
  0x25   :  { %732 = vmatprep.mubr.bf16.mxu1 %v4909_v38  ;;  %1020 = vmatpush1.bf16.msra.mxu1 %v4959_v12 }
  0x26   :  { %1021 = vmatprep.subr.bf16.mxu1 %v4964_v15 }
  0x27   :  { %4845 = vmatpush3.bf16.msra.mxu0 %v4915_v41 }
  0x28   :  { %4846 = vmatprep.subr.bf16.mxu0 %v4928_v44 }
  0x29   :  { %1022 = vmatpush1.bf16.msra.mxu1 %v4962_v14 }
  0x2a   :  { %636 = vmatmul.mubr.bf16.gmra.mrb[4].mxu0 %v4908_v39  ;;  %1023 = vmatprep.subr.bf16.mxu1 %v4967_v17 }
  0x2b   :  { %643 = vmatprep.mubr.bf16.mxu0 %v4912_v40  ;;  %4847 = vmatpush3.bf16.msra.mxu0 %v4928_v44 }
  0x2c   :  { %733 = vmatmul.mubr.bf16.gmra.mrb[4].mxu1 %v4911_v42  ;;  %4848 = vmatprep.subr.bf16.mxu0 %v4941_v49 }
  0x2d   :  { %740 = vmatprep.mubr.bf16.mxu1 %v4916_v43  ;;  %1024 = vmatpush1.bf16.msra.mxu1 %v4965_v16 }
  0x2e   :  { %1025 = vmatprep.subr.bf16.mxu1 %v4973_v23 }
  0x2f   :  { %4849 = vmatpush3.bf16.msra.mxu0 %v4941_v49 }
  0x30   :  { %1184 = vmatprep.subr.bf16.mxu0 %v4970_v18 }
  0x31   :  { %1026 = vmatpush1.bf16.msra.mxu1 %v4971_v22 }
  0x32   :  { %644 = vmatmul.mubr.bf16.gmra.mrb[8].mxu0 %v4914_v45  ;;  %1060 = vmatprep.subr.bf16.mxu1 %v4988_v30 }
  0x33   :  { %651 = vmatprep.mubr.bf16.mxu0 %v4919_v46 }
  0x34   :  { %741 = vmatmul.mubr.bf16.gmra.mrb[8].mxu1 %v4918_v47 }
  0x35   :  { %748 = vmatprep.mubr.bf16.mxu1 %v4922_v48 }
  0x3a   :  { %652 = vmatmul.mubr.bf16.gmra.mrb[12].mxu0 %v4921_v50 }
  0x3b   :  { %659 = vmatprep.mubr.bf16.mxu0 %v4925_v51 }
  0x3c   :  { %749 = vmatmul.mubr.bf16.gmra.mrb[12].mxu1 %v4924_v52 }
  0x3d   :  { %756 = vmatprep.mubr.bf16.mxu1 %v4929_v53 }
  0x42   :  { %660 = vmatmul.mubr.bf16.gmra.mrb[16].mxu0 %v4927_v54 }
  0x43   :  { %667 = vmatprep.mubr.bf16.mxu0 %v4932_v55 }
  0x44   :  { %757 = vmatmul.mubr.bf16.gmra.mrb[16].mxu1 %v4931_v56 }
  0x45   :  { %764 = vmatprep.mubr.bf16.mxu1 %v4935_v57 }
  0x4a   :  { %668 = vmatmul.mubr.bf16.gmra.mrb[20].mxu0 %v4934_v58 }
  0x4b   :  { %675 = vmatprep.mubr.bf16.mxu0 %v4938_v59 }
  0x4c   :  { %765 = vmatmul.mubr.bf16.gmra.mrb[20].mxu1 %v4937_v60 }
  0x4d   :  { %772 = vmatprep.mubr.bf16.mxu1 %v4942_v61 }
  0x52   :  { %676 = vmatmul.mubr.bf16.gmra.mrb[24].mxu0 %v4940_v62 }
  0x53   :  { %683 = vmatprep.mubr.bf16.mxu0 %v4945_v63 }
  0x54   :  { %773 = vmatmul.mubr.bf16.gmra.mrb[24].mxu1 %v4944_v0 }
  0x55   :  { %780 = vmatprep.mubr.bf16.mxu1 %v4948_v1 }
  0x5a   :  { %684 = vmatmul.mubr.bf16.gmra.mrb[28].mxu0 %v4947_v2 }
  0x5b   :  { %4850 = vmatprep.mubr.msk.bf16.mxu0 %vm570_vm0, %v4951_v3 }
  0x5c   :  { %781 = vmatmul.mubr.bf16.gmra.mrb[28].mxu1 %v4950_v4 }
  0x5d   :  { %1051 = vmatprep.mubr.bf16.mxu1 %v5375_v29 }
  0x62   :  { %4851 = vmatmul.mubr.msk.bf16.vlgmr.msra.gmra.mrb[32].mxu0 %vm570_vm0, %v4952_v5 }
  0x63   :  { %4854 = vmatprep.mubr.msk.bf16.mxu0 %vm570_vm0, %v4953_v6  ;;  %1185 = vmatpush1.bf16.msra.mxu0 %v4968_v19 }
  0x64   :  { %1186 = vmatprep.subr.bf16.mxu0 %v4976_v20 }
  0x67   :  { %1187 = vmatpush1.bf16.msra.mxu0 %v4974_v21 }
  0x68   :  { %1188 = vmatprep.subr.bf16.mxu0 %v4979_v24 }
  0x6a   :  { %4855 = vmatmul.mubr.msk.bf16.gmra.mrb[36].mxu0 %vm570_vm0, %v4954_v7 }
  0x6b   :  { %4858 = vmatprep.mubr.msk.bf16.mxu0 %vm570_vm0, %v4955_v8  ;;  %1189 = vmatpush1.bf16.msra.mxu0 %v4977_v25 }
  0x6c   :  { %1190 = vmatprep.subr.bf16.mxu0 %v4982_v26 }
  0x6f   :  { %1191 = vmatpush1.bf16.msra.mxu0 %v4980_v27 }
  0x70   :  { %1366 = vmatprep.subr.bf16.mxu0 %v4985_v28 }
  0x72   :  { %4859 = vmatmul.mubr.msk.bf16.gmra.mrb[40].mxu0 %vm570_vm0, %v4956_v9 }
  0x73   :  { %4862 = vmatprep.mubr.msk.bf16.mxu0 %vm570_vm0, %v4957_v10 }
  0x7a   :  { %4863 = vmatmul.mubr.msk.bf16.gmra.mrb[44].mxu0 %vm570_vm0, %v4958_v11 }
  0x7b   :  { %1216 = vmatprep.mubr.bf16.mxu0 %v5375_v29 }
  0xf5   :  { %v4674_v31 = vpop.f32.mrb[0].mxu0 }
  0xf6   :  { %v4675_v33 = vpop.f32.mrb[1].mxu0 }
  0xf7   :  { %v4676_v34 = vadd.f32 %v4675_v33, %v4674_v31  ;;  %v4677_v35 = vpop.f32.mrb[2].mxu0  ;;  %v4738_v36 = vpop.f32.mrb[0].mxu1 }
  0xf8   :  { %v4678_v37 = vpop.f32.mrb[3].mxu0  ;;  %v4739_v40 = vpop.f32.mrb[1].mxu1 }
  0xf9   :  { %v630_v38 = vadd.f32 %v4676_v34, %v5711_v32  ;;  %v4679_v39 = vadd.f32 %v4678_v37, %v4677_v35  ;;  %v4740_v41 = vadd.f32 %v4739_v40, %v4738_v36  ;;  %v4741_v42 = vpop.f32.mrb[2].mxu1 }
  0xfa   :  { %v4742_v44 = vpop.f32.mrb[3].mxu1 }
  0xfb   :  { %v633_v43 = vadd.f32 %v4679_v39, %v5711_v32  ;;  %v4743_v45 = vadd.f32 %v4742_v44, %v4741_v42  ;;  %v5715_v46 = vadd.f32 %v4740_v41, %v630_v38 }
  0xfd   :  { %v4680_v47 = vpop.f32.mrb[4].mxu0  ;;  %v5717_v49 = vadd.f32 %v4743_v45, %v633_v43 }
  0xfe   :  { %v4681_v48 = vpop.f32.mrb[5].mxu0 }
  0xff   :  { %v4682_v50 = vadd.f32 %v4681_v48, %v4680_v47  ;;  %v4683_v51 = vpop.f32.mrb[6].mxu0  ;;  %v4744_v52 = vpop.f32.mrb[4].mxu1 }
 0x100   :  { %v4684_v53 = vpop.f32.mrb[7].mxu0  ;;  %v4745_v56 = vpop.f32.mrb[5].mxu1 }
 0x101   :  { %v638_v54 = vadd.f32 %v4682_v50, %v5711_v32  ;;  %v4685_v55 = vadd.f32 %v4684_v53, %v4683_v51  ;;  %v4746_v57 = vadd.f32 %v4745_v56, %v4744_v52  ;;  %v4747_v58 = vpop.f32.mrb[6].mxu1 }
 0x102   :  { %v4748_v60 = vpop.f32.mrb[7].mxu1 }
 0x103   :  { %v641_v59 = vadd.f32 %v4685_v55, %v5711_v32  ;;  %v4749_v61 = vadd.f32 %v4748_v60, %v4747_v58  ;;  %v5721_v62 = vadd.f32 %v4746_v57, %v638_v54 }
 0x105   :  { %v4686_v63 = vpop.f32.mrb[8].mxu0  ;;  %v5723_v1 = vadd.f32 %v4749_v61, %v641_v59 }
 0x106   :  { %v4687_v0 = vpop.f32.mrb[9].mxu0 }
 0x107   :  { %v4688_v2 = vadd.f32 %v4687_v0, %v4686_v63  ;;  %v4689_v3 = vpop.f32.mrb[10].mxu0  ;;  %v4750_v4 = vpop.f32.mrb[8].mxu1 }
 0x108   :  { %v4690_v5 = vpop.f32.mrb[11].mxu0  ;;  %v4751_v8 = vpop.f32.mrb[9].mxu1 }
 0x109   :  { %v646_v6 = vadd.f32 %v4688_v2, %v5711_v32  ;;  %v4691_v7 = vadd.f32 %v4690_v5, %v4689_v3  ;;  %v4752_v9 = vadd.f32 %v4751_v8, %v4750_v4  ;;  %v4753_v10 = vpop.f32.mrb[10].mxu1 }
 0x10a   :  { %v4754_v12 = vpop.f32.mrb[11].mxu1 }
 0x10b   :  { %v649_v11 = vadd.f32 %v4691_v7, %v5711_v32  ;;  %v4755_v13 = vadd.f32 %v4754_v12, %v4753_v10  ;;  %v5727_v14 = vadd.f32 %v4752_v9, %v646_v6 }
 0x10d   :  { %v4692_v15 = vpop.f32.mrb[12].mxu0  ;;  %v5729_v17 = vadd.f32 %v4755_v13, %v649_v11 }
 0x10e   :  { %v4693_v16 = vpop.f32.mrb[13].mxu0 }
 0x10f   :  { %v4694_v18 = vadd.f32 %v4693_v16, %v4692_v15  ;;  %v4695_v19 = vpop.f32.mrb[14].mxu0  ;;  %v4756_v20 = vpop.f32.mrb[12].mxu1 }
 0x110   :  { %v4696_v21 = vpop.f32.mrb[15].mxu0  ;;  %v4757_v24 = vpop.f32.mrb[13].mxu1 }
 0x111   :  { %v654_v22 = vadd.f32 %v4694_v18, %v5711_v32  ;;  %v4697_v23 = vadd.f32 %v4696_v21, %v4695_v19  ;;  %v4758_v25 = vadd.f32 %v4757_v24, %v4756_v20  ;;  %v4759_v26 = vpop.f32.mrb[14].mxu1 }
 0x112   :  { %v4760_v28 = vpop.f32.mrb[15].mxu1 }
 0x113   :  { %v657_v27 = vadd.f32 %v4697_v23, %v5711_v32  ;;  %v4761_v30 = vadd.f32 %v4760_v28, %v4759_v26  ;;  %v5733_v31 = vadd.f32 %v4758_v25, %v654_v22 }
 0x115   :  { %v4698_v33 = vpop.f32.mrb[16].mxu0  ;;  %v5735_v35 = vadd.f32 %v4761_v30, %v657_v27 }
 0x116   :  { %v4699_v34 = vpop.f32.mrb[17].mxu0 }
 0x117   :  { %v4700_v36 = vadd.f32 %v4699_v34, %v4698_v33  ;;  %v4701_v37 = vpop.f32.mrb[18].mxu0  ;;  %v4762_v38 = vpop.f32.mrb[16].mxu1 }
 0x118   :  { %v4702_v39 = vpop.f32.mrb[19].mxu0  ;;  %v4763_v42 = vpop.f32.mrb[17].mxu1 }
 0x119   :  { %v662_v40 = vadd.f32 %v4700_v36, %v5711_v32  ;;  %v4703_v41 = vadd.f32 %v4702_v39, %v4701_v37  ;;  %v4764_v43 = vadd.f32 %v4763_v42, %v4762_v38  ;;  %v4765_v44 = vpop.f32.mrb[18].mxu1 }
 0x11a   :  { %v4766_v47 = vpop.f32.mrb[19].mxu1 }
 0x11b   :  { %v665_v45 = vadd.f32 %v4703_v41, %v5711_v32  ;;  %v4767_v48 = vadd.f32 %v4766_v47, %v4765_v44  ;;  %v5739_v50 = vadd.f32 %v4764_v43, %v662_v40 }
 0x11d   :  { %v4704_v51 = vpop.f32.mrb[20].mxu0  ;;  %v5741_v53 = vadd.f32 %v4767_v48, %v665_v45 }
 0x11e   :  { %v4705_v52 = vpop.f32.mrb[21].mxu0 }
 0x11f   :  { %v4706_v54 = vadd.f32 %v4705_v52, %v4704_v51  ;;  %v4707_v55 = vpop.f32.mrb[22].mxu0  ;;  %v4768_v56 = vpop.f32.mrb[20].mxu1 }
 0x120   :  { %v4708_v57 = vpop.f32.mrb[23].mxu0  ;;  %v4769_v60 = vpop.f32.mrb[21].mxu1 }
 0x121   :  { %v670_v58 = vadd.f32 %v4706_v54, %v5711_v32  ;;  %v4709_v59 = vadd.f32 %v4708_v57, %v4707_v55  ;;  %v4770_v61 = vadd.f32 %v4769_v60, %v4768_v56  ;;  %v4771_v63 = vpop.f32.mrb[22].mxu1  ;;  %v4983_v56 = vld [vmem:[%s6762_s3 + $0x100] ss:$16 sps:$4 sm:$0xff]  }
 0x122   :  { %v4772_v2 = vpop.f32.mrb[23].mxu1 }
 0x123   :  { %v673_v0 = vadd.f32 %v4709_v59, %v5711_v32  ;;  %v4773_v3 = vadd.f32 %v4772_v2, %v4771_v63  ;;  %v5745_v4 = vadd.f32 %v4770_v61, %v670_v58  ;;  %v4991_v58 = vld [vmem:[%s6762_s3 + $0x124] ss:$16 sps:$4 sm:$0xff]   ;;  %v4989_v63 = vld [vmem:[%s6762_s3 + $0x120] ss:$16 sps:$4 sm:$0xff]  }
 0x125   :  { %v4710_v5 = vpop.f32.mrb[24].mxu0  ;;  %v5747_v7 = vadd.f32 %v4773_v3, %v673_v0 }
 0x126   :  { %v4711_v6 = vpop.f32.mrb[25].mxu0 }
 0x127   :  { %v4712_v8 = vadd.f32 %v4711_v6, %v4710_v5  ;;  %v4713_v9 = vpop.f32.mrb[26].mxu0  ;;  %v4774_v10 = vpop.f32.mrb[24].mxu1  ;;  %v4992_v6 = vld [vmem:[%s6762_s3 + $0xa8] ss:$16 sps:$4 sm:$0xff]  }
 0x128   :  { %v4714_v11 = vpop.f32.mrb[27].mxu0  ;;  %v4775_v15 = vpop.f32.mrb[25].mxu1 }
 0x129   :  { %v678_v12 = vadd.f32 %v4712_v8, %v5711_v32  ;;  %v4715_v13 = vadd.f32 %v4714_v11, %v4713_v9  ;;  %v4776_v16 = vadd.f32 %v4775_v15, %v4774_v10  ;;  %v4777_v18 = vpop.f32.mrb[26].mxu1  ;;  %v5000_v8 = vld [vmem:[%s6762_s3 + $0xcc] ss:$16 sps:$4 sm:$0xff]   ;;  %v5003_v9 = vld [vmem:[%s6762_s3 + $0x164] ss:$16 sps:$4 sm:$0xff]  }
 0x12a   :  { %v4778_v20 = vpop.f32.mrb[27].mxu1  ;;  %v5006_v11 = vld [vmem:[%s6762_s3 + $0xec] ss:$16 sps:$4 sm:$0xff]   ;;  %v5001_v15 = vld [vmem:[%s6762_s3 + $0x160] ss:$16 sps:$4 sm:$0xff]  }
 0x12b   :  { %v681_v19 = vadd.f32 %v4715_v13, %v5711_v32  ;;  %v4779_v21 = vadd.f32 %v4778_v20, %v4777_v18  ;;  %v5751_v22 = vadd.f32 %v4776_v16, %v678_v12  ;;  %v5009_v20 = vld [vmem:[%s6762_s3 + $0x184] ss:$16 sps:$4 sm:$0xff]  }
 0x12d   :  { %v4716_v23 = vpop.f32.mrb[28].mxu0  ;;  %v5753_v25 = vadd.f32 %v4779_v21, %v681_v19 }
 0x12e   :  { %v4717_v24 = vpop.f32.mrb[29].mxu0 }
 0x12f   :  { %v4718_v26 = vadd.f32 %v4717_v24, %v4716_v23  ;;  %v4719_v27 = vpop.f32.mrb[30].mxu0  ;;  %v4780_v28 = vpop.f32.mrb[28].mxu1  ;;  %v5004_v23 = vld [vmem:[%s6762_s3 + $0xe8] ss:$16 sps:$4 sm:$0xff]  }
 0x130   :  { %v4720_v30 = vpop.f32.mrb[31].mxu0  ;;  %v4781_v36 = vpop.f32.mrb[29].mxu1 }
 0x131   :  { %v686_v33 = vadd.f32 %v4718_v26, %v5711_v32  ;;  %v4721_v34 = vadd.f32 %v4720_v30, %v4719_v27  ;;  %v4782_v37 = vadd.f32 %v4781_v36, %v4780_v28  ;;  %v4783_v38 = vpop.f32.mrb[30].mxu1  ;;  %v5015_v27 = vld [vmem:[%s6762_s3 + $0x1a4] ss:$16 sps:$4 sm:$0xff]   ;;  %v5018_v30 = vld [vmem:[%s6762_s3 + $0x2c] ss:$16 sps:$4 sm:$0xff]  }
 0x132   :  { %v4784_v40 = vpop.f32.mrb[31].mxu1  ;;  %v5013_v36 = vld [vmem:[%s6762_s3 + $0x1a0] ss:$16 sps:$4 sm:$0xff]  }
 0x133   :  { %v689_v39 = vadd.f32 %v4721_v34, %v5711_v32  ;;  %v4785_v41 = vadd.f32 %v4784_v40, %v4783_v38  ;;  %v5757_v42 = vadd.f32 %v4782_v37, %v686_v33 }
 0x135   :  { %v4852_v43 = vpop.f32.mrb[32].mxu0  ;;  %v5762_v47 = vadd.f32 %v4785_v41, %v689_v39  ;;  %v5021_v39 = vld [vmem:[%s6762_s3 + $0x1c4] ss:$16 sps:$4 sm:$0xff]  }
 0x136   :  { %v5760_v44 = vadd.f32 %v4852_v43, %v5721_v62  ;;  %v823_v45 = vpop.f32.mrb[33].mxu0  ;;  %v5024_v43 = vld [vmem:[%s6762_s3 + $0x4c] ss:$16 sps:$4 sm:$0xff]  }
 0x137   :  { %v824_v48 = vadd.f32 %v823_v45, %v5715_v46  ;;  %v4853_v51 = vpop.f32.mrb[34].mxu0  ;;  %v4986_v46 = vld [vmem:[%s6762_s3 + $0x88] ss:$16 sps:$4 sm:$0xff]   ;;  %v5027_v45 = vld [vmem:[%s6762_s3 + $0x1e4] ss:$16 sps:$4 sm:$0xff]  }
 0x138   :  { %v5766_v52 = vadd.f32 %v4853_v51, %v5723_v1  ;;  %v826_v54 = vpop.f32.mrb[35].mxu0  ;;  %v888_v16 = vmax.f32 %v5760_v44, 0.0  ;;  %v5019_v44 = vld [vmem:[%s6762_s3 + $0x1c0] ss:$16 sps:$4 sm:$0xff]  }
 0x139   :  { %v886_v55 = vmax.f32 %v824_v48, 0.0  ;;  %v827_v32 = vadd.f32 %v826_v54, %v5717_v49  ;;  %v4994_v49 = vld [vmem:[%s6762_s3 + $0xac] ss:$16 sps:$4 sm:$0xff]   ;;  %v5025_v48 = vld [vmem:[%s6762_s3 + $0x1e0] ss:$16 sps:$4 sm:$0xff]  }
 0x13a   :  { %v5855_v26 = vpack.c.bf16 %v888_v16, %v888_v16  ;;  %v889_v51 = vmax.f32 %v5766_v52, 0.0  ;;  %v5033_v54 = vld [vmem:[%s6762_s3 + $0x204] ss:$16 sps:$4 sm:$0xff]   ;;  %v5031_v52 = vld [vmem:[%s6762_s3 + $0x200] ss:$16 sps:$4 sm:$0xff]  }
 0x13b   :  { %v5772_v57 = vpack.c.bf16 %v886_v55, %v886_v55  ;;  %v887_v62 = vmax.f32 %v827_v32, 0.0  ;;  %v5028_v55 = vld [vmem:[%s6762_s3 + $0x68] ss:$16 sps:$4 sm:$0xff]   ;;  %v5036_v32 = vld [vmem:[%s6762_s3 + $0x10c] ss:$16 sps:$4 sm:$0xff]  }
 0x13c   :  { %v5069_v16 = vld [vmem:[%s6762_s3 + $0x2c4] ss:$16 sps:$4 sm:$0xff]  }
 0x13d   :  { %v5780_v1 = vpack.c.bf16 %v887_v62, %v887_v62  ;;  %v4856_v59 = vpop.f32.mrb[36].mxu0  ;;  %4371 = vmatmul.mubr.msk.bf16.vlgmr.msra.gmra.mrb[48].mxu0 %vm570_vm0, %v5772_v57  ;;  %v5039_v62 = vld [vmem:[%s6762_s3 + $0x224] ss:$16 sps:$4 sm:$0xff]  }
 0x13e   :  { %v5788_v60 = vadd.f32 %v4856_v59, %v5733_v31  ;;  %1367 = vmatpush1.bf16.msra.mxu0 %v4983_v56  ;;  %v839_v61 = vpop.f32.mrb[37].mxu0  ;;  %1398 = vmatprep.mubr.bf16.mxu0 %v5375_v29  ;;  %v4997_v31 = vld [vmem:[%s6762_s3 + $0x144] ss:$16 sps:$4 sm:$0xff]   ;;  %v5924_v56 = vpack.c.bf16 %v889_v51, %v889_v51  ;;  %v5097_v51 = vld [vmem:[%s6762_s3 + $0x360] ss:$16 sps:$4 sm:$0xff]  }
 0x13f   :  { %v5795_v0 = vadd.f32 %v839_v61, %v5727_v14  ;;  %v4857_v2 = vpop.f32.mrb[38].mxu0  ;;  %4353 = vmatmul.mubr.msk.bf16.vlgmr.msra.gmra.mrb[32].mxu1 %vm570_vm0, %v5780_v1  ;;  %1368 = vmatprep.subr.bf16.mxu0 %v4991_v58  ;;  %v5034_v58 = vld [vmem:[%s6762_s3 + $0x108] ss:$16 sps:$4 sm:$0xff]   ;;  %v5045_v59 = vld [vmem:[%s6762_s3 + $0x244] ss:$16 sps:$4 sm:$0xff]  }
 0x140   :  { %v5803_v3 = vadd.f32 %v4857_v2, %v5735_v35  ;;  %1061 = vmatpush1.bf16.msra.mxu1 %v4986_v46  ;;  %v842_v5 = vpop.f32.mrb[39].mxu0  ;;  %1092 = vmatprep.mubr.bf16.mxu1 %v5375_v29  ;;  %v4995_v35 = vld [vmem:[%s6762_s3 + $0x140] ss:$16 sps:$4 sm:$0xff]   ;;  %v5042_v46 = vld [vmem:[%s6762_s3 + $0x12c] ss:$16 sps:$4 sm:$0xff]  }
 0x141   :  { %v5810_v14 = vadd.f32 %v842_v5, %v5729_v17  ;;  %1062 = vmatprep.subr.bf16.mxu1 %v4994_v49  ;;  %v4998_v17 = vld [vmem:[%s6762_s3 + $0xc8] ss:$16 sps:$4 sm:$0xff]   ;;  %v5048_v61 = vld [vmem:[%s6762_s3 + $0x14c] ss:$16 sps:$4 sm:$0xff]   ;;  %v5049_v5 = vld [vmem:[%s6762_s3 + $0x260] ss:$16 sps:$4 sm:$0xff]  }
 0x142   :  { %1369 = vmatpush1.bf16.msra.mxu0 %v4989_v63  ;;  %v5040_v49 = vld [vmem:[%s6762_s3 + $0x128] ss:$16 sps:$4 sm:$0xff]   ;;  %v5051_v63 = vld [vmem:[%s6762_s3 + $0x264] ss:$16 sps:$4 sm:$0xff]  }
 0x143   :  { %1370 = vmatprep.subr.bf16.mxu0 %v4997_v31  ;;  %v5046_v2 = vld [vmem:[%s6762_s3 + $0x148] ss:$16 sps:$4 sm:$0xff]   ;;  %v5054_v31 = vld [vmem:[%s6762_s3 + $0x16c] ss:$16 sps:$4 sm:$0xff]  }
 0x144   :  { %1063 = vmatpush1.bf16.msra.mxu1 %v4992_v6  ;;  %v890_v6 = vmax.f32 %v5795_v0, 0.0  ;;  %v5055_v0 = vld [vmem:[%s6762_s3 + $0x280] ss:$16 sps:$4 sm:$0xff]  }
 0x145   :  { %v4860_v10 = vpop.f32.mrb[40].mxu0  ;;  %1064 = vmatprep.subr.bf16.mxu1 %v5000_v8  ;;  %v5057_v8 = vld [vmem:[%s6762_s3 + $0x284] ss:$16 sps:$4 sm:$0xff]  }
 0x146   :  { %v5828_v12 = vadd.f32 %v4860_v10, %v5745_v4  ;;  %1371 = vmatpush1.bf16.msra.mxu0 %v4995_v35  ;;  %v855_v13 = vpop.f32.mrb[41].mxu0  ;;  %v5052_v35 = vld [vmem:[%s6762_s3 + $0x168] ss:$16 sps:$4 sm:$0xff]   ;;  %v5063_v10 = vld [vmem:[%s6762_s3 + $0x2a4] ss:$16 sps:$4 sm:$0xff]  }
 0x147   :  { %v5835_v18 = vadd.f32 %v855_v13, %v5739_v50  ;;  %v4861_v19 = vpop.f32.mrb[42].mxu0  ;;  %1372 = vmatprep.subr.bf16.mxu0 %v5003_v9  ;;  %v5012_v50 = vld [vmem:[%s6762_s3 + $0xc] ss:$16 sps:$4 sm:$0xff]  }
 0x148   :  { %v5841_v4 = vadd.f32 %v4861_v19, %v5747_v7  ;;  %1065 = vmatpush1.bf16.msra.mxu1 %v4998_v17  ;;  %v858_v21 = vpop.f32.mrb[43].mxu0  ;;  %v5007_v7 = vld [vmem:[%s6762_s3 + $0x180] ss:$16 sps:$4 sm:$0xff]   ;;  %v5060_v9 = vld [vmem:[%s6762_s3 + $0x18c] ss:$16 sps:$4 sm:$0xff]   ;;  %v5981_v17 = vpack.c.bf16 %v890_v6, %v890_v6  ;;  %v893_v6 = vmax.f32 %v5803_v3, 0.0 }
 0x149   :  { %v5847_v24 = vadd.f32 %v858_v21, %v5741_v53  ;;  %1066 = vmatprep.subr.bf16.mxu1 %v5006_v11  ;;  %v5010_v53 = vld [vmem:[%s6762_s3 + $0x8] ss:$16 sps:$4 sm:$0xff]   ;;  %v5066_v13 = vld [vmem:[%s6762_s3 + $0x1ac] ss:$16 sps:$4 sm:$0xff]   ;;  %v5067_v21 = vld [vmem:[%s6762_s3 + $0x2c0] ss:$16 sps:$4 sm:$0xff]  }
 0x14a   :  { %1373 = vmatpush1.bf16.msra.mxu0 %v5001_v15  ;;  %v5058_v11 = vld [vmem:[%s6762_s3 + $0x188] ss:$16 sps:$4 sm:$0xff]   ;;  %v5061_v15 = vld [vmem:[%s6762_s3 + $0x2a0] ss:$16 sps:$4 sm:$0xff]  }
 0x14b   :  { %1552 = vmatprep.subr.bf16.mxu0 %v5009_v20  ;;  %v5064_v19 = vld [vmem:[%s6762_s3 + $0x1a8] ss:$16 sps:$4 sm:$0xff]   ;;  %v5072_v20 = vld [vmem:[%s6762_s3 + $0x1cc] ss:$16 sps:$4 sm:$0xff]   ;;  %v5127_v3 = vld [vmem:[%s6762_s3 + $0x400] ss:$16 sps:$4 sm:$0xff]  }
 0x14c   :  { %1067 = vmatpush1.bf16.msra.mxu1 %v5004_v23  ;;  %v5075_v23 = vld [vmem:[%s6762_s3 + $0x2e4] ss:$16 sps:$4 sm:$0xff]  }
 0x14d   :  { %4389 = vmatmul.mubr.msk.bf16.vlgmr.msra.gmra.mrb[52].mxu0 %vm570_vm0, %v5855_v26  ;;  %v4864_v28 = vpop.f32.mrb[44].mxu0  ;;  %1225 = vmatprep.subr.bf16.mxu1 %v5012_v50  ;;  %v5070_v50 = vld [vmem:[%s6762_s3 + $0x1c8] ss:$16 sps:$4 sm:$0xff]  }
 0x14e   :  { %v5869_v33 = vadd.f32 %v4864_v28, %v5757_v42  ;;  %1553 = vmatpush1.bf16.msra.mxu0 %v5007_v7  ;;  %v871_v34 = vpop.f32.mrb[45].mxu0  ;;  %1584 = vmatprep.mubr.bf16.mxu0 %v5375_v29  ;;  %v5016_v42 = vld [vmem:[%s6762_s3 + $0x28] ss:$16 sps:$4 sm:$0xff]   ;;  %v5078_v7 = vld [vmem:[%s6762_s3 + $0x1ec] ss:$16 sps:$4 sm:$0xff]  }
 0x14f   :  { %v5876_v37 = vadd.f32 %v871_v34, %v5751_v22  ;;  %4354 = vmatmul.mubr.msk.bf16.vlgmr.msra.gmra.mrb[36].mxu1 %vm570_vm0, %v5780_v1  ;;  %v4865_v38 = vpop.f32.mrb[46].mxu0  ;;  %1554 = vmatprep.subr.bf16.mxu0 %v5015_v27  ;;  %v5037_v1 = vld [vmem:[%s6762_s3 + $0x220] ss:$16 sps:$4 sm:$0xff]   ;;  %v891_v27 = vmax.f32 %v5810_v14, 0.0  ;;  %v5076_v28 = vld [vmem:[%s6762_s3 + $0x1e8] ss:$16 sps:$4 sm:$0xff]  }
 0x150   :  { %v5884_v40 = vadd.f32 %v4865_v38, %v5762_v47  ;;  %1226 = vmatpush1.bf16.msra.mxu1 %v5010_v53  ;;  %v874_v41 = vpop.f32.mrb[47].mxu0  ;;  %1257 = vmatprep.mubr.bf16.mxu1 %v5375_v29  ;;  %v5030_v47 = vld [vmem:[%s6762_s3 + $0x6c] ss:$16 sps:$4 sm:$0xff]   ;;  %v5081_v53 = vld [vmem:[%s6762_s3 + $0x304] ss:$16 sps:$4 sm:$0xff]  }
 0x151   :  { %v5891_v22 = vadd.f32 %v874_v41, %v5753_v25  ;;  %1227 = vmatprep.subr.bf16.mxu1 %v5018_v30  ;;  %v5022_v25 = vld [vmem:[%s6762_s3 + $0x48] ss:$16 sps:$4 sm:$0xff]   ;;  %v5084_v30 = vld [vmem:[%s6762_s3 + $0x20c] ss:$16 sps:$4 sm:$0xff]   ;;  %v5079_v14 = vld [vmem:[%s6762_s3 + $0x300] ss:$16 sps:$4 sm:$0xff]   ;;  %v6038_v34 = vpack.c.bf16 %v891_v27, %v891_v27 }
 0x152   :  { %1555 = vmatpush1.bf16.msra.mxu0 %v5013_v36  ;;  %v5087_v36 = vld [vmem:[%s6762_s3 + $0x324] ss:$16 sps:$4 sm:$0xff]   ;;  %v5082_v38 = vld [vmem:[%s6762_s3 + $0x208] ss:$16 sps:$4 sm:$0xff]   ;;  %v5085_v41 = vld [vmem:[%s6762_s3 + $0x320] ss:$16 sps:$4 sm:$0xff]  }
 0x153   :  { %1556 = vmatprep.subr.bf16.mxu0 %v5021_v39  ;;  %v5090_v39 = vld [vmem:[%s6762_s3 + $0x22c] ss:$16 sps:$4 sm:$0xff]   ;;  %v5153_v27 = vld [vmem:[%s6762_s3 + $0x484] ss:$16 sps:$4 sm:$0xff]  }
 0x154   :  { %1228 = vmatpush1.bf16.msra.mxu1 %v5016_v42  ;;  %v5093_v42 = vld [vmem:[%s6762_s3 + $0x344] ss:$16 sps:$4 sm:$0xff]  }
 0x155   :  { %1229 = vmatprep.subr.bf16.mxu1 %v5024_v43  ;;  %v5088_v43 = vld [vmem:[%s6762_s3 + $0x228] ss:$16 sps:$4 sm:$0xff]  }
 0x156   :  { %1557 = vmatpush1.bf16.msra.mxu0 %v5019_v44  ;;  %v5096_v44 = vld [vmem:[%s6762_s3 + $0x24c] ss:$16 sps:$4 sm:$0xff]  }
 0x157   :  { %1558 = vmatprep.subr.bf16.mxu0 %v5027_v45  ;;  %v5091_v45 = vld [vmem:[%s6762_s3 + $0x340] ss:$16 sps:$4 sm:$0xff]  }
 0x158   :  { %1230 = vmatpush1.bf16.msra.mxu1 %v5022_v25  ;;  %v5099_v25 = vld [vmem:[%s6762_s3 + $0x364] ss:$16 sps:$4 sm:$0xff]  }
 0x159   :  { %1231 = vmatprep.subr.bf16.mxu1 %v5030_v47  ;;  %v5094_v47 = vld [vmem:[%s6762_s3 + $0x248] ss:$16 sps:$4 sm:$0xff]  }
 0x15a   :  { %1559 = vmatpush1.bf16.msra.mxu0 %v5025_v48  ;;  %v5102_v48 = vld [vmem:[%s6762_s3 + $0x26c] ss:$16 sps:$4 sm:$0xff]  }
 0x15b   :  { %1738 = vmatprep.subr.bf16.mxu0 %v5033_v54  ;;  %v892_v54 = vmax.f32 %v5788_v60, 0.0  ;;  %v5103_v60 = vld [vmem:[%s6762_s3 + $0x380] ss:$16 sps:$4 sm:$0xff]  }
 0x15c   :  { %1232 = vmatpush1.bf16.msra.mxu1 %v5028_v55  ;;  %v5105_v55 = vld [vmem:[%s6762_s3 + $0x384] ss:$16 sps:$4 sm:$0xff]  }
 0x15d   :  { %4407 = vmatmul.mubr.msk.bf16.vlgmr.msra.gmra.mrb[56].mxu0 %vm570_vm0, %v5924_v56  ;;  %1407 = vmatprep.subr.bf16.mxu1 %v5036_v32  ;;  %v5100_v32 = vld [vmem:[%s6762_s3 + $0x268] ss:$16 sps:$4 sm:$0xff]  }
 0x15e   :  { %1739 = vmatpush1.bf16.msra.mxu0 %v5031_v52  ;;  %1770 = vmatprep.mubr.bf16.mxu0 %v5375_v29  ;;  %v5108_v52 = vld [vmem:[%s6762_s3 + $0x28c] ss:$16 sps:$4 sm:$0xff]  }
 0x15f   :  { %4372 = vmatmul.mubr.msk.bf16.vlgmr.msra.gmra.mrb[40].mxu1 %vm570_vm0, %v5772_v57  ;;  %1740 = vmatprep.subr.bf16.mxu0 %v5039_v62  ;;  %v5043_v57 = vld [vmem:[%s6762_s3 + $0x240] ss:$16 sps:$4 sm:$0xff]   ;;  %v5111_v62 = vld [vmem:[%s6762_s3 + $0x3a4] ss:$16 sps:$4 sm:$0xff]  }
 0x160   :  { %1408 = vmatpush1.bf16.msra.mxu1 %v5034_v58  ;;  %1439 = vmatprep.mubr.bf16.mxu1 %v5375_v29  ;;  %v5106_v58 = vld [vmem:[%s6762_s3 + $0x288] ss:$16 sps:$4 sm:$0xff]  }
 0x161   :  { %1409 = vmatprep.subr.bf16.mxu1 %v5042_v46  ;;  %v5114_v46 = vld [vmem:[%s6762_s3 + $0x2ac] ss:$16 sps:$4 sm:$0xff]  }
 0x162   :  { %1741 = vmatpush1.bf16.msra.mxu0 %v5037_v1  ;;  %v5109_v1 = vld [vmem:[%s6762_s3 + $0x3a0] ss:$16 sps:$4 sm:$0xff]  }
 0x163   :  { %1742 = vmatprep.subr.bf16.mxu0 %v5045_v59  ;;  %v5117_v59 = vld [vmem:[%s6762_s3 + $0x3c4] ss:$16 sps:$4 sm:$0xff]  }
 0x164   :  { %1410 = vmatpush1.bf16.msra.mxu1 %v5040_v49  ;;  %v5112_v49 = vld [vmem:[%s6762_s3 + $0x2a8] ss:$16 sps:$4 sm:$0xff]  }
 0x165   :  { %1411 = vmatprep.subr.bf16.mxu1 %v5048_v61  ;;  %v5120_v61 = vld [vmem:[%s6762_s3 + $0x2cc] ss:$16 sps:$4 sm:$0xff]  }
 0x166   :  { %1743 = vmatpush1.bf16.msra.mxu0 %v5043_v57  ;;  %v5115_v57 = vld [vmem:[%s6762_s3 + $0x3c0] ss:$16 sps:$4 sm:$0xff]  }
 0x167   :  { %1744 = vmatprep.subr.bf16.mxu0 %v5051_v63  ;;  %v5123_v63 = vld [vmem:[%s6762_s3 + $0x3e4] ss:$16 sps:$4 sm:$0xff]  }
 0x168   :  { %1412 = vmatpush1.bf16.msra.mxu1 %v5046_v2  ;;  %v5118_v2 = vld [vmem:[%s6762_s3 + $0x2c8] ss:$16 sps:$4 sm:$0xff]  }
 0x169   :  { %1413 = vmatprep.subr.bf16.mxu1 %v5054_v31  ;;  %v5126_v31 = vld [vmem:[%s6762_s3 + $0x2ec] ss:$16 sps:$4 sm:$0xff]  }
 0x16a   :  { %1745 = vmatpush1.bf16.msra.mxu0 %v5049_v5  ;;  %v5121_v5 = vld [vmem:[%s6762_s3 + $0x3e0] ss:$16 sps:$4 sm:$0xff]  }
 0x16b   :  { %1924 = vmatprep.subr.bf16.mxu0 %v5057_v8  ;;  %v5129_v8 = vld [vmem:[%s6762_s3 + $0x404] ss:$16 sps:$4 sm:$0xff]  }
 0x16c   :  { %1414 = vmatpush1.bf16.msra.mxu1 %v5052_v35  ;;  %v5124_v35 = vld [vmem:[%s6762_s3 + $0x2e8] ss:$16 sps:$4 sm:$0xff]  }
 0x16d   :  { %4425 = vmatmul.mubr.msk.bf16.vlgmr.msra.gmra.mrb[60].mxu0 %vm570_vm0, %v5981_v17  ;;  %1593 = vmatprep.subr.bf16.mxu1 %v5060_v9  ;;  %v5132_v9 = vld [vmem:[%s6762_s3 + $0x30c] ss:$16 sps:$4 sm:$0xff]  }
 0x16e   :  { %1925 = vmatpush1.bf16.msra.mxu0 %v5055_v0  ;;  %1956 = vmatprep.mubr.bf16.mxu0 %v5375_v29  ;;  %v6152_v0 = vpack.c.bf16 %v893_v6, %v893_v6  ;;  %v5204_v6 = vld [vmem:[%s6762_s3 + $0x48c] ss:$16 sps:$4 sm:$0xff]  }
 0x16f   :  { %4390 = vmatmul.mubr.msk.bf16.vlgmr.msra.gmra.mrb[44].mxu1 %vm570_vm0, %v5855_v26  ;;  %1926 = vmatprep.subr.bf16.mxu0 %v5063_v10  ;;  %v5073_v26 = vld [vmem:[%s6762_s3 + $0x2e0] ss:$16 sps:$4 sm:$0xff]   ;;  %v5130_v10 = vld [vmem:[%s6762_s3 + $0x308] ss:$16 sps:$4 sm:$0xff]  }
 0x170   :  { %1594 = vmatpush1.bf16.msra.mxu1 %v5058_v11  ;;  %1625 = vmatprep.mubr.bf16.mxu1 %v5375_v29  ;;  %v5138_v11 = vld [vmem:[%s6762_s3 + $0x32c] ss:$16 sps:$4 sm:$0xff]  }
 0x171   :  { %1595 = vmatprep.subr.bf16.mxu1 %v5066_v13  ;;  %v5133_v13 = vld [vmem:[%s6762_s3 + $0x420] ss:$16 sps:$4 sm:$0xff]  }
 0x172   :  { %1927 = vmatpush1.bf16.msra.mxu0 %v5061_v15  ;;  %v5141_v15 = vld [vmem:[%s6762_s3 + $0x444] ss:$16 sps:$4 sm:$0xff]  }
 0x173   :  { %1928 = vmatprep.subr.bf16.mxu0 %v5069_v16  ;;  %v5136_v16 = vld [vmem:[%s6762_s3 + $0x328] ss:$16 sps:$4 sm:$0xff]  }
 0x174   :  { %1596 = vmatpush1.bf16.msra.mxu1 %v5064_v19  ;;  %v5144_v19 = vld [vmem:[%s6762_s3 + $0x34c] ss:$16 sps:$4 sm:$0xff]  }
 0x175   :  { %1597 = vmatprep.subr.bf16.mxu1 %v5072_v20  ;;  %v5139_v20 = vld [vmem:[%s6762_s3 + $0x440] ss:$16 sps:$4 sm:$0xff]  }
 0x176   :  { %1929 = vmatpush1.bf16.msra.mxu0 %v5067_v21  ;;  %v5147_v21 = vld [vmem:[%s6762_s3 + $0x464] ss:$16 sps:$4 sm:$0xff]  }
 0x177   :  { %1930 = vmatprep.subr.bf16.mxu0 %v5075_v23  ;;  %v5142_v23 = vld [vmem:[%s6762_s3 + $0x348] ss:$16 sps:$4 sm:$0xff]  }
 0x178   :  { %1598 = vmatpush1.bf16.msra.mxu1 %v5070_v50  ;;  %v5150_v50 = vld [vmem:[%s6762_s3 + $0x36c] ss:$16 sps:$4 sm:$0xff]  }
 0x179   :  { %1599 = vmatprep.subr.bf16.mxu1 %v5078_v7  ;;  %v5145_v7 = vld [vmem:[%s6762_s3 + $0x460] ss:$16 sps:$4 sm:$0xff]  }
 0x17a   :  { %1931 = vmatpush1.bf16.msra.mxu0 %v5073_v26  ;;  %v894_v26 = vmax.f32 %v5835_v18, 0.0  ;;  %v5151_v18 = vld [vmem:[%s6762_s3 + $0x480] ss:$16 sps:$4 sm:$0xff]  }
 0x17b   :  { %2110 = vmatprep.subr.bf16.mxu0 %v5081_v53  ;;  %v5148_v53 = vld [vmem:[%s6762_s3 + $0x368] ss:$16 sps:$4 sm:$0xff]  }
 0x17c   :  { %1600 = vmatpush1.bf16.msra.mxu1 %v5076_v28  ;;  %v5156_v28 = vld [vmem:[%s6762_s3 + $0x38c] ss:$16 sps:$4 sm:$0xff]  }
 0x17d   :  { %4443 = vmatmul.mubr.msk.bf16.vlgmr.msra.gmra.mrb[64].mxu0 %vm570_vm0, %v6038_v34  ;;  %1779 = vmatprep.subr.bf16.mxu1 %v5084_v30  ;;  %v6209_v30 = vpack.c.bf16 %v894_v26, %v894_v26 }
 0x17e   :  { %2111 = vmatpush1.bf16.msra.mxu0 %v5079_v14  ;;  %2142 = vmatprep.mubr.bf16.mxu0 %v5375_v29  ;;  %v5159_v14 = vld [vmem:[%s6762_s3 + $0x4a4] ss:$16 sps:$4 sm:$0xff]  }
 0x17f   :  { %4408 = vmatmul.mubr.msk.bf16.vlgmr.msra.gmra.mrb[48].mxu1 %vm570_vm0, %v5924_v56  ;;  %2112 = vmatprep.subr.bf16.mxu0 %v5087_v36  ;;  %v6095_v56 = vpack.c.bf16 %v892_v54, %v892_v54  ;;  %v5162_v36 = vld [vmem:[%s6762_s3 + $0x3ac] ss:$16 sps:$4 sm:$0xff]   ;;  %v5172_v54 = vld [vmem:[%s6762_s3 + $0x3e8] ss:$16 sps:$4 sm:$0xff]  }
 0x180   :  { %1780 = vmatpush1.bf16.msra.mxu1 %v5082_v38  ;;  %1811 = vmatprep.mubr.bf16.mxu1 %v5375_v29  ;;  %v5157_v38 = vld [vmem:[%s6762_s3 + $0x4a0] ss:$16 sps:$4 sm:$0xff]  }
 0x181   :  { %1781 = vmatprep.subr.bf16.mxu1 %v5090_v39  ;;  %v5165_v39 = vld [vmem:[%s6762_s3 + $0x4c4] ss:$16 sps:$4 sm:$0xff]  }
 0x182   :  { %2113 = vmatpush1.bf16.msra.mxu0 %v5085_v41  ;;  %v5160_v41 = vld [vmem:[%s6762_s3 + $0x3a8] ss:$16 sps:$4 sm:$0xff]  }
 0x183   :  { %2114 = vmatprep.subr.bf16.mxu0 %v5093_v42  ;;  %v5168_v42 = vld [vmem:[%s6762_s3 + $0x3cc] ss:$16 sps:$4 sm:$0xff]  }
 0x184   :  { %1782 = vmatpush1.bf16.msra.mxu1 %v5088_v43  ;;  %v5163_v43 = vld [vmem:[%s6762_s3 + $0x4c0] ss:$16 sps:$4 sm:$0xff]  }
 0x185   :  { %1783 = vmatprep.subr.bf16.mxu1 %v5096_v44  ;;  %v5171_v44 = vld [vmem:[%s6762_s3 + $0x4e4] ss:$16 sps:$4 sm:$0xff]  }
 0x186   :  { %2115 = vmatpush1.bf16.msra.mxu0 %v5091_v45  ;;  %v5166_v45 = vld [vmem:[%s6762_s3 + $0x3c8] ss:$16 sps:$4 sm:$0xff]  }
 0x187   :  { %2116 = vmatprep.subr.bf16.mxu0 %v5099_v25  ;;  %v5174_v25 = vld [vmem:[%s6762_s3 + $0x3ec] ss:$16 sps:$4 sm:$0xff]  }
 0x188   :  { %1784 = vmatpush1.bf16.msra.mxu1 %v5094_v47  ;;  %v5169_v47 = vld [vmem:[%s6762_s3 + $0x4e0] ss:$16 sps:$4 sm:$0xff]  }
 0x189   :  { %1785 = vmatprep.subr.bf16.mxu1 %v5102_v48  ;;  %v895_v48 = vmax.f32 %v5847_v24, 0.0  ;;  %v5175_v24 = vld [vmem:[%s6762_s3 + $0x500] ss:$16 sps:$4 sm:$0xff]  }
 0x18a   :  { %2117 = vmatpush1.bf16.msra.mxu0 %v5097_v51  ;;  %v5177_v51 = vld [vmem:[%s6762_s3 + $0x504] ss:$16 sps:$4 sm:$0xff]  }
 0x18b   :  { %2296 = vmatprep.subr.bf16.mxu0 %v5105_v55  ;;  %v5180_v55 = vld [vmem:[%s6762_s3 + $0x40c] ss:$16 sps:$4 sm:$0xff]  }
 0x18c   :  { %1786 = vmatpush1.bf16.msra.mxu1 %v5100_v32  ;;  %v6266_v32 = vpack.c.bf16 %v895_v48, %v895_v48  ;;  %v5255_v48 = vld [vmem:[%s6762_s3 + $0x6a4] ss:$16 sps:$4 sm:$0xff]  }
 0x18d   :  { %4461 = vmatmul.mubr.msk.bf16.vlgmr.msra.gmra.mrb[68].mxu0 %vm570_vm0, %v6095_v56  ;;  %1965 = vmatprep.subr.bf16.mxu1 %v5108_v52  ;;  %v5183_v52 = vld [vmem:[%s6762_s3 + $0x524] ss:$16 sps:$4 sm:$0xff]  }
 0x18e   :  { %2297 = vmatpush1.bf16.msra.mxu0 %v5103_v60  ;;  %2328 = vmatprep.mubr.bf16.mxu0 %v5375_v29  ;;  %v5178_v60 = vld [vmem:[%s6762_s3 + $0x408] ss:$16 sps:$4 sm:$0xff]  }
 0x18f   :  { %4426 = vmatmul.mubr.msk.bf16.vlgmr.msra.gmra.mrb[52].mxu1 %vm570_vm0, %v5981_v17  ;;  %2298 = vmatprep.subr.bf16.mxu0 %v5111_v62  ;;  %v5135_v17 = vld [vmem:[%s6762_s3 + $0x424] ss:$16 sps:$4 sm:$0xff]   ;;  %v5181_v62 = vld [vmem:[%s6762_s3 + $0x520] ss:$16 sps:$4 sm:$0xff]  }
 0x190   :  { %1966 = vmatpush1.bf16.msra.mxu1 %v5106_v58  ;;  %1997 = vmatprep.mubr.bf16.mxu1 %v5375_v29  ;;  %v5189_v58 = vld [vmem:[%s6762_s3 + $0x544] ss:$16 sps:$4 sm:$0xff]  }
 0x191   :  { %1967 = vmatprep.subr.bf16.mxu1 %v5114_v46  ;;  %v5184_v46 = vld [vmem:[%s6762_s3 + $0x428] ss:$16 sps:$4 sm:$0xff]  }
 0x192   :  { %2299 = vmatpush1.bf16.msra.mxu0 %v5109_v1  ;;  %v5192_v1 = vld [vmem:[%s6762_s3 + $0x44c] ss:$16 sps:$4 sm:$0xff]  }
 0x193   :  { %2300 = vmatprep.subr.bf16.mxu0 %v5117_v59  ;;  %v5187_v59 = vld [vmem:[%s6762_s3 + $0x540] ss:$16 sps:$4 sm:$0xff]  }
 0x194   :  { %1968 = vmatpush1.bf16.msra.mxu1 %v5112_v49  ;;  %v5195_v49 = vld [vmem:[%s6762_s3 + $0x564] ss:$16 sps:$4 sm:$0xff]  }
 0x195   :  { %1969 = vmatprep.subr.bf16.mxu1 %v5120_v61  ;;  %v5190_v61 = vld [vmem:[%s6762_s3 + $0x448] ss:$16 sps:$4 sm:$0xff]  }
 0x196   :  { %2301 = vmatpush1.bf16.msra.mxu0 %v5115_v57  ;;  %v5198_v57 = vld [vmem:[%s6762_s3 + $0x46c] ss:$16 sps:$4 sm:$0xff]  }
 0x197   :  { %2302 = vmatprep.subr.bf16.mxu0 %v5123_v63  ;;  %v5193_v63 = vld [vmem:[%s6762_s3 + $0x560] ss:$16 sps:$4 sm:$0xff]  }
 0x198   :  { %1970 = vmatpush1.bf16.msra.mxu1 %v5118_v2  ;;  %v896_v2 = vmax.f32 %v5828_v12, 0.0  ;;  %v5199_v12 = vld [vmem:[%s6762_s3 + $0x580] ss:$16 sps:$4 sm:$0xff]  }
 0x199   :  { %1971 = vmatprep.subr.bf16.mxu1 %v5126_v31  ;;  %v5201_v31 = vld [vmem:[%s6762_s3 + $0x584] ss:$16 sps:$4 sm:$0xff]  }
 0x19a   :  { %2303 = vmatpush1.bf16.msra.mxu0 %v5121_v5  ;;  %v5196_v5 = vld [vmem:[%s6762_s3 + $0x468] ss:$16 sps:$4 sm:$0xff]  }
 0x19b   :  { %2482 = vmatprep.subr.bf16.mxu0 %v5129_v8  ;;  %v6323_v8 = vpack.c.bf16 %v896_v2, %v896_v2  ;;  %v5274_v2 = vld [vmem:[%s6762_s3 + $0x608] ss:$16 sps:$4 sm:$0xff]  }
 0x19c   :  { %1972 = vmatpush1.bf16.msra.mxu1 %v5124_v35  ;;  %v5207_v35 = vld [vmem:[%s6762_s3 + $0x5a4] ss:$16 sps:$4 sm:$0xff]  }
 0x19d   :  { %4479 = vmatmul.mubr.msk.bf16.vlgmr.msra.gmra.mrb[72].mxu0 %vm570_vm0, %v6152_v0  ;;  %2151 = vmatprep.subr.bf16.mxu1 %v5132_v9  ;;  %v5202_v9 = vld [vmem:[%s6762_s3 + $0x488] ss:$16 sps:$4 sm:$0xff]  }
 0x19e   :  { %2483 = vmatpush1.bf16.msra.mxu0 %v5127_v3  ;;  %2514 = vmatprep.mubr.bf16.mxu0 %v5375_v29  ;;  %v5210_v3 = vld [vmem:[%s6762_s3 + $0x4ac] ss:$16 sps:$4 sm:$0xff]  }
 0x19f   :  { %4444 = vmatmul.mubr.msk.bf16.vlgmr.msra.gmra.mrb[56].mxu1 %vm570_vm0, %v6038_v34  ;;  %2484 = vmatprep.subr.bf16.mxu0 %v5135_v17  ;;  %v5154_v34 = vld [vmem:[%s6762_s3 + $0x388] ss:$16 sps:$4 sm:$0xff]   ;;  %v5213_v17 = vld [vmem:[%s6762_s3 + $0x5c4] ss:$16 sps:$4 sm:$0xff]  }
 0x1a0   :  { %2152 = vmatpush1.bf16.msra.mxu1 %v5130_v10  ;;  %2183 = vmatprep.mubr.bf16.mxu1 %v5375_v29  ;;  %v5208_v10 = vld [vmem:[%s6762_s3 + $0x4a8] ss:$16 sps:$4 sm:$0xff]  }
 0x1a1   :  { %2153 = vmatprep.subr.bf16.mxu1 %v5138_v11  ;;  %v5216_v11 = vld [vmem:[%s6762_s3 + $0x4cc] ss:$16 sps:$4 sm:$0xff]  }
 0x1a2   :  { %2485 = vmatpush1.bf16.msra.mxu0 %v5133_v13  ;;  %v5211_v13 = vld [vmem:[%s6762_s3 + $0x5c0] ss:$16 sps:$4 sm:$0xff]  }
 0x1a3   :  { %2486 = vmatprep.subr.bf16.mxu0 %v5141_v15  ;;  %v5219_v15 = vld [vmem:[%s6762_s3 + $0x5e4] ss:$16 sps:$4 sm:$0xff]  }
 0x1a4   :  { %2154 = vmatpush1.bf16.msra.mxu1 %v5136_v16  ;;  %v5214_v16 = vld [vmem:[%s6762_s3 + $0x4c8] ss:$16 sps:$4 sm:$0xff]  }
 0x1a5   :  { %2155 = vmatprep.subr.bf16.mxu1 %v5144_v19  ;;  %v5222_v19 = vld [vmem:[%s6762_s3 + $0x4ec] ss:$16 sps:$4 sm:$0xff]  }
 0x1a6   :  { %2487 = vmatpush1.bf16.msra.mxu0 %v5139_v20  ;;  %v5217_v20 = vld [vmem:[%s6762_s3 + $0x5e0] ss:$16 sps:$4 sm:$0xff]  }
 0x1a7   :  { %2488 = vmatprep.subr.bf16.mxu0 %v5147_v21  ;;  %v897_v21 = vmax.f32 %v5841_v4, 0.0  ;;  %v5223_v4 = vld [vmem:[%s6762_s3 + $0x600] ss:$16 sps:$4 sm:$0xff]  }
 0x1a8   :  { %2156 = vmatpush1.bf16.msra.mxu1 %v5142_v23  ;;  %v5225_v23 = vld [vmem:[%s6762_s3 + $0x604] ss:$16 sps:$4 sm:$0xff]  }
 0x1a9   :  { %2157 = vmatprep.subr.bf16.mxu1 %v5150_v50  ;;  %v5220_v50 = vld [vmem:[%s6762_s3 + $0x4e8] ss:$16 sps:$4 sm:$0xff]   ;;  %v6380_v26 = vpack.c.bf16 %v897_v21, %v897_v21  ;;  %v5306_v21 = vld [vmem:[%s6762_s3 + $0x6ac] ss:$16 sps:$4 sm:$0xff]  }
 0x1aa   :  { %2489 = vmatpush1.bf16.msra.mxu0 %v5145_v7  ;;  %v5228_v7 = vld [vmem:[%s6762_s3 + $0x50c] ss:$16 sps:$4 sm:$0xff]  }
 0x1ab   :  { %2668 = vmatprep.subr.bf16.mxu0 %v5153_v27  ;;  %v5231_v27 = vld [vmem:[%s6762_s3 + $0x624] ss:$16 sps:$4 sm:$0xff]  }
 0x1ac   :  { %2158 = vmatpush1.bf16.msra.mxu1 %v5148_v53  ;;  %v5226_v53 = vld [vmem:[%s6762_s3 + $0x508] ss:$16 sps:$4 sm:$0xff]  }
 0x1ad   :  { %4497 = vmatmul.mubr.msk.bf16.vlgmr.msra.gmra.mrb[76].mxu0 %vm570_vm0, %v6209_v30  ;;  %2337 = vmatprep.subr.bf16.mxu1 %v5156_v28  ;;  %v5234_v28 = vld [vmem:[%s6762_s3 + $0x52c] ss:$16 sps:$4 sm:$0xff]  }
 0x1ae   :  { %2669 = vmatpush1.bf16.msra.mxu0 %v5151_v18  ;;  %2700 = vmatprep.mubr.bf16.mxu0 %v5375_v29  ;;  %v5229_v18 = vld [vmem:[%s6762_s3 + $0x620] ss:$16 sps:$4 sm:$0xff]  }
 0x1af   :  { %4462 = vmatmul.mubr.msk.bf16.vlgmr.msra.gmra.mrb[60].mxu1 %vm570_vm0, %v6095_v56  ;;  %2670 = vmatprep.subr.bf16.mxu0 %v5159_v14  ;;  %v5186_v56 = vld [vmem:[%s6762_s3 + $0x42c] ss:$16 sps:$4 sm:$0xff]   ;;  %v5232_v14 = vld [vmem:[%s6762_s3 + $0x528] ss:$16 sps:$4 sm:$0xff]  }
 0x1b0   :  { %2338 = vmatpush1.bf16.msra.mxu1 %v5154_v34  ;;  %2369 = vmatprep.mubr.bf16.mxu1 %v5375_v29  ;;  %v5240_v34 = vld [vmem:[%s6762_s3 + $0x54c] ss:$16 sps:$4 sm:$0xff]  }
 0x1b1   :  { %2339 = vmatprep.subr.bf16.mxu1 %v5162_v36  ;;  %v5235_v36 = vld [vmem:[%s6762_s3 + $0x640] ss:$16 sps:$4 sm:$0xff]  }
 0x1b2   :  { %2671 = vmatpush1.bf16.msra.mxu0 %v5157_v38  ;;  %v5243_v38 = vld [vmem:[%s6762_s3 + $0x664] ss:$16 sps:$4 sm:$0xff]  }
 0x1b3   :  { %2672 = vmatprep.subr.bf16.mxu0 %v5165_v39  ;;  %v5238_v39 = vld [vmem:[%s6762_s3 + $0x548] ss:$16 sps:$4 sm:$0xff]  }
 0x1b4   :  { %2340 = vmatpush1.bf16.msra.mxu1 %v5160_v41  ;;  %v5246_v41 = vld [vmem:[%s6762_s3 + $0x56c] ss:$16 sps:$4 sm:$0xff]  }
 0x1b5   :  { %2341 = vmatprep.subr.bf16.mxu1 %v5168_v42  ;;  %v5241_v42 = vld [vmem:[%s6762_s3 + $0x660] ss:$16 sps:$4 sm:$0xff]  }
 0x1b6   :  { %2673 = vmatpush1.bf16.msra.mxu0 %v5163_v43  ;;  %v898_v43 = vmax.f32 %v5876_v37, 0.0  ;;  %v5247_v37 = vld [vmem:[%s6762_s3 + $0x680] ss:$16 sps:$4 sm:$0xff]  }
 0x1b7   :  { %2674 = vmatprep.subr.bf16.mxu0 %v5171_v44  ;;  %v5249_v44 = vld [vmem:[%s6762_s3 + $0x684] ss:$16 sps:$4 sm:$0xff]  }
 0x1b8   :  { %2342 = vmatpush1.bf16.msra.mxu1 %v5166_v45  ;;  %v5244_v45 = vld [vmem:[%s6762_s3 + $0x568] ss:$16 sps:$4 sm:$0xff]  }
 0x1b9   :  { %2343 = vmatprep.subr.bf16.mxu1 %v5174_v25  ;;  %v5252_v25 = vld [vmem:[%s6762_s3 + $0x58c] ss:$16 sps:$4 sm:$0xff]  }
 0x1ba   :  { %2675 = vmatpush1.bf16.msra.mxu0 %v5169_v47  ;;  %v6437_v47 = vpack.c.bf16 %v898_v43, %v898_v43  ;;  %v5318_v43 = vld [vmem:[%s6762_s3 + $0x6ec] ss:$16 sps:$4 sm:$0xff]  }
 0x1bb   :  { %2854 = vmatprep.subr.bf16.mxu0 %v5177_v51  ;;  %v5250_v51 = vld [vmem:[%s6762_s3 + $0x588] ss:$16 sps:$4 sm:$0xff]  }
 0x1bc   :  { %2344 = vmatpush1.bf16.msra.mxu1 %v5172_v54  ;;  %v5258_v54 = vld [vmem:[%s6762_s3 + $0x5ac] ss:$16 sps:$4 sm:$0xff]  }
 0x1bd   :  { %4515 = vmatmul.mubr.msk.bf16.vlgmr.msra.gmra.mrb[80].mxu0 %vm570_vm0, %v6266_v32  ;;  %2523 = vmatprep.subr.bf16.mxu1 %v5180_v55  ;;  %v5253_v55 = vld [vmem:[%s6762_s3 + $0x6a0] ss:$16 sps:$4 sm:$0xff]  }
 0x1be   :  { %2855 = vmatpush1.bf16.msra.mxu0 %v5175_v24  ;;  %2886 = vmatprep.mubr.bf16.mxu0 %v5375_v29  ;;  %v5261_v24 = vld [vmem:[%s6762_s3 + $0x6c4] ss:$16 sps:$4 sm:$0xff]  }
 0x1bf   :  { %4480 = vmatmul.mubr.msk.bf16.vlgmr.msra.gmra.mrb[64].mxu1 %vm570_vm0, %v6152_v0  ;;  %2856 = vmatprep.subr.bf16.mxu0 %v5183_v52  ;;  %v5205_v0 = vld [vmem:[%s6762_s3 + $0x5a0] ss:$16 sps:$4 sm:$0xff]   ;;  %v5264_v52 = vld [vmem:[%s6762_s3 + $0x5cc] ss:$16 sps:$4 sm:$0xff]  }
 0x1c0   :  { %2524 = vmatpush1.bf16.msra.mxu1 %v5178_v60  ;;  %2555 = vmatprep.mubr.bf16.mxu1 %v5375_v29  ;;  %v5259_v60 = vld [vmem:[%s6762_s3 + $0x6c0] ss:$16 sps:$4 sm:$0xff]  }
 0x1c1   :  { %2525 = vmatprep.subr.bf16.mxu1 %v5186_v56  ;;  %v5267_v56 = vld [vmem:[%s6762_s3 + $0x6e4] ss:$16 sps:$4 sm:$0xff]  }
 0x1c2   :  { %2857 = vmatpush1.bf16.msra.mxu0 %v5181_v62  ;;  %v5262_v62 = vld [vmem:[%s6762_s3 + $0x5c8] ss:$16 sps:$4 sm:$0xff]  }
 0x1c3   :  { %2858 = vmatprep.subr.bf16.mxu0 %v5189_v58  ;;  %v5270_v58 = vld [vmem:[%s6762_s3 + $0x5ec] ss:$16 sps:$4 sm:$0xff]  }
 0x1c4   :  { %2526 = vmatpush1.bf16.msra.mxu1 %v5184_v46  ;;  %v5265_v46 = vld [vmem:[%s6762_s3 + $0x6e0] ss:$16 sps:$4 sm:$0xff]  }
 0x1c5   :  { %2527 = vmatprep.subr.bf16.mxu1 %v5192_v1  ;;  %v899_v1 = vmax.f32 %v5891_v22, 0.0  ;;  %v5271_v22 = vld [vmem:[%s6762_s3 + $0x700] ss:$16 sps:$4 sm:$0xff]  }
 0x1c6   :  { %2859 = vmatpush1.bf16.msra.mxu0 %v5187_v59  ;;  %v5273_v59 = vld [vmem:[%s6762_s3 + $0x704] ss:$16 sps:$4 sm:$0xff]  }
 0x1c7   :  { %2860 = vmatprep.subr.bf16.mxu0 %v5195_v49  ;;  %v5268_v49 = vld [vmem:[%s6762_s3 + $0x5e8] ss:$16 sps:$4 sm:$0xff]  }
 0x1c8   :  { %2528 = vmatpush1.bf16.msra.mxu1 %v5190_v61  ;;  %v5276_v61 = vld [vmem:[%s6762_s3 + $0x60c] ss:$16 sps:$4 sm:$0xff]  }
 0x1c9   :  { %2529 = vmatprep.subr.bf16.mxu1 %v5198_v57  ;;  %v6494_v57 = vpack.c.bf16 %v899_v1, %v899_v1  ;;  %v5325_v1 = vld [vmem:[%s6762_s3 + $0x748] ss:$16 sps:$4 sm:$0xff]  }
 0x1ca   :  { %2861 = vmatpush1.bf16.msra.mxu0 %v5193_v63  ;;  %v5279_v63 = vld [vmem:[%s6762_s3 + $0x724] ss:$16 sps:$4 sm:$0xff]  }
 0x1cb   :  { %3040 = vmatprep.subr.bf16.mxu0 %v5201_v31  ;;  %v5282_v31 = vld [vmem:[%s6762_s3 + $0x62c] ss:$16 sps:$4 sm:$0xff]  }
 0x1cc   :  { %2530 = vmatpush1.bf16.msra.mxu1 %v5196_v5  ;;  %v5277_v5 = vld [vmem:[%s6762_s3 + $0x720] ss:$16 sps:$4 sm:$0xff]  }
 0x1cd   :  { %4533 = vmatmul.mubr.msk.bf16.vlgmr.msra.gmra.mrb[84].mxu0 %vm570_vm0, %v6323_v8  ;;  %2709 = vmatprep.subr.bf16.mxu1 %v5204_v6  ;;  %v5285_v6 = vld [vmem:[%s6762_s3 + $0x744] ss:$16 sps:$4 sm:$0xff]  }
 0x1ce   :  { %3041 = vmatpush1.bf16.msra.mxu0 %v5199_v12  ;;  %3072 = vmatprep.mubr.bf16.mxu0 %v5375_v29  ;;  %v5280_v12 = vld [vmem:[%s6762_s3 + $0x628] ss:$16 sps:$4 sm:$0xff]  }
 0x1cf   :  { %4498 = vmatmul.mubr.msk.bf16.vlgmr.msra.gmra.mrb[68].mxu1 %vm570_vm0, %v6209_v30  ;;  %3042 = vmatprep.subr.bf16.mxu0 %v5207_v35  ;;  %v5237_v30 = vld [vmem:[%s6762_s3 + $0x644] ss:$16 sps:$4 sm:$0xff]   ;;  %v5283_v35 = vld [vmem:[%s6762_s3 + $0x740] ss:$16 sps:$4 sm:$0xff]  }
 0x1d0   :  { %2710 = vmatpush1.bf16.msra.mxu1 %v5202_v9  ;;  %2741 = vmatprep.mubr.bf16.mxu1 %v5375_v29  ;;  %v5291_v9 = vld [vmem:[%s6762_s3 + $0x764] ss:$16 sps:$4 sm:$0xff]  }
 0x1d1   :  { %2711 = vmatprep.subr.bf16.mxu1 %v5210_v3  ;;  %v5286_v3 = vld [vmem:[%s6762_s3 + $0x648] ss:$16 sps:$4 sm:$0xff]  }
 0x1d2   :  { %3043 = vmatpush1.bf16.msra.mxu0 %v5205_v0  ;;  %v5294_v0 = vld [vmem:[%s6762_s3 + $0x66c] ss:$16 sps:$4 sm:$0xff]  }
 0x1d3   :  { %3044 = vmatprep.subr.bf16.mxu0 %v5213_v17  ;;  %v5289_v17 = vld [vmem:[%s6762_s3 + $0x760] ss:$16 sps:$4 sm:$0xff]  }
 0x1d4   :  { %2712 = vmatpush1.bf16.msra.mxu1 %v5208_v10  ;;  %v900_v10 = vmax.f32 %v5869_v33, 0.0  ;;  %v5295_v33 = vld [vmem:[%s6762_s3 + $0x780] ss:$16 sps:$4 sm:$0xff]  }
 0x1d5   :  { %2713 = vmatprep.subr.bf16.mxu1 %v5216_v11  ;;  %v5297_v11 = vld [vmem:[%s6762_s3 + $0x784] ss:$16 sps:$4 sm:$0xff]  }
 0x1d6   :  { %3045 = vmatpush1.bf16.msra.mxu0 %v5211_v13  ;;  %v5292_v13 = vld [vmem:[%s6762_s3 + $0x668] ss:$16 sps:$4 sm:$0xff]  }
 0x1d7   :  { %3046 = vmatprep.subr.bf16.mxu0 %v5219_v15  ;;  %v5300_v15 = vld [vmem:[%s6762_s3 + $0x68c] ss:$16 sps:$4 sm:$0xff]  }
 0x1d8   :  { %2714 = vmatpush1.bf16.msra.mxu1 %v5214_v16  ;;  %v6551_v16 = vpack.c.bf16 %v900_v10, %v900_v10 }
 0x1d9   :  { %2715 = vmatprep.subr.bf16.mxu1 %v5222_v19  ;;  %v5303_v19 = vld [vmem:[%s6762_s3 + $0x7a4] ss:$16 sps:$4 sm:$0xff]  }
 0x1da   :  { %3047 = vmatpush1.bf16.msra.mxu0 %v5217_v20  ;;  %v5298_v20 = vld [vmem:[%s6762_s3 + $0x688] ss:$16 sps:$4 sm:$0xff]  }
 0x1db   :  { %3226 = vmatprep.subr.bf16.mxu0 %v5225_v23  ;;  %v5301_v23 = vld [vmem:[%s6762_s3 + $0x7a0] ss:$16 sps:$4 sm:$0xff]  }
 0x1dc   :  { %2716 = vmatpush1.bf16.msra.mxu1 %v5220_v50  ;;  %v5309_v50 = vld [vmem:[%s6762_s3 + $0x7c4] ss:$16 sps:$4 sm:$0xff]  }
 0x1dd   :  { %4551 = vmatmul.mubr.msk.bf16.vlgmr.msra.gmra.mrb[88].mxu0 %vm570_vm0, %v6380_v26  ;;  %2895 = vmatprep.subr.bf16.mxu1 %v5228_v7 }
 0x1de   :  { %3227 = vmatpush1.bf16.msra.mxu0 %v5223_v4  ;;  %3258 = vmatprep.mubr.bf16.mxu0 %v5375_v29  ;;  %v5304_v4 = vld [vmem:[%s6762_s3 + $0x6a8] ss:$16 sps:$4 sm:$0xff]  }
 0x1df   :  { %4516 = vmatmul.mubr.msk.bf16.vlgmr.msra.gmra.mrb[72].mxu1 %vm570_vm0, %v6266_v32  ;;  %3228 = vmatprep.subr.bf16.mxu0 %v5231_v27  ;;  %v5256_v32 = vld [vmem:[%s6762_s3 + $0x5a8] ss:$16 sps:$4 sm:$0xff]   ;;  %v5312_v27 = vld [vmem:[%s6762_s3 + $0x6cc] ss:$16 sps:$4 sm:$0xff]  }
 0x1e0   :  { %2896 = vmatpush1.bf16.msra.mxu1 %v5226_v53  ;;  %2927 = vmatprep.mubr.bf16.mxu1 %v5375_v29 }
 0x1e1   :  { %2897 = vmatprep.subr.bf16.mxu1 %v5234_v28 }
 0x1e2   :  { %3229 = vmatpush1.bf16.msra.mxu0 %v5229_v18  ;;  %v5307_v18 = vld [vmem:[%s6762_s3 + $0x7c0] ss:$16 sps:$4 sm:$0xff]  }
 0x1e3   :  { %3230 = vmatprep.subr.bf16.mxu0 %v5237_v30 }
 0x1e4   :  { %2898 = vmatpush1.bf16.msra.mxu1 %v5232_v14 }
 0x1e5   :  { %2899 = vmatprep.subr.bf16.mxu1 %v5240_v34 }
 0x1e6   :  { %3231 = vmatpush1.bf16.msra.mxu0 %v5235_v36  ;;  %v5315_v36 = vld [vmem:[%s6762_s3 + $0x7e4] ss:$16 sps:$4 sm:$0xff]  }
 0x1e7   :  { %3232 = vmatprep.subr.bf16.mxu0 %v5243_v38 }
 0x1e8   :  { %2900 = vmatpush1.bf16.msra.mxu1 %v5238_v39 }
 0x1e9   :  { %2901 = vmatprep.subr.bf16.mxu1 %v5246_v41  ;;  %v5310_v41 = vld [vmem:[%s6762_s3 + $0x6c8] ss:$16 sps:$4 sm:$0xff]  }
 0x1ea   :  { %3233 = vmatpush1.bf16.msra.mxu0 %v5241_v42 }
 0x1eb   :  { %3412 = vmatprep.subr.bf16.mxu0 %v5249_v44  ;;  %v5313_v44 = vld [vmem:[%s6762_s3 + $0x7e0] ss:$16 sps:$4 sm:$0xff]  }
 0x1ec   :  { %2902 = vmatpush1.bf16.msra.mxu1 %v5244_v45  ;;  %v901_v45 = vmax.f32 %v5884_v40, 0.0  ;;  %v5324_v40 = vld [vmem:[%s6762_s3 + $0x72c] ss:$16 sps:$4 sm:$0xff]  }
 0x1ed   :  { %4569 = vmatmul.mubr.msk.bf16.vlgmr.msra.gmra.mrb[92].mxu0 %vm570_vm0, %v6437_v47  ;;  %3081 = vmatprep.subr.bf16.mxu1 %v5252_v25  ;;  %v5316_v25 = vld [vmem:[%s6762_s3 + $0x6e8] ss:$16 sps:$4 sm:$0xff]  }
 0x1ee   :  { %3413 = vmatpush1.bf16.msra.mxu0 %v5247_v37  ;;  %3444 = vmatprep.mubr.bf16.mxu0 %v5375_v29  ;;  %v5321_v37 = vld [vmem:[%s6762_s3 + $0x70c] ss:$16 sps:$4 sm:$0xff]  }
 0x1ef   :  { %4534 = vmatmul.mubr.msk.bf16.vlgmr.msra.gmra.mrb[76].mxu1 %vm570_vm0, %v6323_v8  ;;  %3414 = vmatprep.subr.bf16.mxu0 %v5255_v48  ;;  %v5288_v8 = vld [vmem:[%s6762_s3 + $0x64c] ss:$16 sps:$4 sm:$0xff]   ;;  %v5319_v48 = vld [vmem:[%s6762_s3 + $0x708] ss:$16 sps:$4 sm:$0xff]  }
 0x1f0   :  { %3082 = vmatpush1.bf16.msra.mxu1 %v5250_v51  ;;  %3113 = vmatprep.mubr.bf16.mxu1 %v5375_v29 }
 0x1f1   :  { %3083 = vmatprep.subr.bf16.mxu1 %v5258_v54  ;;  %v5322_v54 = vld [vmem:[%s6762_s3 + $0x728] ss:$16 sps:$4 sm:$0xff]  }
 0x1f2   :  { %3415 = vmatpush1.bf16.msra.mxu0 %v5253_v55 }
 0x1f3   :  { %3416 = vmatprep.subr.bf16.mxu0 %v5261_v24 }
 0x1f4   :  { %3084 = vmatpush1.bf16.msra.mxu1 %v5256_v32  ;;  %v5327_v32 = vld [vmem:[%s6762_s3 + $0x74c] ss:$16 sps:$4 sm:$0xff]  }
 0x1f5   :  { %3085 = vmatprep.subr.bf16.mxu1 %v5264_v52 }
 0x1f6   :  { %3417 = vmatpush1.bf16.msra.mxu0 %v5259_v60 }
 0x1f7   :  { %3418 = vmatprep.subr.bf16.mxu0 %v5267_v56 }
 0x1f8   :  { %3086 = vmatpush1.bf16.msra.mxu1 %v5262_v62 }
 0x1f9   :  { %3087 = vmatprep.subr.bf16.mxu1 %v5270_v58 }
 0x1fa   :  { %3419 = vmatpush1.bf16.msra.mxu0 %v5265_v46 }
 0x1fb   :  { %3598 = vmatprep.subr.bf16.mxu0 %v5273_v59 }
 0x1fc   :  { %3088 = vmatpush1.bf16.msra.mxu1 %v5268_v49  ;;  %v5330_v49 = vld [vmem:[%s6762_s3 + $0x76c] ss:$16 sps:$4 sm:$0xff]  }
 0x1fd   :  { %4587 = vmatmul.mubr.msk.bf16.vlgmr.msra.gmra.mrb[96].mxu0 %vm570_vm0, %v6494_v57  ;;  %3267 = vmatprep.subr.bf16.mxu1 %v5276_v61  ;;  %v5328_v61 = vld [vmem:[%s6762_s3 + $0x768] ss:$16 sps:$4 sm:$0xff]  }
 0x1fe   :  { %3599 = vmatpush1.bf16.msra.mxu0 %v5271_v22  ;;  %3630 = vmatprep.mubr.bf16.mxu0 %v5375_v29  ;;  %v5333_v22 = vld [vmem:[%s6762_s3 + $0x78c] ss:$16 sps:$4 sm:$0xff]  }
 0x1ff   :  { %4552 = vmatmul.mubr.msk.bf16.vlgmr.msra.gmra.mrb[80].mxu1 %vm570_vm0, %v6380_v26  ;;  %3600 = vmatprep.subr.bf16.mxu0 %v5279_v63  ;;  %v5336_v63 = vld [vmem:[%s6762_s3 + $0x7ac] ss:$16 sps:$4 sm:$0xff]  }
 0x200   :  { %3268 = vmatpush1.bf16.msra.mxu1 %v5274_v2  ;;  %3299 = vmatprep.mubr.bf16.mxu1 %v5375_v29 }
 0x201   :  { %3269 = vmatprep.subr.bf16.mxu1 %v5282_v31  ;;  %v5334_v31 = vld [vmem:[%s6762_s3 + $0x7a8] ss:$16 sps:$4 sm:$0xff]  }
 0x202   :  { %3601 = vmatpush1.bf16.msra.mxu0 %v5277_v5 }
 0x203   :  { %3602 = vmatprep.subr.bf16.mxu0 %v5285_v6 }
 0x204   :  { %3270 = vmatpush1.bf16.msra.mxu1 %v5280_v12  ;;  %v5339_v12 = vld [vmem:[%s6762_s3 + $0x7cc] ss:$16 sps:$4 sm:$0xff]  }
 0x205   :  { %3271 = vmatprep.subr.bf16.mxu1 %v5288_v8 }
 0x206   :  { %3603 = vmatpush1.bf16.msra.mxu0 %v5283_v35 }
 0x207   :  { %3604 = vmatprep.subr.bf16.mxu0 %v5291_v9 }
 0x208   :  { %3272 = vmatpush1.bf16.msra.mxu1 %v5286_v3 }
 0x209   :  { %3273 = vmatprep.subr.bf16.mxu1 %v5294_v0 }
 0x20a   :  { %3605 = vmatpush1.bf16.msra.mxu0 %v5289_v17 }
 0x20b   :  { %3784 = vmatprep.subr.bf16.mxu0 %v5297_v11 }
 0x20c   :  { %3274 = vmatpush1.bf16.msra.mxu1 %v5292_v13 }
 0x20d   :  { %4605 = vmatmul.mubr.msk.bf16.vlgmr.msra.gmra.mrb[100].mxu0 %vm570_vm0, %v6551_v16  ;;  %3453 = vmatprep.subr.bf16.mxu1 %v5300_v15  ;;  %v5342_v15 = vld [vmem:[%s6762_s3 + $0x7ec] ss:$16 sps:$4 sm:$0xff]  }
 0x20e   :  { %3785 = vmatpush1.bf16.msra.mxu0 %v5295_v33  ;;  %3816 = vmatprep.mubr.bf16.mxu0 %v5375_v29  ;;  %v5340_v33 = vld [vmem:[%s6762_s3 + $0x7e8] ss:$16 sps:$4 sm:$0xff]  }
 0x20f   :  { %4570 = vmatmul.mubr.msk.bf16.vlgmr.msra.gmra.mrb[84].mxu1 %vm570_vm0, %v6437_v47  ;;  %3786 = vmatprep.subr.bf16.mxu0 %v5303_v19  ;;  %v3684_v47 = vpack.c.bf16 %v901_v45, %v901_v45 }
 0x210   :  { %3454 = vmatpush1.bf16.msra.mxu1 %v5298_v20  ;;  %v1218_v7 = vpop.f32.mrb[48].mxu0  ;;  %3485 = vmatprep.mubr.bf16.mxu1 %v5375_v29 }
 0x211   :  { %v1220_v26 = vpop.f32.mrb[49].mxu0  ;;  %3455 = vmatprep.subr.bf16.mxu1 %v5306_v21 }
 0x212   :  { %3787 = vmatpush1.bf16.msra.mxu0 %v5301_v23  ;;  %v1053_v53 = vpop.f32.mrb[32].mxu1  ;;  %v1222_v28 = vpop.f32.mrb[50].mxu0 }
 0x213   :  { %v1219_v30 = vadd.f32 %v1218_v7, %v1053_v53  ;;  %v1055_v14 = vpop.f32.mrb[33].mxu1  ;;  %v1223_v34 = vpop.f32.mrb[51].mxu0  ;;  %3788 = vmatprep.subr.bf16.mxu0 %v5309_v50 }
 0x214   :  { %v1221_v38 = vadd.f32 %v1220_v26, %v1055_v14  ;;  %3456 = vmatpush1.bf16.msra.mxu1 %v5304_v4  ;;  %v1057_v39 = vpop.f32.mrb[34].mxu1 }
 0x215   :  { %v1058_v42 = vpop.f32.mrb[35].mxu1  ;;  %3457 = vmatprep.subr.bf16.mxu1 %v5312_v27 }
 0x216   :  { %3789 = vmatpush1.bf16.msra.mxu0 %v5307_v18 }
 0x217   :  { %3790 = vmatprep.subr.bf16.mxu0 %v5315_v36 }
 0x218   :  { %3458 = vmatpush1.bf16.msra.mxu1 %v5310_v41 }
 0x219   :  { %3459 = vmatprep.subr.bf16.mxu1 %v5318_v43 }
 0x21a   :  { %3791 = vmatpush1.bf16.msra.mxu0 %v5313_v44 }
 0x21c   :  { %3460 = vmatpush1.bf16.msra.mxu1 %v5316_v25  ;;  %v5343_v25 = vld [vmem:[%s6764_s5 + $0x40] sm:$0xff]  }
 0x21d   :  { %4623 = vmatmul.mubr.msk.bf16.vlgmr.msra.gmra.mrb[104].mxu0 %vm570_vm0, %v3684_v47  ;;  %3639 = vmatprep.subr.bf16.mxu1 %v5321_v37  ;;  %v5344_v37 = vld [vmem:[%s6764_s5] sm:$0xff]  }
 0x21e   :  { %4798 = vmatprep.subr.bf16.mxu0 %v5343_v25  ;;  %v5370_v25 = vld [vmem:[%s6764_s5 + $0xa8] sm:$0xff]  }
 0x21f   :  { %4588 = vmatmul.mubr.msk.bf16.vlgmr.msra.gmra.mrb[88].mxu1 %vm570_vm0, %v6494_v57  ;;  %v5331_v57 = vld [vmem:[%s6762_s3 + $0x788] ss:$16 sps:$4 sm:$0xff]   ;;  %4799 = vmatpush3.bf16.msra.mxu0 %v5344_v37 }
 0x220   :  { %v1400_v51 = vpop.f32.mrb[52].mxu0  ;;  %3640 = vmatpush1.bf16.msra.mxu1 %v5319_v48  ;;  %3671 = vmatprep.mubr.bf16.mxu1 %v5375_v29  ;;  %v5346_v48 = vld [vmem:[%s6764_s5 + $0x8] sm:$0xff]  }
 0x221   :  { %v1448_v55 = vadd.f32 %v1400_v51, %v1219_v30  ;;  %v1402_v24 = vpop.f32.mrb[53].mxu0  ;;  %3641 = vmatprep.subr.bf16.mxu1 %v5324_v40 }
 0x222   :  { %v1449_v52 = vadd.f32 %v1402_v24, %v1221_v38  ;;  %v1094_v60 = vpop.f32.mrb[36].mxu1  ;;  %v1404_v56 = vpop.f32.mrb[54].mxu0 }
 0x223   :  { %v1096_v62 = vpop.f32.mrb[37].mxu1  ;;  %v1405_v58 = vpop.f32.mrb[55].mxu0 }
 0x224   :  { %v1098_v46 = vpop.f32.mrb[38].mxu1  ;;  %3642 = vmatpush1.bf16.msra.mxu1 %v5322_v54 }
 0x225   :  { %v1099_v59 = vpop.f32.mrb[39].mxu1  ;;  %3643 = vmatprep.subr.bf16.mxu1 %v5327_v32 }
 0x228   :  { %3644 = vmatpush1.bf16.msra.mxu1 %v5325_v1 }
 0x229   :  { %3645 = vmatprep.subr.bf16.mxu1 %v5330_v49  ;;  %v5349_v49 = vld [vmem:[%s6764_s5 + $0x58] sm:$0xff]  }
 0x22c   :  { %3646 = vmatpush1.bf16.msra.mxu1 %v5328_v61  ;;  %v5350_v61 = vld [vmem:[%s6764_s5 + $0x18] sm:$0xff]  }
 0x22d   :  { %3825 = vmatprep.subr.bf16.mxu1 %v5333_v22  ;;  %v5351_v22 = vld [vmem:[%s6764_s5 + $0x60] sm:$0xff]  }
 0x22f   :  { %4606 = vmatmul.mubr.msk.bf16.vlgmr.msra.gmra.mrb[92].mxu1 %vm570_vm0, %v6551_v16 }
 0x230   :  { %v1586_v2 = vpop.f32.mrb[56].mxu0  ;;  %3826 = vmatpush1.bf16.msra.mxu1 %v5331_v57  ;;  %3857 = vmatprep.mubr.bf16.mxu1 %v5375_v29  ;;  %v5337_v29 = vld [vmem:[%s6762_s3 + $0x7c8] ss:$16 sps:$4 sm:$0xff]   ;;  %v5352_v57 = vld [vmem:[%s6764_s5 + $0x20] sm:$0xff]  }
 0x231   :  { %v1634_v5 = vadd.f32 %v1586_v2, %v1448_v55  ;;  %v1588_v6 = vpop.f32.mrb[57].mxu0  ;;  %3827 = vmatprep.subr.bf16.mxu1 %v5336_v63  ;;  %v5347_v55 = vld [vmem:[%s6764_s5 + $0x50] sm:$0xff]   ;;  %v5353_v63 = vld [vmem:[%s6764_s5 + $0x68] sm:$0xff]  }
 0x232   :  { %v1635_v8 = vadd.f32 %v1588_v6, %v1449_v52  ;;  %v1259_v35 = vpop.f32.mrb[40].mxu1  ;;  %v1590_v9 = vpop.f32.mrb[58].mxu0  ;;  %v5354_v2 = vld [vmem:[%s6764_s5 + $0x28] sm:$0xff]  }
 0x233   :  { %v1260_v3 = vadd.f32 %v1259_v35, %v1094_v60  ;;  %v1261_v0 = vpop.f32.mrb[41].mxu1  ;;  %v1591_v17 = vpop.f32.mrb[59].mxu0  ;;  %v5348_v60 = vld [vmem:[%s6764_s5 + $0x10] sm:$0xff]  }
 0x234   :  { %v1262_v10 = vadd.f32 %v1261_v0, %v1096_v62  ;;  %v1263_v11 = vpop.f32.mrb[42].mxu1  ;;  %3828 = vmatpush1.bf16.msra.mxu1 %v5334_v31 }
 0x235   :  { %v1264_v13 = vpop.f32.mrb[43].mxu1  ;;  %3829 = vmatprep.subr.bf16.mxu1 %v5339_v12  ;;  %v5355_v12 = vld [vmem:[%s6764_s5 + $0x70] sm:$0xff]  }
 0x238   :  { %3830 = vmatpush1.bf16.msra.mxu1 %v5337_v29 }
 0x239   :  { %3831 = vmatprep.subr.bf16.mxu1 %v5342_v15  ;;  %v5357_v15 = vld [vmem:[%s6764_s5 + $0x78] sm:$0xff]  }
 0x23c   :  { %3832 = vmatpush1.bf16.msra.mxu1 %v5340_v33  ;;  %v5358_v33 = vld [vmem:[%s6764_s5 + $0x38] sm:$0xff]  }
 0x23f   :  { %4624 = vmatmul.mubr.msk.bf16.vlgmr.msra.gmra.mrb[96].mxu1 %vm570_vm0, %v3684_v47  ;;  %v5345_v47 = vld [vmem:[%s6764_s5 + $0x48] sm:$0xff]  }
 0x240   :  { %v1772_v16 = vpop.f32.mrb[60].mxu0  ;;  %4800 = vmatprep.subr.bf16.mxu0 %v5345_v47 }
 0x241   :  { %v1820_v19 = vadd.f32 %v1772_v16, %v1634_v5  ;;  %v1774_v20 = vpop.f32.mrb[61].mxu0  ;;  %4801 = vmatpush3.bf16.msra.mxu0 %v5346_v48  ;;  %v5359_v16 = vld [vmem:[%s6764_s5 + $0xc0] sm:$0xff]  }
 0x242   :  { %v1821_v21 = vadd.f32 %v1774_v20, %v1635_v8  ;;  %v1441_v23 = vpop.f32.mrb[44].mxu1  ;;  %v1776_v50 = vpop.f32.mrb[62].mxu0  ;;  %4802 = vmatprep.subr.bf16.mxu0 %v5347_v55  ;;  %v5361_v20 = vld [vmem:[%s6764_s5 + $0xc8] sm:$0xff]   ;;  %4820 = vmatprep.subr.bf16.mxu1 %v5359_v16 }
 0x243   :  { %v1450_v7 = vadd.f32 %v1441_v23, %v1260_v3  ;;  %v1443_v4 = vpop.f32.mrb[45].mxu1  ;;  %v1777_v26 = vpop.f32.mrb[63].mxu0  ;;  %v5356_v3 = vld [vmem:[%s6764_s5 + $0x30] sm:$0xff]   ;;  %v5362_v23 = vld [vmem:[%s6764_s5 + $0x88] sm:$0xff]  }
 0x244   :  { %v1451_v27 = vadd.f32 %v1443_v4, %v1262_v10  ;;  %v1445_v53 = vpop.f32.mrb[46].mxu1 }
 0x245   :  { %v1446_v28 = vpop.f32.mrb[47].mxu1  ;;  %4803 = vmatpush3.bf16.msra.mxu0 %v5348_v60 }
 0x246   :  { %4804 = vmatprep.subr.bf16.mxu0 %v5349_v49 }
 0x249   :  { %4805 = vmatpush3.bf16.msra.mxu0 %v5350_v61 }
 0x24a   :  { %4806 = vmatprep.subr.bf16.mxu0 %v5351_v22 }
 0x24d   :  { %4807 = vmatpush3.bf16.msra.mxu0 %v5352_v57 }
 0x24e   :  { %4808 = vmatprep.subr.bf16.mxu0 %v5353_v63 }
 0x250   :  { %v1958_v18 = vpop.f32.mrb[64].mxu0 }
 0x251   :  { %v2006_v30 = vadd.f32 %v1958_v18, %v1820_v19  ;;  %v1960_v14 = vpop.f32.mrb[65].mxu0  ;;  %4809 = vmatpush3.bf16.msra.mxu0 %v5354_v2  ;;  %v5360_v19 = vld [vmem:[%s6764_s5 + $0x80] sm:$0xff]  }
 0x252   :  { %v2007_v34 = vadd.f32 %v1960_v14, %v1821_v21  ;;  %v1627_v36 = vpop.f32.mrb[48].mxu1  ;;  %v1962_v38 = vpop.f32.mrb[66].mxu0  ;;  %4810 = vmatprep.subr.bf16.mxu0 %v5355_v12  ;;  %4821 = vmatpush3.bf16.msra.mxu1 %v5360_v19 }
 0x253   :  { %v1636_v39 = vadd.f32 %v1627_v36, %v1450_v7  ;;  %v1629_v41 = vpop.f32.mrb[49].mxu1  ;;  %v1963_v42 = vpop.f32.mrb[67].mxu0  ;;  %4822 = vmatprep.subr.bf16.mxu1 %v5361_v20  ;;  %v5364_v36 = vld [vmem:[%s6764_s5 + $0x90] sm:$0xff]  }
 0x254   :  { %v1637_v43 = vadd.f32 %v1629_v41, %v1451_v27  ;;  %v1631_v44 = vpop.f32.mrb[50].mxu1  ;;  %v5366_v41 = vld [vmem:[%s6764_s5 + $0x98] sm:$0xff]   ;;  %v5367_v42 = vld [vmem:[%s6764_s5 + $0xe0] sm:$0xff]  }
 0x255   :  { %v1632_v45 = vpop.f32.mrb[51].mxu1  ;;  %4811 = vmatpush3.bf16.msra.mxu0 %v5356_v3  ;;  %v5369_v44 = vld [vmem:[%s6764_s5 + $0xe8] sm:$0xff]  }
 0x256   :  { %4812 = vmatprep.subr.bf16.mxu0 %v5357_v15  ;;  %4823 = vmatpush3.bf16.msra.mxu1 %v5362_v23 }
 0x259   :  { %4813 = vmatpush3.bf16.msra.mxu0 %v5358_v33 }
 0x260   :  { %v2144_v40 = vpop.f32.mrb[68].mxu0 }
 0x261   :  { %v2192_v51 = vadd.f32 %v2144_v40, %v2006_v30  ;;  %v2146_v54 = vpop.f32.mrb[69].mxu0  ;;  %v5363_v30 = vld [vmem:[%s6764_s5 + $0xd0] sm:$0xff]  }
 0x262   :  { %v2193_v24 = vadd.f32 %v2146_v54, %v2007_v34  ;;  %v1813_v32 = vpop.f32.mrb[52].mxu1  ;;  %v2148_v52 = vpop.f32.mrb[70].mxu0  ;;  %4824 = vmatprep.subr.bf16.mxu1 %v5363_v30 }
 0x263   :  { %v1822_v56 = vadd.f32 %v1813_v32, %v1636_v39  ;;  %v1815_v62 = vpop.f32.mrb[53].mxu1  ;;  %v2149_v58 = vpop.f32.mrb[71].mxu0  ;;  %v5365_v39 = vld [vmem:[%s6764_s5 + $0xd8] sm:$0xff]   ;;  %4825 = vmatpush3.bf16.msra.mxu1 %v5364_v36  ;;  %v5371_v32 = vld [vmem:[%s6764_s5 + $0xf0] sm:$0xff]  }
 0x264   :  { %v1823_v46 = vadd.f32 %v1815_v62, %v1637_v43  ;;  %v1817_v1 = vpop.f32.mrb[54].mxu1  ;;  %4826 = vmatprep.subr.bf16.mxu1 %v5365_v39  ;;  %v5368_v43 = vld [vmem:[%s6764_s5 + $0xa0] sm:$0xff]   ;;  %v5373_v58 = vld [vmem:[%s6764_s5 + $0xf8] sm:$0xff]  }
 0x265   :  { %v1818_v59 = vpop.f32.mrb[55].mxu1 }
 0x267   :  { %4827 = vmatpush3.bf16.msra.mxu1 %v5366_v41 }
 0x268   :  { %4828 = vmatprep.subr.bf16.mxu1 %v5367_v42 }
 0x26b   :  { %4829 = vmatpush3.bf16.msra.mxu1 %v5368_v43 }
 0x26c   :  { %4830 = vmatprep.subr.bf16.mxu1 %v5369_v44 }
 0x26f   :  { %4831 = vmatpush3.bf16.msra.mxu1 %v5370_v25 }
 0x270   :  { %v2330_v31 = vpop.f32.mrb[72].mxu0  ;;  %4832 = vmatprep.subr.bf16.mxu1 %v5371_v32  ;;  %v3872_v32 = vlaneseq }
 0x271   :  { %v2378_v5 = vadd.f32 %v2330_v31, %v2192_v51  ;;  %v2332_v6 = vpop.f32.mrb[73].mxu0 }
 0x272   :  { %v2379_v8 = vadd.f32 %v2332_v6, %v2193_v24  ;;  %v1999_v35 = vpop.f32.mrb[56].mxu1  ;;  %v2334_v9 = vpop.f32.mrb[74].mxu0 }
 0x273   :  { %v2008_v0 = vadd.f32 %v1999_v35, %v1822_v56  ;;  %v2001_v17 = vpop.f32.mrb[57].mxu1  ;;  %v2335_v10 = vpop.f32.mrb[75].mxu0  ;;  %v5372_v56 = vld [vmem:[%s6764_s5 + $0xb0] sm:$0xff]  }
 0x274   :  { %v2009_v11 = vadd.f32 %v2001_v17, %v1823_v46  ;;  %v2003_v29 = vpop.f32.mrb[58].mxu1  ;;  %4833 = vmatpush3.bf16.msra.mxu1 %v5372_v56  ;;  %v5374_v46 = vld [vmem:[%s6764_s5 + $0xb8] sm:$0xff]  }
 0x275   :  { %v2004_v13 = vpop.f32.mrb[59].mxu1  ;;  %4834 = vmatprep.subr.bf16.mxu1 %v5373_v58 }
 0x278   :  { %4835 = vmatpush3.bf16.msra.mxu1 %v5374_v46  ;;  %v3870_v46 = vld [vmem:[%s6765_s4] sm:$0xf] }
 0x280   :  { %v2516_v21 = vpop.f32.mrb[76].mxu0 }
 0x281   :  { %v2564_v50 = vadd.f32 %v2516_v21, %v2378_v5  ;;  %v2518_v7 = vpop.f32.mrb[77].mxu0 }
 0x282   :  { %v2565_v4 = vadd.f32 %v2518_v7, %v2379_v8  ;;  %v2185_v26 = vpop.f32.mrb[60].mxu1  ;;  %v2520_v27 = vpop.f32.mrb[78].mxu0 }
 0x283   :  { %v2194_v53 = vadd.f32 %v2185_v26, %v2008_v0  ;;  %v2187_v28 = vpop.f32.mrb[61].mxu1  ;;  %v2521_v18 = vpop.f32.mrb[79].mxu0 }
 0x284   :  { %v2195_v14 = vadd.f32 %v2187_v28, %v2009_v11  ;;  %v2189_v34 = vpop.f32.mrb[62].mxu1 }
 0x285   :  { %v2190_v38 = vpop.f32.mrb[63].mxu1 }
 0x290   :  { %v2702_v45 = vpop.f32.mrb[80].mxu0 }
 0x291   :  { %v2750_v37 = vadd.f32 %v2702_v45, %v2564_v50  ;;  %v2704_v47 = vpop.f32.mrb[81].mxu0 }
 0x292   :  { %v2751_v48 = vadd.f32 %v2704_v47, %v2565_v4  ;;  %v2371_v40 = vpop.f32.mrb[64].mxu1  ;;  %v2706_v51 = vpop.f32.mrb[82].mxu0 }
 0x293   :  { %v2380_v54 = vadd.f32 %v2371_v40, %v2194_v53  ;;  %v2373_v55 = vpop.f32.mrb[65].mxu1  ;;  %v2707_v24 = vpop.f32.mrb[83].mxu0 }
 0x294   :  { %v2381_v52 = vadd.f32 %v2373_v55, %v2195_v14  ;;  %v2375_v60 = vpop.f32.mrb[66].mxu1 }
 0x295   :  { %v2376_v62 = vpop.f32.mrb[67].mxu1 }
 0x296   :  { %v3873_v62 = vshrl.u32 %v3872_v32, 7 }
 0x298   :  { %v3874_v58 = vsub.s32 0, %v3873_v62 }
 0x2a0   :  { %v2888_v1 = vpop.f32.mrb[84].mxu0 }
 0x2a1   :  { %v2936_v59 = vadd.f32 %v2888_v1, %v2750_v37  ;;  %v2890_v49 = vpop.f32.mrb[85].mxu0  ;;  %v3878_v1 = vsub.s32 1, %v3873_v62 }
 0x2a2   :  { %v2937_v61 = vadd.f32 %v2890_v49, %v2751_v48  ;;  %v2557_v22 = vpop.f32.mrb[68].mxu1  ;;  %v2892_v57 = vpop.f32.mrb[86].mxu0 }
 0x2a3   :  { %v2566_v63 = vadd.f32 %v2557_v22, %v2380_v54  ;;  %v2559_v2 = vpop.f32.mrb[69].mxu1  ;;  %v2893_v31 = vpop.f32.mrb[87].mxu0 }
 0x2a4   :  { %v2567_v5 = vadd.f32 %v2559_v2, %v2381_v52  ;;  %v2561_v6 = vpop.f32.mrb[70].mxu1 }
 0x2a5   :  { %v2562_v12 = vpop.f32.mrb[71].mxu1 }
 0x2b0   :  { %v3074_v8 = vpop.f32.mrb[88].mxu0 }
 0x2b1   :  { %v3122_v35 = vadd.f32 %v3074_v8, %v2936_v59  ;;  %v3076_v9 = vpop.f32.mrb[89].mxu0  ;;  %v3875_v59 = vrot.slane %v3870_v46, %v3874_v58 }
 0x2b2   :  { %v3123_v3 = vadd.f32 %v3076_v9, %v2937_v61  ;;  %v2743_v0 = vpop.f32.mrb[72].mxu1  ;;  %v3078_v17 = vpop.f32.mrb[90].mxu0  ;;  %v3879_v61 = vrot.slane %v3870_v46, %v3878_v1 }
 0x2b3   :  { %v2752_v10 = vadd.f32 %v2743_v0, %v2566_v63  ;;  %v2745_v11 = vpop.f32.mrb[73].mxu1  ;;  %v3079_v29 = vpop.f32.mrb[91].mxu0 }
 0x2b4   :  { %v2753_v13 = vadd.f32 %v2745_v11, %v2567_v5  ;;  %v2747_v15 = vpop.f32.mrb[74].mxu1 }
 0x2b5   :  { %v2748_v33 = vpop.f32.mrb[75].mxu1 }
 0x2c0   :  { %v3260_v16 = vpop.f32.mrb[92].mxu0 }
 0x2c1   :  { %v3308_v19 = vadd.f32 %v3260_v16, %v3122_v35  ;;  %v3262_v20 = vpop.f32.mrb[93].mxu0 }
 0x2c2   :  { %v3309_v21 = vadd.f32 %v3262_v20, %v3123_v3  ;;  %v2929_v23 = vpop.f32.mrb[76].mxu1  ;;  %v3264_v50 = vpop.f32.mrb[94].mxu0 }
 0x2c3   :  { %v2938_v7 = vadd.f32 %v2929_v23, %v2752_v10  ;;  %v2931_v4 = vpop.f32.mrb[77].mxu1  ;;  %v3265_v26 = vpop.f32.mrb[95].mxu0  ;;  %v3886_v23 = vsub.s32 3, %v3873_v62 }
 0x2c4   :  { %v2939_v27 = vadd.f32 %v2931_v4, %v2753_v13  ;;  %v2933_v53 = vpop.f32.mrb[78].mxu1 }
 0x2c5   :  { %v2934_v28 = vpop.f32.mrb[79].mxu1  ;;  %v3887_v4 = vrot.slane %v3870_v46, %v3886_v23 }
 0x2d0   :  { %v3446_v18 = vpop.f32.mrb[96].mxu0 }
 0x2d1   :  { %v3494_v30 = vadd.f32 %v3446_v18, %v3308_v19  ;;  %v3448_v14 = vpop.f32.mrb[97].mxu0 }
 0x2d2   :  { %v3495_v34 = vadd.f32 %v3448_v14, %v3309_v21  ;;  %v3115_v36 = vpop.f32.mrb[80].mxu1  ;;  %v3450_v38 = vpop.f32.mrb[98].mxu0  ;;  %v3882_v21 = vsub.s32 2, %v3873_v62 }
 0x2d3   :  { %v3124_v39 = vadd.f32 %v3115_v36, %v2938_v7  ;;  %v3117_v41 = vpop.f32.mrb[81].mxu1  ;;  %v3451_v42 = vpop.f32.mrb[99].mxu0 }
 0x2d4   :  { %v3125_v43 = vadd.f32 %v3117_v41, %v2939_v27  ;;  %v3119_v44 = vpop.f32.mrb[82].mxu1  ;;  %v3883_v50 = vrot.slane %v3870_v46, %v3882_v21 }
 0x2d5   :  { %v3120_v45 = vpop.f32.mrb[83].mxu1 }
 0x2e0   :  { %v3632_v25 = vpop.f32.mrb[100].mxu0 }
 0x2e1   :  { %v3680_v37 = vadd.f32 %v3632_v25, %v3494_v30  ;;  %v3634_v47 = vpop.f32.mrb[101].mxu0  ;;  %v4625_v25 = vld [vmem:[%s6766_s6] ss:$0 sm:$0xff] }
 0x2e2   :  { %v3681_v48 = vadd.f32 %v3634_v47, %v3495_v34  ;;  %v3301_v40 = vpop.f32.mrb[84].mxu1  ;;  %v3636_v51 = vpop.f32.mrb[102].mxu0 }
 0x2e3   :  { %v3310_v54 = vadd.f32 %v3301_v40, %v3124_v39  ;;  %v3303_v55 = vpop.f32.mrb[85].mxu1  ;;  %v3637_v24 = vpop.f32.mrb[103].mxu0 }
 0x2e4   :  { %v3311_v52 = vadd.f32 %v3303_v55, %v3125_v43  ;;  %v3305_v60 = vpop.f32.mrb[86].mxu1 }
 0x2e5   :  { %v3306_v56 = vpop.f32.mrb[87].mxu1 }
 0x2f0   :  { %v3818_v49 = vpop.f32.mrb[104].mxu0 }
 0x2f1   :  { %v3866_v22 = vadd.f32 %v3818_v49, %v3680_v37  ;;  %v3820_v57 = vpop.f32.mrb[105].mxu0 }
 0x2f2   :  { %v3867_v63 = vadd.f32 %v3820_v57, %v3681_v48  ;;  %v3487_v2 = vpop.f32.mrb[88].mxu1  ;;  %v3822_v31 = vpop.f32.mrb[106].mxu0 }
 0x2f3   :  { %v3892_v5 = vadd.f32 %v3875_v59, %v3866_v22  ;;  %v3496_v6 = vadd.f32 %v3487_v2, %v3310_v54  ;;  %v3489_v12 = vpop.f32.mrb[89].mxu1  ;;  %v3823_v8 = vpop.f32.mrb[107].mxu0 }
 0x2f4   :  { %v3893_v35 = vadd.f32 %v3879_v61, %v3867_v63  ;;  %v3497_v9 = vadd.f32 %v3489_v12, %v3311_v52  ;;  %v3491_v3 = vpop.f32.mrb[90].mxu1 }
 0x2f5   :  { %v3896_v0 = vmax.f32 %v3892_v5, 0.0  ;;  %v3492_v17 = vpop.f32.mrb[91].mxu1 }
 0x2f6   :  { %v3897_v10 = vmax.f32 %v3893_v35, 0.0 }
 0x2f7   :  { %v3900_v29 = vpack.c.bf16 %v3896_v0, %v3896_v0 }
 0x2f8   :  { %v3901_v11 = vpack.c.bf16 %v3897_v10, %v3897_v10 }
 0x2fa   :  { %4199 = vmatprep.mubr.bf16.mxu0 %v3901_v11 }
 0x2fb   :  { %4200 = vmatmul.mubr.bf16.vlgmr.msra.gmra.mrb[108].mxu0 %v3900_v29 }
 0x302   :  { %v3673_v13 = vpop.f32.mrb[92].mxu1 }
 0x303   :  { %v3682_v15 = vadd.f32 %v3673_v13, %v3496_v6  ;;  %v3675_v33 = vpop.f32.mrb[93].mxu1 }
 0x304   :  { %v3683_v16 = vadd.f32 %v3675_v33, %v3497_v9  ;;  %v3677_v19 = vpop.f32.mrb[94].mxu1 }
 0x305   :  { %v3678_v20 = vpop.f32.mrb[95].mxu1 }
 0x312   :  { %v3859_v7 = vpop.f32.mrb[96].mxu1 }
 0x313   :  { %v3868_v26 = vadd.f32 %v3859_v7, %v3682_v15  ;;  %v3861_v27 = vpop.f32.mrb[97].mxu1 }
 0x314   :  { %v3869_v53 = vadd.f32 %v3861_v27, %v3683_v16  ;;  %v3863_v28 = vpop.f32.mrb[98].mxu1 }
 0x315   :  { %v3894_v18 = vadd.f32 %v3883_v50, %v3868_v26  ;;  %v3864_v30 = vpop.f32.mrb[99].mxu1 }
 0x316   :  { %v3895_v14 = vadd.f32 %v3887_v4, %v3869_v53 }
 0x317   :  { %v3898_v34 = vmax.f32 %v3894_v18, 0.0 }
 0x318   :  { %v3899_v36 = vmax.f32 %v3895_v14, 0.0 }
 0x319   :  { %v3902_v39 = vpack.c.bf16 %v3898_v34, %v3898_v34 }
 0x31a   :  { %v3903_v38 = vpack.c.bf16 %v3899_v36, %v3899_v36 }
 0x31c   :  { %4239 = vmatprep.mubr.bf16.mxu1 %v3903_v38 }
 0x31d   :  { %4240 = vmatmul.mubr.bf16.vlgmr.msra.gmra.mrb[100].mxu1 %v3902_v39 }
 0x3ce   :  { %v4814_v41 = vpop.f32.mrb[108].mxu0 }
 0x3cf   :  { %v4815_v42 = vpop.f32.mrb[109].mxu0 }
 0x3d0   :  { %v4816_v43 = vadd.f32 %v4815_v42, %v4814_v41  ;;  %v4817_v44 = vpop.f32.mrb[110].mxu0 }
 0x3d1   :  { %v4818_v45 = vpop.f32.mrb[111].mxu0 }
 0x3d2   :  { %v4202_v48 = vadd.f32 %v4816_v43, %v4625_v25 }
 0x3f0   :  { %v4836_v37 = vpop.f32.mrb[100].mxu1 }
 0x3f1   :  { %v4837_v47 = vpop.f32.mrb[101].mxu1 }
 0x3f2   :  { %v4838_v40 = vadd.f32 %v4837_v47, %v4836_v37  ;;  %v4839_v51 = vpop.f32.mrb[102].mxu1 }
 0x3f3   :  { %v4840_v54 = vpop.f32.mrb[103].mxu1 }
 0x3f4   :  { %v4242_v55 = vadd.f32 %v4838_v40, %v4202_v48 }
 0x3f6   :  { %4247 = vst [vmem:[%s6767_s7] sm:$0xff] %v4242_v55 }

</bundles_post_ra>
